<compile_context>
chip_gen: v6e
topology: v6e:2x2x1
jax: 0.10.0
libtpu: 0.0.40
codegen_flags: <defaults>
</compile_context>

<pallas_src>
import functools

import jax
import jax.numpy as jnp
from jax import lax
from jax.experimental import pallas as pl
from jax.experimental.pallas import tpu as pltpu

EPS = 1e-5  # PyTorch BatchNorm default eps


# ----------------------------------------------------------------------------
# Pallas kernel: fused conv1+shortcut matmul, BN1+ReLU, conv2 as a single
# im2col matmul, BN2, shortcut BN, residual add, final ReLU.
# ----------------------------------------------------------------------------
def _conv_block_kernel(N, OH, OW, K, Cin, C1, C2,
                       ph00_ref, ph01_ref, ph10_ref, ph11_ref,
                       wfused_ref, w2_ref,
                       g1_ref, b1_ref, g2_ref, b2_ref, gsc_ref, bsc_ref,
                       out_ref, ypad_ref):
    M = N * OH * OW
    pd = K // 2
    inv_m = 1.0 / M

    def bn(x, g_ref, b_ref):
        # training-mode BatchNorm, single reduction pass:
        # biased var = E[x^2] - E[x]^2, all in f32.
        s = jnp.sum(x, axis=0, keepdims=True)
        s2 = jnp.sum(x * x, axis=0, keepdims=True)
        mu = s * inv_m
        var = s2 * inv_m - mu * mu
        return (x - mu) * lax.rsqrt(var + EPS) * g_ref[...] + b_ref[...]

    phases = ((ph00_ref, ph01_ref), (ph10_ref, ph11_ref))

    # --- conv1 + shortcut: ONE fused im2col matmul -------------------------
    # tap (kh, kw) of the stride-2 conv reads padded-input row kh + 2*oh,
    # col kw + 2*ow  ==  phase[kh%2][kw%2][kh//2 + oh, kw//2 + ow]  (unit-
    # stride, contiguous slices only).
    taps1 = []
    for kh in range(K):
        for kw in range(K):
            ph = phases[kh % 2][kw % 2]
            r0, c0 = kh // 2, kw // 2
            taps1.append(ph[:, r0:r0 + OH, c0:c0 + OW, :].reshape(M, Cin))
    p1 = jnp.concatenate(taps1, axis=-1).astype(jnp.bfloat16)   # (M, K*K*Cin)
    y0 = jnp.dot(p1, wfused_ref[...],
                 preferred_element_type=jnp.float32)            # (M, C1+C2)

    y1 = jnp.maximum(bn(y0[:, :C1], g1_ref, b1_ref), 0.0)       # BN1 + ReLU
    sc = bn(y0[:, C1:], gsc_ref, bsc_ref)                       # shortcut BN

    # --- conv2: zero-padded scratch + ONE im2col matmul (contraction 36) ---
    ypad_ref[...] = jnp.zeros(ypad_ref.shape, ypad_ref.dtype)
    ypad_ref[:, pd:pd + OH, pd:pd + OW, :] = y1.reshape(N, OH, OW, C1)

    taps2 = []
    for kh in range(K):
        for kw in range(K):
            taps2.append(
                ypad_ref[:, kh:kh + OH, kw:kw + OW, :].reshape(M, C1))
    p2 = jnp.concatenate(taps2, axis=-1).astype(jnp.bfloat16)   # (M, K*K*C1)
    y2 = bn(jnp.dot(p2, w2_ref[...], preferred_element_type=jnp.float32),
            g2_ref, b2_ref)                                     # (M, C2)

    # --- residual add + ReLU ------------------------------------------------
    out_ref[...] = jnp.maximum(y2 + sc, 0.0)


# ----------------------------------------------------------------------------
# Wrapper: NCHW <-> NHWC plumbing, stride-2 phase split, weight packing.
# ----------------------------------------------------------------------------
def conv_block_forward(x_nchw, params, *, kernel_size=3, stride=2, padding=1):
    w1, w2, wsc, g1, b1, g2, b2, gsc, bsc = params
    N, Cin, H, W = x_nchw.shape
    K = kernel_size
    assert stride == 2 and K % 2 == 1 and padding == K // 2, \
        "implemented for the module's default config (odd k, stride=2, pad=k//2)"
    C1, C2 = w1.shape[-1], w2.shape[-1]
    OH = (H + 2 * padding - K) // stride + 1
    OW = (W + 2 * padding - K) // stride + 1
    M = N * OH * OW

    x_nhwc = jnp.transpose(x_nchw, (0, 2, 3, 1)).astype(jnp.float32)

    # Zero-pad and split into the 4 stride-2 phases (pure layout, ~1x input
    # bytes in HBM instead of the previous 9x im2col expansion).
    PH, PW = OH + K // 2, OW + K // 2
    xp = jnp.pad(x_nhwc, ((0, 0),
                          (padding, 2 * PH - H - padding),
                          (padding, 2 * PW - W - padding),
                          (0, 0)))
    ph = [[xp[:, r::2, c::2, :] for c in range(2)] for r in range(2)]

    # Fused conv1 + shortcut weight: shortcut (1x1, stride 2) is exactly the
    # centre tap of the stride-2 k x k window, so its weight sits on the
    # centre-tap rows of the fused (K*K*Cin, C1+C2) matrix.
    KKC = K * K * Cin
    w1f = w1.reshape(KKC, C1)                       # (kh, kw, cin) order
    ctap = (K // 2) * K + (K // 2)
    wsc_emb = jnp.zeros((KKC, C2), jnp.float32)
    wsc_emb = wsc_emb.at[ctap * Cin:(ctap + 1) * Cin, :].set(
        wsc.reshape(Cin, C2))
    wfused = jnp.concatenate([w1f, wsc_emb], axis=1).astype(jnp.bfloat16)
    w2f = w2.reshape(K * K * C1, C2).astype(jnp.bfloat16)

    kern = functools.partial(_conv_block_kernel, N, OH, OW, K, Cin, C1, C2)
    out_flat = pl.pallas_call(
        kern,
        out_shape=jax.ShapeDtypeStruct((M, C2), jnp.float32),
        in_specs=[pl.BlockSpec(memory_space=pltpu.MemorySpace.VMEM)] * 12,
        out_specs=pl.BlockSpec(memory_space=pltpu.MemorySpace.VMEM),
        scratch_shapes=[pltpu.VMEM(
            (N, OH + 2 * padding, OW + 2 * padding, C1), jnp.float32)],
        compiler_params=pltpu.CompilerParams(
            vmem_limit_bytes=32 * 1024 * 1024),
    )(ph[0][0], ph[0][1], ph[1][0], ph[1][1], wfused, w2f,
      g1, b1, g2, b2, gsc, bsc)

    out = out_flat.reshape(N, OH, OW, C2)
    return jnp.transpose(out, (0, 3, 1, 2))                     # back to NCHW


# ----------------------------------------------------------------------------
# Deterministic parameter init (shapes from ConvBlock.__init__).
# ----------------------------------------------------------------------------
def init_params(key, in_channel, filter_channel, kernel_size):
    c1 = filter_channel // 4
    c2 = filter_channel
    k = kernel_size
    k1, k2, k3 = jax.random.split(key, 3)
    w1 = jax.random.normal(k1, (k, k, in_channel, c1), jnp.float32) \
        * (1.0 / (k * k * in_channel)) ** 0.5
    w2 = jax.random.normal(k2, (k, k, c1, c2), jnp.float32) \
        * (1.0 / (k * k * c1)) ** 0.5
    wsc = jax.random.normal(k3, (1, 1, in_channel, c2), jnp.float32) \
        * (1.0 / in_channel) ** 0.5
    # BatchNorm affine params: PyTorch default init weight=1, bias=0
    g1, b1 = jnp.ones((1, c1), jnp.float32), jnp.zeros((1, c1), jnp.float32)
    g2, b2 = jnp.ones((1, c2), jnp.float32), jnp.zeros((1, c2), jnp.float32)
    gsc, bsc = jnp.ones((1, c2), jnp.float32), jnp.zeros((1, c2), jnp.float32)
    return (w1, w2, wsc, g1, b1, g2, b2, gsc, bsc)


# ----------------------------------------------------------------------------
# Pure-JAX reference (lax convs). matmul_dtype lets us build an
# apples-to-apples bf16-operand reference in addition to the full-f32 one.
# ----------------------------------------------------------------------------
def reference_forward(x_nchw, params, *, kernel_size=3, stride=2, padding=1,
                      matmul_dtype=jnp.float32):
    w1, w2, wsc, g1, b1, g2, b2, gsc, bsc = params
    dn = ('NHWC', 'HWIO', 'NHWC')
    x = jnp.transpose(x_nchw, (0, 2, 3, 1)).astype(jnp.float32)

    def conv(lhs, rhs, strides, pads):
        return lax.conv_general_dilated(
            lhs.astype(matmul_dtype), rhs.astype(matmul_dtype), strides, pads,
            dimension_numbers=dn, preferred_element_type=jnp.float32)

    def bn(y, g, b):
        mu = y.mean(axis=(0, 1, 2), keepdims=True)
        var = ((y - mu) ** 2).mean(axis=(0, 1, 2), keepdims=True)
        return (y - mu) * lax.rsqrt(var + EPS) * g.reshape(1, 1, 1, -1) \
            + b.reshape(1, 1, 1, -1)

    p = [(padding, padding)] * 2
    y = conv(x, w1, (stride, stride), p)
    y = jnp.maximum(bn(y, g1, b1), 0.0)
    y = conv(y, w2, (1, 1), p)
    y = bn(y, g2, b2)
    s = conv(x, wsc, (stride, stride), [(0, 0), (0, 0)])
    s = bn(s, gsc, bsc)
    out = jnp.maximum(y + s, 0.0)
    return jnp.transpose(out, (0, 3, 1, 2))


if __name__ == "__main__":
    # ConvBlock(in_channel=4, filter_channel=16, kernel_size=3, stride=2,
    #           n_input_dims=4, padding=1, bias=False, act_fn='relu')
    key = jax.random.PRNGKey(0)
    kx, kp = jax.random.split(key)
    x = jax.random.normal(kx, (2, 4, 16, 16), jnp.float32)   # NCHW input
    params = init_params(kp, in_channel=4, filter_channel=16, kernel_size=3)

    out = jax.block_until_ready(conv_block_forward(x, params))
    assert out.shape == (2, 16, 8, 8), out.shape

    # Apples-to-apples check: lax reference with the same bf16 MXU operands.
    ref_bf16 = reference_forward(x, params, matmul_dtype=jnp.bfloat16)
    assert jnp.allclose(out, ref_bf16, atol=1e-2, rtol=1e-2), \
        float(jnp.max(jnp.abs(out - ref_bf16)))

    # Sanity check vs. the full-f32 reference (loose: bf16 matmul operands).
    ref_f32 = reference_forward(x, params, matmul_dtype=jnp.float32)
    assert jnp.allclose(out, ref_f32, atol=1e-1, rtol=1e-1), \
        float(jnp.max(jnp.abs(out - ref_f32)))

    print("KERNEL_OK")
</pallas_src>

<mosaic_0001>
module attributes {stable_mosaic.version = 11 : i64} {
  func.func @_conv_block_kernel(%arg0: memref<2x9x9x4xf32, #tpu.memory_space<vmem>>, %arg1: memref<2x9x9x4xf32, #tpu.memory_space<vmem>>, %arg2: memref<2x9x9x4xf32, #tpu.memory_space<vmem>>, %arg3: memref<2x9x9x4xf32, #tpu.memory_space<vmem>>, %arg4: memref<36x20xbf16, #tpu.memory_space<vmem>>, %arg5: memref<36x16xbf16, #tpu.memory_space<vmem>>, %arg6: memref<1x4xf32, #tpu.memory_space<vmem>>, %arg7: memref<1x4xf32, #tpu.memory_space<vmem>>, %arg8: memref<1x16xf32, #tpu.memory_space<vmem>>, %arg9: memref<1x16xf32, #tpu.memory_space<vmem>>, %arg10: memref<1x16xf32, #tpu.memory_space<vmem>>, %arg11: memref<1x16xf32, #tpu.memory_space<vmem>>, %arg12: memref<128x16xf32, #tpu.memory_space<vmem>>, %arg13: memref<2x10x10x4xf32, #tpu.memory_space<vmem>>) attributes {dimension_semantics = [], scalar_prefetch = 0 : i64, scratch_operands = 1 : i64, tpu.core_type = #tpu.core_type<tc>} {
    %c0 = arith.constant 0 : index
    %c0_0 = arith.constant 0 : index
    %c0_1 = arith.constant 0 : index
    %c0_2 = arith.constant 0 : index
    %0 = vector.load %arg0[%c0, %c0_0, %c0_1, %c0_2] : memref<2x9x9x4xf32, #tpu.memory_space<vmem>>, vector<2x8x8x4xf32>
    %1 = vector.shape_cast %0 : vector<2x8x8x4xf32> to vector<128x4xf32>
    %c0_3 = arith.constant 0 : index
    %c0_4 = arith.constant 0 : index
    %c0_5 = arith.constant 0 : index
    %c0_6 = arith.constant 0 : index
    %2 = vector.load %arg1[%c0_3, %c0_4, %c0_5, %c0_6] : memref<2x9x9x4xf32, #tpu.memory_space<vmem>>, vector<2x8x8x4xf32>
    %3 = vector.shape_cast %2 : vector<2x8x8x4xf32> to vector<128x4xf32>
    %c0_7 = arith.constant 0 : index
    %c0_8 = arith.constant 0 : index
    %c1 = arith.constant 1 : index
    %c0_9 = arith.constant 0 : index
    %4 = vector.load %arg0[%c0_7, %c0_8, %c1, %c0_9] : memref<2x9x9x4xf32, #tpu.memory_space<vmem>>, vector<2x8x8x4xf32>
    %5 = vector.shape_cast %4 : vector<2x8x8x4xf32> to vector<128x4xf32>
    %c0_10 = arith.constant 0 : index
    %c0_11 = arith.constant 0 : index
    %c0_12 = arith.constant 0 : index
    %c0_13 = arith.constant 0 : index
    %6 = vector.load %arg2[%c0_10, %c0_11, %c0_12, %c0_13] : memref<2x9x9x4xf32, #tpu.memory_space<vmem>>, vector<2x8x8x4xf32>
    %7 = vector.shape_cast %6 : vector<2x8x8x4xf32> to vector<128x4xf32>
    %c0_14 = arith.constant 0 : index
    %c0_15 = arith.constant 0 : index
    %c0_16 = arith.constant 0 : index
    %c0_17 = arith.constant 0 : index
    %8 = vector.load %arg3[%c0_14, %c0_15, %c0_16, %c0_17] : memref<2x9x9x4xf32, #tpu.memory_space<vmem>>, vector<2x8x8x4xf32>
    %9 = vector.shape_cast %8 : vector<2x8x8x4xf32> to vector<128x4xf32>
    %c0_18 = arith.constant 0 : index
    %c0_19 = arith.constant 0 : index
    %c1_20 = arith.constant 1 : index
    %c0_21 = arith.constant 0 : index
    %10 = vector.load %arg2[%c0_18, %c0_19, %c1_20, %c0_21] : memref<2x9x9x4xf32, #tpu.memory_space<vmem>>, vector<2x8x8x4xf32>
    %11 = vector.shape_cast %10 : vector<2x8x8x4xf32> to vector<128x4xf32>
    %c0_22 = arith.constant 0 : index
    %c1_23 = arith.constant 1 : index
    %c0_24 = arith.constant 0 : index
    %c0_25 = arith.constant 0 : index
    %12 = vector.load %arg0[%c0_22, %c1_23, %c0_24, %c0_25] : memref<2x9x9x4xf32, #tpu.memory_space<vmem>>, vector<2x8x8x4xf32>
    %13 = vector.shape_cast %12 : vector<2x8x8x4xf32> to vector<128x4xf32>
    %c0_26 = arith.constant 0 : index
    %c1_27 = arith.constant 1 : index
    %c0_28 = arith.constant 0 : index
    %c0_29 = arith.constant 0 : index
    %14 = vector.load %arg1[%c0_26, %c1_27, %c0_28, %c0_29] : memref<2x9x9x4xf32, #tpu.memory_space<vmem>>, vector<2x8x8x4xf32>
    %15 = vector.shape_cast %14 : vector<2x8x8x4xf32> to vector<128x4xf32>
    %c0_30 = arith.constant 0 : index
    %c1_31 = arith.constant 1 : index
    %c1_32 = arith.constant 1 : index
    %c0_33 = arith.constant 0 : index
    %16 = vector.load %arg0[%c0_30, %c1_31, %c1_32, %c0_33] : memref<2x9x9x4xf32, #tpu.memory_space<vmem>>, vector<2x8x8x4xf32>
    %17 = vector.shape_cast %16 : vector<2x8x8x4xf32> to vector<128x4xf32>
    %18 = tpu.concatenate %1, %3, %5, %7, %9, %11, %13, %15, %17 in 1 : vector<128x4xf32>, vector<128x4xf32>, vector<128x4xf32>, vector<128x4xf32>, vector<128x4xf32>, vector<128x4xf32>, vector<128x4xf32>, vector<128x4xf32>, vector<128x4xf32> -> vector<128x36xf32>
    %19 = arith.truncf %18 : vector<128x36xf32> to vector<128x36xbf16>
    %c0_34 = arith.constant 0 : index
    %c0_35 = arith.constant 0 : index
    %20 = vector.load %arg4[%c0_34, %c0_35] : memref<36x20xbf16, #tpu.memory_space<vmem>>, vector<36x20xbf16>
    %cst = arith.constant dense<0.000000e+00> : vector<128x20xf32>
    %21 = tpu.matmul %19, %20, %cst {dimension_numbers = #tpu.dot_dimension_numbers<[1], [0], [0], [1], [0, 0, 1, 1], [], []>} : vector<128x36xbf16>, vector<36x20xbf16>, vector<128x20xf32> -> vector<128x20xf32>
    %22 = vector.extract_strided_slice %21 {offsets = [0, 0], sizes = [128, 4], strides = [1, 1]} : vector<128x20xf32> to vector<128x4xf32>
    %cst_36 = arith.constant dense<0.000000e+00> : vector<4xf32>
    %23 = vector.multi_reduction <add>, %22, %cst_36 [0] : vector<128x4xf32> to vector<4xf32>
    %24 = vector.shape_cast %23 : vector<4xf32> to vector<1x4xf32>
    %25 = arith.mulf %22, %22 : vector<128x4xf32>
    %cst_37 = arith.constant dense<0.000000e+00> : vector<4xf32>
    %26 = vector.multi_reduction <add>, %25, %cst_37 [0] : vector<128x4xf32> to vector<4xf32>
    %27 = vector.shape_cast %26 : vector<4xf32> to vector<1x4xf32>
    %cst_38 = arith.constant 7.812500e-03 : f32
    %28 = vector.broadcast %cst_38 : f32 to vector<1x4xf32>
    %29 = arith.mulf %24, %28 : vector<1x4xf32>
    %cst_39 = arith.constant 7.812500e-03 : f32
    %30 = vector.broadcast %cst_39 : f32 to vector<1x4xf32>
    %31 = arith.mulf %27, %30 : vector<1x4xf32>
    %32 = arith.mulf %29, %29 : vector<1x4xf32>
    %33 = arith.subf %31, %32 : vector<1x4xf32>
    %34 = vector.broadcast %29 : vector<1x4xf32> to vector<128x4xf32>
    %35 = arith.subf %22, %34 : vector<128x4xf32>
    %cst_40 = arith.constant 9.99999974E-6 : f32
    %36 = vector.broadcast %cst_40 : f32 to vector<1x4xf32>
    %37 = arith.addf %33, %36 : vector<1x4xf32>
    %38 = math.rsqrt %37 : vector<1x4xf32>
    %39 = vector.broadcast %38 : vector<1x4xf32> to vector<128x4xf32>
    %40 = arith.mulf %35, %39 : vector<128x4xf32>
    %c0_41 = arith.constant 0 : index
    %c0_42 = arith.constant 0 : index
    %41 = vector.load %arg6[%c0_41, %c0_42] : memref<1x4xf32, #tpu.memory_space<vmem>>, vector<1x4xf32>
    %42 = vector.broadcast %41 : vector<1x4xf32> to vector<128x4xf32>
    %43 = arith.mulf %40, %42 : vector<128x4xf32>
    %c0_43 = arith.constant 0 : index
    %c0_44 = arith.constant 0 : index
    %44 = vector.load %arg7[%c0_43, %c0_44] : memref<1x4xf32, #tpu.memory_space<vmem>>, vector<1x4xf32>
    %45 = vector.broadcast %44 : vector<1x4xf32> to vector<128x4xf32>
    %46 = arith.addf %43, %45 : vector<128x4xf32>
    %cst_45 = arith.constant 0.000000e+00 : f32
    %47 = vector.broadcast %cst_45 : f32 to vector<128x4xf32>
    %48 = arith.maximumf %46, %47 : vector<128x4xf32>
    %49 = vector.extract_strided_slice %21 {offsets = [0, 4], sizes = [128, 16], strides = [1, 1]} : vector<128x20xf32> to vector<128x16xf32>
    %cst_46 = arith.constant dense<0.000000e+00> : vector<16xf32>
    %50 = vector.multi_reduction <add>, %49, %cst_46 [0] : vector<128x16xf32> to vector<16xf32>
    %51 = vector.shape_cast %50 : vector<16xf32> to vector<1x16xf32>
    %52 = arith.mulf %49, %49 : vector<128x16xf32>
    %cst_47 = arith.constant dense<0.000000e+00> : vector<16xf32>
    %53 = vector.multi_reduction <add>, %52, %cst_47 [0] : vector<128x16xf32> to vector<16xf32>
    %54 = vector.shape_cast %53 : vector<16xf32> to vector<1x16xf32>
    %cst_48 = arith.constant 7.812500e-03 : f32
    %55 = vector.broadcast %cst_48 : f32 to vector<1x16xf32>
    %56 = arith.mulf %51, %55 : vector<1x16xf32>
    %cst_49 = arith.constant 7.812500e-03 : f32
    %57 = vector.broadcast %cst_49 : f32 to vector<1x16xf32>
    %58 = arith.mulf %54, %57 : vector<1x16xf32>
    %59 = arith.mulf %56, %56 : vector<1x16xf32>
    %60 = arith.subf %58, %59 : vector<1x16xf32>
    %61 = vector.broadcast %56 : vector<1x16xf32> to vector<128x16xf32>
    %62 = arith.subf %49, %61 : vector<128x16xf32>
    %cst_50 = arith.constant 9.99999974E-6 : f32
    %63 = vector.broadcast %cst_50 : f32 to vector<1x16xf32>
    %64 = arith.addf %60, %63 : vector<1x16xf32>
    %65 = math.rsqrt %64 : vector<1x16xf32>
    %66 = vector.broadcast %65 : vector<1x16xf32> to vector<128x16xf32>
    %67 = arith.mulf %62, %66 : vector<128x16xf32>
    %c0_51 = arith.constant 0 : index
    %c0_52 = arith.constant 0 : index
    %68 = vector.load %arg10[%c0_51, %c0_52] : memref<1x16xf32, #tpu.memory_space<vmem>>, vector<1x16xf32>
    %69 = vector.broadcast %68 : vector<1x16xf32> to vector<128x16xf32>
    %70 = arith.mulf %67, %69 : vector<128x16xf32>
    %c0_53 = arith.constant 0 : index
    %c0_54 = arith.constant 0 : index
    %71 = vector.load %arg11[%c0_53, %c0_54] : memref<1x16xf32, #tpu.memory_space<vmem>>, vector<1x16xf32>
    %72 = vector.broadcast %71 : vector<1x16xf32> to vector<128x16xf32>
    %73 = arith.addf %70, %72 : vector<128x16xf32>
    %cst_55 = arith.constant 0.000000e+00 : f32
    %74 = vector.broadcast %cst_55 : f32 to vector<2x10x10x4xf32>
    %c0_56 = arith.constant 0 : index
    %c0_57 = arith.constant 0 : index
    %c0_58 = arith.constant 0 : index
    %c0_59 = arith.constant 0 : index
    %75 = vector.load %arg13[%c0_56, %c0_57, %c0_58, %c0_59] : memref<2x10x10x4xf32, #tpu.memory_space<vmem>>, vector<2x10x10x4xf32>
    tpu.vector_store %arg13[%c0_56, %c0_57, %c0_58, %c0_59], %74 {strides = array<i32>} : memref<2x10x10x4xf32, #tpu.memory_space<vmem>>, vector<2x10x10x4xf32>,
    %76 = vector.shape_cast %48 : vector<128x4xf32> to vector<2x8x8x4xf32>
    %c0_60 = arith.constant 0 : index
    %c1_61 = arith.constant 1 : index
    %c1_62 = arith.constant 1 : index
    %c0_63 = arith.constant 0 : index
    %77 = vector.load %arg13[%c0_60, %c1_61, %c1_62, %c0_63] : memref<2x10x10x4xf32, #tpu.memory_space<vmem>>, vector<2x8x8x4xf32>
    tpu.vector_store %arg13[%c0_60, %c1_61, %c1_62, %c0_63], %76 {strides = array<i32>} : memref<2x10x10x4xf32, #tpu.memory_space<vmem>>, vector<2x8x8x4xf32>,
    %c0_64 = arith.constant 0 : index
    %c0_65 = arith.constant 0 : index
    %c0_66 = arith.constant 0 : index
    %c0_67 = arith.constant 0 : index
    %78 = vector.load %arg13[%c0_64, %c0_65, %c0_66, %c0_67] : memref<2x10x10x4xf32, #tpu.memory_space<vmem>>, vector<2x8x8x4xf32>
    %79 = vector.shape_cast %78 : vector<2x8x8x4xf32> to vector<128x4xf32>
    %c0_68 = arith.constant 0 : index
    %c0_69 = arith.constant 0 : index
    %c1_70 = arith.constant 1 : index
    %c0_71 = arith.constant 0 : index
    %80 = vector.load %arg13[%c0_68, %c0_69, %c1_70, %c0_71] : memref<2x10x10x4xf32, #tpu.memory_space<vmem>>, vector<2x8x8x4xf32>
    %81 = vector.shape_cast %80 : vector<2x8x8x4xf32> to vector<128x4xf32>
    %c0_72 = arith.constant 0 : index
    %c0_73 = arith.constant 0 : index
    %c2 = arith.constant 2 : index
    %c0_74 = arith.constant 0 : index
    %82 = vector.load %arg13[%c0_72, %c0_73, %c2, %c0_74] : memref<2x10x10x4xf32, #tpu.memory_space<vmem>>, vector<2x8x8x4xf32>
    %83 = vector.shape_cast %82 : vector<2x8x8x4xf32> to vector<128x4xf32>
    %c0_75 = arith.constant 0 : index
    %c1_76 = arith.constant 1 : index
    %c0_77 = arith.constant 0 : index
    %c0_78 = arith.constant 0 : index
    %84 = vector.load %arg13[%c0_75, %c1_76, %c0_77, %c0_78] : memref<2x10x10x4xf32, #tpu.memory_space<vmem>>, vector<2x8x8x4xf32>
    %85 = vector.shape_cast %84 : vector<2x8x8x4xf32> to vector<128x4xf32>
    %c0_79 = arith.constant 0 : index
    %c1_80 = arith.constant 1 : index
    %c1_81 = arith.constant 1 : index
    %c0_82 = arith.constant 0 : index
    %86 = vector.load %arg13[%c0_79, %c1_80, %c1_81, %c0_82] : memref<2x10x10x4xf32, #tpu.memory_space<vmem>>, vector<2x8x8x4xf32>
    %87 = vector.shape_cast %86 : vector<2x8x8x4xf32> to vector<128x4xf32>
    %c0_83 = arith.constant 0 : index
    %c1_84 = arith.constant 1 : index
    %c2_85 = arith.constant 2 : index
    %c0_86 = arith.constant 0 : index
    %88 = vector.load %arg13[%c0_83, %c1_84, %c2_85, %c0_86] : memref<2x10x10x4xf32, #tpu.memory_space<vmem>>, vector<2x8x8x4xf32>
    %89 = vector.shape_cast %88 : vector<2x8x8x4xf32> to vector<128x4xf32>
    %c0_87 = arith.constant 0 : index
    %c2_88 = arith.constant 2 : index
    %c0_89 = arith.constant 0 : index
    %c0_90 = arith.constant 0 : index
    %90 = vector.load %arg13[%c0_87, %c2_88, %c0_89, %c0_90] : memref<2x10x10x4xf32, #tpu.memory_space<vmem>>, vector<2x8x8x4xf32>
    %91 = vector.shape_cast %90 : vector<2x8x8x4xf32> to vector<128x4xf32>
    %c0_91 = arith.constant 0 : index
    %c2_92 = arith.constant 2 : index
    %c1_93 = arith.constant 1 : index
    %c0_94 = arith.constant 0 : index
    %92 = vector.load %arg13[%c0_91, %c2_92, %c1_93, %c0_94] : memref<2x10x10x4xf32, #tpu.memory_space<vmem>>, vector<2x8x8x4xf32>
    %93 = vector.shape_cast %92 : vector<2x8x8x4xf32> to vector<128x4xf32>
    %c0_95 = arith.constant 0 : index
    %c2_96 = arith.constant 2 : index
    %c2_97 = arith.constant 2 : index
    %c0_98 = arith.constant 0 : index
    %94 = vector.load %arg13[%c0_95, %c2_96, %c2_97, %c0_98] : memref<2x10x10x4xf32, #tpu.memory_space<vmem>>, vector<2x8x8x4xf32>
    %95 = vector.shape_cast %94 : vector<2x8x8x4xf32> to vector<128x4xf32>
    %96 = tpu.concatenate %79, %81, %83, %85, %87, %89, %91, %93, %95 in 1 : vector<128x4xf32>, vector<128x4xf32>, vector<128x4xf32>, vector<128x4xf32>, vector<128x4xf32>, vector<128x4xf32>, vector<128x4xf32>, vector<128x4xf32>, vector<128x4xf32> -> vector<128x36xf32>
    %97 = arith.truncf %96 : vector<128x36xf32> to vector<128x36xbf16>
    %c0_99 = arith.constant 0 : index
    %c0_100 = arith.constant 0 : index
    %98 = vector.load %arg5[%c0_99, %c0_100] : memref<36x16xbf16, #tpu.memory_space<vmem>>, vector<36x16xbf16>
    %cst_101 = arith.constant dense<0.000000e+00> : vector<128x16xf32>
    %99 = tpu.matmul %97, %98, %cst_101 {dimension_numbers = #tpu.dot_dimension_numbers<[1], [0], [0], [1], [0, 0, 1, 1], [], []>} : vector<128x36xbf16>, vector<36x16xbf16>, vector<128x16xf32> -> vector<128x16xf32>
    %cst_102 = arith.constant dense<0.000000e+00> : vector<16xf32>
    %100 = vector.multi_reduction <add>, %99, %cst_102 [0] : vector<128x16xf32> to vector<16xf32>
    %101 = vector.shape_cast %100 : vector<16xf32> to vector<1x16xf32>
    %102 = arith.mulf %99, %99 : vector<128x16xf32>
    %cst_103 = arith.constant dense<0.000000e+00> : vector<16xf32>
    %103 = vector.multi_reduction <add>, %102, %cst_103 [0] : vector<128x16xf32> to vector<16xf32>
    %104 = vector.shape_cast %103 : vector<16xf32> to vector<1x16xf32>
    %cst_104 = arith.constant 7.812500e-03 : f32
    %105 = vector.broadcast %cst_104 : f32 to vector<1x16xf32>
    %106 = arith.mulf %101, %105 : vector<1x16xf32>
    %cst_105 = arith.constant 7.812500e-03 : f32
    %107 = vector.broadcast %cst_105 : f32 to vector<1x16xf32>
    %108 = arith.mulf %104, %107 : vector<1x16xf32>
    %109 = arith.mulf %106, %106 : vector<1x16xf32>
    %110 = arith.subf %108, %109 : vector<1x16xf32>
    %111 = vector.broadcast %106 : vector<1x16xf32> to vector<128x16xf32>
    %112 = arith.subf %99, %111 : vector<128x16xf32>
    %cst_106 = arith.constant 9.99999974E-6 : f32
    %113 = vector.broadcast %cst_106 : f32 to vector<1x16xf32>
    %114 = arith.addf %110, %113 : vector<1x16xf32>
    %115 = math.rsqrt %114 : vector<1x16xf32>
    %116 = vector.broadcast %115 : vector<1x16xf32> to vector<128x16xf32>
    %117 = arith.mulf %112, %116 : vector<128x16xf32>
    %c0_107 = arith.constant 0 : index
    %c0_108 = arith.constant 0 : index
    %118 = vector.load %arg8[%c0_107, %c0_108] : memref<1x16xf32, #tpu.memory_space<vmem>>, vector<1x16xf32>
    %119 = vector.broadcast %118 : vector<1x16xf32> to vector<128x16xf32>
    %120 = arith.mulf %117, %119 : vector<128x16xf32>
    %c0_109 = arith.constant 0 : index
    %c0_110 = arith.constant 0 : index
    %121 = vector.load %arg9[%c0_109, %c0_110] : memref<1x16xf32, #tpu.memory_space<vmem>>, vector<1x16xf32>
    %122 = vector.broadcast %121 : vector<1x16xf32> to vector<128x16xf32>
    %123 = arith.addf %120, %122 : vector<128x16xf32>
    %124 = arith.addf %123, %73 : vector<128x16xf32>
    %cst_111 = arith.constant 0.000000e+00 : f32
    %125 = vector.broadcast %cst_111 : f32 to vector<128x16xf32>
    %126 = arith.maximumf %124, %125 : vector<128x16xf32>
    %c0_112 = arith.constant 0 : index
    %c0_113 = arith.constant 0 : index
    %127 = vector.load %arg12[%c0_112, %c0_113] : memref<128x16xf32, #tpu.memory_space<vmem>>, vector<128x16xf32>
    tpu.vector_store %arg12[%c0_112, %c0_113], %126 {strides = array<i32>} : memref<128x16xf32, #tpu.memory_space<vmem>>, vector<128x16xf32>,
    return
  }
}

</mosaic_0001>

<bundles_post_ra>
// kernel: tpu_custom_call.1
= control target key start
LH: loop header
LB: loop body
LE: loop exit
PB: predicated region body
PF: predicated region fallthrough
CT: control target
= control target key end

     0   :  { %s3434_s19 = smov 4   ;;  %s3435_s20 = smov 8   ;;  %vm889_vm0 = vcmask 1041408   ;;  %vm700_vm1 = vcmask 31744   ;;  %vm717_vm2 = vcmask 64512   ;;  %vm734_vm3 = vcmask 97280   ;;  %s5151_s1 = inlined_call_operand.vmem [shape: f32[2,9,9,4], index: 1, kind: input, shape index: {}]   ;;  %s5152_s0 = inlined_call_operand.vmem [shape: f32[2,9,9,4], index: 0, kind: input, shape index: {}]   ;;  %s5153_s2 = inlined_call_operand.vmem [shape: f32[2,9,9,4], index: 2, kind: input, shape index: {}]   ;;  %s5154_s3 = inlined_call_operand.vmem [shape: f32[2,9,9,4], index: 3, kind: input, shape index: {}]   ;;  %s5155_s4 = inlined_call_operand.vmem [shape: bf16[36,20], index: 4, kind: input, shape index: {}]   ;;  %s5156_s6 = inlined_call_operand.vmem [shape: f32[1,4], index: 6, kind: input, shape index: {}]   ;;  %s5157_s7 = inlined_call_operand.vmem [shape: f32[1,4], index: 7, kind: input, shape index: {}]   ;;  %s5158_s5 = inlined_call_operand.vmem [shape: bf16[36,16], index: 5, kind: input, shape index: {}]   ;;  %s5159_s10 = inlined_call_operand.vmem [shape: f32[1,16], index: 10, kind: input, shape index: {}]   ;;  %s5160_s11 = inlined_call_operand.vmem [shape: f32[1,16], index: 11, kind: input, shape index: {}]   ;;  %s5161_s8 = inlined_call_operand.vmem [shape: f32[1,16], index: 8, kind: input, shape index: {}]   ;;  %s5162_s9 = inlined_call_operand.vmem [shape: f32[1,16], index: 9, kind: input, shape index: {}]   ;;  %s5163_s12 = inlined_call_operand.vmem [shape: f32[128,16], index: 12, kind: output, shape index: {}]  }
   0x1   :  { %v58_v0 = vld [vmem:[%s5151_s1] sm:$0xff]  ;;  %v59_v1 = vld [vmem:[%s5151_s1 + $0x10] sm:$0xff]  ;;  %s3436_s21 = smov 12   ;;  %s3437_s30 = smov 16   ;;  %v3423_v51 = vld [vmem:[%s5155_s4 + $0x8] sm:$0xff]   ;;  %vm751_vm4 = vcmask 130048  }
   0x2   :  { %v74_v2 = vld [vmem:[%s5152_s0 + $0x1] sm:$0xff]  ;;  %v2782_v3 = vpack.i.bf16 %v59_v1, %v58_v0  ;;  %v3521_v4 = vld [vmem:[%s5152_s0 + $0x11] sm:$0xff]  ;;  %s3438_s24 = smov 20   ;;  %s3439_s27 = smov 24   ;;  %vm768_vm5 = vcmask 162816   ;;  %vm785_vm6 = vcmask 195584  }
   0x3   :  { %v60_v5 = vld [vmem:[%s5151_s1 + $0x20] sm:$0xff]  ;;  %v61_v6 = vld [vmem:[%s5151_s1 + $0x30] sm:$0xff]  ;;  %v2792_v7 = vpack.i.bf16 %v3521_v4, %v74_v2  ;;  %s3440_s13 = smov 28   ;;  %s3441_s23 = smov 32   ;;  %vm802_vm7 = vcmask 228352   ;;  %vm819_vm8 = vcmask 261120  }
   0x4   :  { %v76_v8 = vld [vmem:[%s5152_s0 + $0x21] sm:$0xff]  ;;  %v3536_v9 = vld [vmem:[%s5152_s0 + $0x31] sm:$0xff]  ;;  %2783 = vrot.lane.b32.xlu0 %v2782_v3, %s3434_s19  ;;  %v2787_v10 = vpack.i.bf16 %v61_v6, %v60_v5  ;;  %v2842_v37 = vpack.i.bf16 %v60_v5, %v59_v1  ;;  %v3422_v50 = vld [vmem:[%s5155_s4 + $0x10] ss:$0 sps:$4 sm:$0x33]   ;;  %vm864_vm9 = vcmask 293888  }
   0x5   :  { %2793 = vrot.lane.b32.xlu1 %v2792_v7, %s3435_s20  ;;  %v2797_v11 = vpack.i.bf16 %v3536_v9, %v76_v8  ;;  %v90_v12 = vld [vmem:[%s5153_s2] sm:$0xff]  ;;  %v91_v13 = vld [vmem:[%s5153_s2 + $0x10] sm:$0xff]  ;;  %v2852_v40 = vpack.i.bf16 %v76_v8, %v3521_v4  ;;  %2770 = vmatprep.subr.msk.bf16.mxu0 %vm889_vm0, %v3422_v50  ;;  %v891_v56 = vsel %vm889_vm0, %v3422_v50, 0  ;;  %vm1180_vm10 = vcmask 162848  }
   0x6   :  { %v92_v14 = vld [vmem:[%s5153_s2 + $0x20] sm:$0xff]  ;;  %v93_v15 = vld [vmem:[%s5153_s2 + $0x30] sm:$0xff]  ;;  %v2802_v16 = vpack.i.bf16 %v91_v13, %v90_v12  ;;  %2727 = vmatpush3.bf16.msra.mxu0 %v891_v56  ;;  %vm1344_vm11 = vcmask 25600  }
   0x7   :  { %v2807_v17 = vpack.i.bf16 %v93_v15, %v92_v14  ;;  %v106_v18 = vld [vmem:[%s5154_s3] sm:$0xff]  ;;  %v107_v19 = vld [vmem:[%s5154_s3 + $0x10] sm:$0xff]  ;;  %2728 = vmatprep.subr.bf16.mxu0 %v3423_v51 }
   0x8   :  { %2788 = vrot.lane.b32.xlu0 %v2787_v10, %s3434_s19  ;;  %v108_v20 = vld [vmem:[%s5154_s3 + $0x20] sm:$0xff]  ;;  %v109_v21 = vld [vmem:[%s5154_s3 + $0x30] sm:$0xff]  ;;  %v2812_v22 = vpack.i.bf16 %v107_v19, %v106_v18 }
   0x9   :  { %2798 = vrot.lane.b32.xlu1 %v2797_v11, %s3435_s20  ;;  %v2817_v23 = vpack.i.bf16 %v109_v21, %v108_v20  ;;  %v122_v24 = vld [vmem:[%s5153_s2 + $0x1] sm:$0xff]  ;;  %v123_v25 = vld [vmem:[%s5153_s2 + $0x11] sm:$0xff] }
   0xa   :  { %v124_v26 = vld [vmem:[%s5153_s2 + $0x21] sm:$0xff]  ;;  %v125_v27 = vld [vmem:[%s5153_s2 + $0x31] sm:$0xff]  ;;  %v2822_v28 = vpack.i.bf16 %v123_v25, %v122_v24  ;;  %2729 = vmatpush3.bf16.msra.mxu0 %v3423_v51 }
   0xb   :  { %v2827_v29 = vpack.i.bf16 %v125_v27, %v124_v26  ;;  %v3586_v30 = vld [vmem:[%s5152_s0 + $0x10] sm:$0xff]  ;;  %v3591_v31 = vld [vmem:[%s5152_s0 + $0x20] sm:$0xff] }
   0xc   :  { %2803 = vrot.lane.b32.xlu0 %v2802_v16, %s3436_s21  ;;  %v3596_v32 = vld [vmem:[%s5152_s0 + $0x30] sm:$0xff]  ;;  %v3601_v33 = vld [vmem:[%s5152_s0 + $0x40] sm:$0xff]  ;;  %v2832_v34 = vpack.i.bf16 %v3591_v31, %v3586_v30 }
   0xd   :  { %2808 = vrot.lane.b32.xlu1 %v2807_v17, %s3436_s21  ;;  %v2837_v35 = vpack.i.bf16 %v3601_v33, %v3596_v32  ;;  %v2647_v36 = vld [vmem:[%s5151_s1 + $0x40] sm:$0xff]  ;;  %v3617_v39 = vld [vmem:[%s5151_s1 + $0x50] sm:$0xff] }
   0xe   :  { %v2847_v38 = vpack.i.bf16 %v2647_v36, %v61_v6  ;;  %v2857_v41 = vpack.i.bf16 %v3617_v39, %v2647_v36  ;;  %v2663_v42 = vld [vmem:[%s5152_s0 + $0x41] sm:$0xff]  ;;  %v3634_v44 = vld [vmem:[%s5151_s1 + $0x70] sm:$0xff] }
   0xf   :  { %v3629_v43 = vld [vmem:[%s5151_s1 + $0x60] sm:$0xff]  ;;  %v2862_v45 = vpack.i.bf16 %v2663_v42, %v3536_v9  ;;  %v3644_v47 = vld [vmem:[%s5152_s0 + $0x51] sm:$0xff] }
  0x10   :  { %2813 = vrot.lane.b32.xlu0 %v2812_v22, %s3437_s30  ;;  %v2867_v46 = vpack.i.bf16 %v3634_v44, %v3629_v43  ;;  %v3649_v48 = vld [vmem:[%s5152_s0 + $0x61] sm:$0xff]  ;;  %v3654_v49 = vld [vmem:[%s5152_s0 + $0x71] sm:$0xff]  ;;  %v2872_v52 = vpack.i.bf16 %v3644_v47, %v2663_v42  ;;  %v2922_v17 = vpack.i.bf16 %v3629_v43, %v3617_v39 }
  0x11   :  { %2818 = vrot.lane.b32.xlu1 %v2817_v23, %s3437_s30  ;;  %v2877_v53 = vpack.i.bf16 %v3654_v49, %v3649_v48  ;;  %v94_v54 = vld [vmem:[%s5153_s2 + $0x40] sm:$0xff]  ;;  %v95_v55 = vld [vmem:[%s5153_s2 + $0x50] sm:$0xff]  ;;  %v2932_v21 = vpack.i.bf16 %v3649_v48, %v3644_v47 }
  0x12   :  { %v96_v57 = vld [vmem:[%s5153_s2 + $0x60] sm:$0xff]  ;;  %v97_v58 = vld [vmem:[%s5153_s2 + $0x70] sm:$0xff]  ;;  %v2882_v60 = vpack.i.bf16 %v95_v55, %v94_v54 }
  0x13   :  { %v3424_v59 = vld [vmem:[%s5155_s4] sm:$0xff]   ;;  %v2887_v61 = vpack.i.bf16 %v97_v58, %v96_v57  ;;  %v111_v63 = vld [vmem:[%s5154_s3 + $0x50] sm:$0xff] }
  0x14   :  { %2823 = vrot.lane.b32.xlu0 %v2822_v28, %s3438_s24  ;;  %v110_v62 = vld [vmem:[%s5154_s3 + $0x40] sm:$0xff]  ;;  %v113_v1 = vld [vmem:[%s5154_s3 + $0x70] sm:$0xff]  ;;  %2730 = vmatprep.subr.bf16.mxu0 %v3424_v59 }
  0x15   :  { %2828 = vrot.lane.b32.xlu1 %v2827_v29, %s3438_s24  ;;  %v112_v0 = vld [vmem:[%s5154_s3 + $0x60] sm:$0xff]  ;;  %v2892_v2 = vpack.i.bf16 %v111_v63, %v110_v62  ;;  %v127_v5 = vld [vmem:[%s5153_s2 + $0x51] sm:$0xff]  ;;  %2731 = vmatpush3.bf16.msra.mxu0 %v3424_v59 }
  0x16   :  { %v2897_v3 = vpack.i.bf16 %v113_v1, %v112_v0  ;;  %v126_v4 = vld [vmem:[%s5153_s2 + $0x41] sm:$0xff]  ;;  %v129_v7 = vld [vmem:[%s5153_s2 + $0x71] sm:$0xff] }
  0x17   :  { %v128_v6 = vld [vmem:[%s5153_s2 + $0x61] sm:$0xff]  ;;  %v2902_v8 = vpack.i.bf16 %v127_v5, %v126_v4  ;;  %v3717_v10 = vld [vmem:[%s5152_s0 + $0x50] sm:$0xff] }
  0x18   :  { %2833 = vrot.lane.b32.xlu0 %v2832_v34, %s3439_s27  ;;  %v2907_v9 = vpack.i.bf16 %v129_v7, %v128_v6  ;;  %v3722_v11 = vld [vmem:[%s5152_s0 + $0x60] sm:$0xff]  ;;  %v3727_v12 = vld [vmem:[%s5152_s0 + $0x70] sm:$0xff] }
  0x19   :  { %2838 = vrot.lane.b32.xlu1 %v2837_v35, %s3439_s27  ;;  %v2635_v13 = vld [vmem:[%s5152_s0 + $0x80] sm:$0xff]  ;;  %v2912_v14 = vpack.i.bf16 %v3722_v11, %v3717_v10  ;;  %v66_v19 = vld [vmem:[%s5151_s1 + $0x90] sm:$0xff] }
  0x1a   :  { %v2917_v15 = vpack.i.bf16 %v2635_v13, %v3727_v12  ;;  %v2651_v16 = vld [vmem:[%s5151_s1 + $0x80] sm:$0xff]  ;;  %v68_v24 = vld [vmem:[%s5151_s1 + $0xb0] sm:$0xff] }
  0x1b   :  { %v2927_v18 = vpack.i.bf16 %v2651_v16, %v3634_v44  ;;  %v67_v20 = vld [vmem:[%s5151_s1 + $0xa0] sm:$0xff]  ;;  %v82_v28 = vld [vmem:[%s5152_s0 + $0x91] sm:$0xff] }
  0x1c   :  { %2843 = vrot.lane.b32.xlu0 %v2842_v37, %s3440_s13  ;;  %v2937_v22 = vpack.i.bf16 %v67_v20, %v66_v19  ;;  %v2667_v23 = vld [vmem:[%s5152_s0 + $0x81] sm:$0xff]  ;;  %v84_v34 = vld [vmem:[%s5152_s0 + $0xb1] sm:$0xff]  ;;  %v3002_v63 = vpack.i.bf16 %v68_v24, %v67_v20 }
  0x1d   :  { %2848 = vrot.lane.b32.xlu1 %v2847_v38, %s3440_s13  ;;  %v69_v25 = vld [vmem:[%s5151_s1 + $0xc0] sm:$0xff]  ;;  %v2942_v26 = vpack.i.bf16 %v2667_v23, %v3654_v49  ;;  %v98_v38 = vld [vmem:[%s5153_s2 + $0x90] sm:$0xff] }
  0x1e   :  { %v2947_v27 = vpack.i.bf16 %v69_v25, %v68_v24  ;;  %v83_v29 = vld [vmem:[%s5152_s0 + $0xa1] sm:$0xff]  ;;  %v114_v44 = vld [vmem:[%s5154_s3 + $0x90] sm:$0xff] }
  0x1f   :  { %v85_v35 = vld [vmem:[%s5152_s0 + $0xc1] sm:$0xff]  ;;  %v2952_v36 = vpack.i.bf16 %v83_v29, %v82_v28  ;;  %v130_v50 = vld [vmem:[%s5153_s2 + $0x91] sm:$0xff] }
  0x20   :  { %2853 = vrot.lane.b32.xlu0 %v2852_v40, %s3441_s23  ;;  %v2957_v37 = vpack.i.bf16 %v85_v35, %v84_v34  ;;  %v99_v39 = vld [vmem:[%s5153_s2 + $0xa0] sm:$0xff]  ;;  %v100_v40 = vld [vmem:[%s5153_s2 + $0xb0] sm:$0xff] }
  0x21   :  { %2858 = vrot.lane.b32.xlu1 %v2857_v41, %s3434_s19  ;;  %v101_v41 = vld [vmem:[%s5153_s2 + $0xc0] sm:$0xff]  ;;  %v2962_v42 = vpack.i.bf16 %v99_v39, %v98_v38  ;;  %v3831_v57 = vld [vmem:[%s5152_s0 + $0xb0] sm:$0xff] }
  0x22   :  { %v2967_v43 = vpack.i.bf16 %v101_v41, %v100_v40  ;;  %v117_v47 = vld [vmem:[%s5154_s3 + $0xc0] sm:$0xff]  ;;  %v3841_v59 = vld [vmem:[%s5152_s0 + $0xd0] sm:$0xff] }
  0x23   :  { %v131_v51 = vld [vmem:[%s5153_s2 + $0xa1] sm:$0xff]  ;;  %v2655_v62 = vld [vmem:[%s5151_s1 + $0xd0] sm:$0xff] }
  0x24   :  { %2863 = vrot.lane.b32.xlu0 %v2862_v45, %s3441_s23  ;;  %v115_v45 = vld [vmem:[%s5154_s3 + $0xa0] sm:$0xff]  ;;  %v2982_v54 = vpack.i.bf16 %v131_v51, %v130_v50  ;;  %v3007_v0 = vpack.i.bf16 %v2655_v62, %v69_v25  ;;  %v2671_v4 = vld [vmem:[%s5152_s0 + $0xd1] sm:$0xff] }
  0x25   :  { %2868 = vrot.lane.b32.xlu1 %v2867_v46, %s3434_s19  ;;  %v116_v46 = vld [vmem:[%s5154_s3 + $0xb0] sm:$0xff]  ;;  %v2972_v48 = vpack.i.bf16 %v115_v45, %v114_v44  ;;  %v3826_v56 = vld [vmem:[%s5152_s0 + $0xa0] sm:$0xff]  ;;  %v3022_v7 = vpack.i.bf16 %v2671_v4, %v85_v35 }
  0x26   :  { %v2977_v49 = vpack.i.bf16 %v117_v47, %v116_v46  ;;  %v3836_v58 = vld [vmem:[%s5152_s0 + $0xc0] sm:$0xff]  ;;  %v72_v5 = vld [vmem:[%s5151_s1 + $0xf0] sm:$0xff] }
  0x27   :  { %v71_v1 = vld [vmem:[%s5151_s1 + $0xe0] sm:$0xff]  ;;  %v88_v13 = vld [vmem:[%s5152_s0 + $0xf1] sm:$0xff] }
  0x28   :  { %2873 = vrot.lane.b32.xlu0 %v2872_v52, %s3435_s20  ;;  %v132_v52 = vld [vmem:[%s5153_s2 + $0xb1] sm:$0xff]  ;;  %v73_v6 = vld [vmem:[%s5151_s1 + $0x100] sm:$0xff] }
  0x29   :  { %2878 = vrot.lane.b32.xlu1 %v2877_v53, %s3435_s20  ;;  %v133_v53 = vld [vmem:[%s5153_s2 + $0xc1] sm:$0xff]  ;;  %v104_v19 = vld [vmem:[%s5153_s2 + $0xf0] sm:$0xff] }
  0x2a   :  { %v2987_v55 = vpack.i.bf16 %v133_v53, %v132_v52  ;;  %v105_v20 = vld [vmem:[%s5153_s2 + $0x100] sm:$0xff]  ;;  %v118_v23 = vld [vmem:[%s5154_s3 + $0xd0] sm:$0xff] }
  0x2b   :  { %v119_v24 = vld [vmem:[%s5154_s3 + $0xe0] sm:$0xff]  ;;  %v120_v25 = vld [vmem:[%s5154_s3 + $0xf0] sm:$0xff] }
  0x2c   :  { %2883 = vrot.lane.b32.xlu0 %v2882_v60, %s3436_s21  ;;  %v2992_v60 = vpack.i.bf16 %v3831_v57, %v3826_v56  ;;  %v136_v35 = vld [vmem:[%s5153_s2 + $0xf1] sm:$0xff]  ;;  %v3926_v39 = vld [vmem:[%s5152_s0 + $0xe0] sm:$0xff] }
  0x2d   :  { %2888 = vrot.lane.b32.xlu1 %v2887_v61, %s3436_s21  ;;  %v2997_v61 = vpack.i.bf16 %v3841_v59, %v3836_v58  ;;  %v3931_v40 = vld [vmem:[%s5152_s0 + $0xf0] sm:$0xff]  ;;  %v3936_v41 = vld [vmem:[%s5152_s0 + $0x100] sm:$0xff] }
  0x2e   :  { %v2659_v46 = vld [vmem:[%s5151_s1 + $0x110] sm:$0xff] }
  0x2f   :  { %v2675_v51 = vld [vmem:[%s5152_s0 + $0x111] sm:$0xff] }
  0x30   :  { %2893 = vrot.lane.b32.xlu0 %v2892_v2, %s3437_s30  ;;  %v3012_v2 = vpack.i.bf16 %v84_v34, %v83_v29  ;;  %v134_v29 = vld [vmem:[%s5153_s2 + $0xd1] sm:$0xff]  ;;  %v135_v34 = vld [vmem:[%s5153_s2 + $0xe1] sm:$0xff] }
  0x31   :  { %2898 = vrot.lane.b32.xlu1 %v2897_v3, %s3437_s30  ;;  %v3017_v3 = vpack.i.bf16 %v71_v1, %v2655_v62 }
  0x34   :  { %2903 = vrot.lane.b32.xlu0 %v2902_v8, %s3438_s24  ;;  %v3027_v8 = vpack.i.bf16 %v73_v6, %v72_v5 }
  0x35   :  { %2908 = vrot.lane.b32.xlu1 %v2907_v9, %s3438_s24  ;;  %v87_v9 = vld [vmem:[%s5152_s0 + $0xe1] sm:$0xff] }
  0x36   :  { %v3092_v53 = vpack.i.bf16 %v88_v13, %v87_v9 }
  0x38   :  { %2913 = vrot.lane.b32.xlu0 %v2912_v14, %s3439_s27  ;;  %v89_v14 = vld [vmem:[%s5152_s0 + $0x101] sm:$0xff] }
  0x39   :  { %2918 = vrot.lane.b32.xlu1 %v2917_v15, %s3439_s27  ;;  %v3032_v15 = vpack.i.bf16 %v87_v9, %v2671_v4  ;;  %v3037_v16 = vpack.i.bf16 %v89_v14, %v88_v13 }
  0x3c   :  { %2923 = vrot.lane.b32.xlu0 %v2922_v17, %s3440_s13  ;;  %v102_v17 = vld [vmem:[%s5153_s2 + $0xd0] sm:$0xff] }
  0x3d   :  { %2928 = vrot.lane.b32.xlu1 %v2927_v18, %s3440_s13  ;;  %v103_v18 = vld [vmem:[%s5153_s2 + $0xe0] sm:$0xff] }
  0x40   :  { %2933 = vrot.lane.b32.xlu0 %v2932_v21, %s3441_s23  ;;  %v3042_v21 = vpack.i.bf16 %v103_v18, %v102_v17 }
  0x41   :  { %2938 = vrot.lane.b32.xlu1 %v2937_v22, %s3434_s19  ;;  %v3047_v22 = vpack.i.bf16 %v105_v20, %v104_v19 }
  0x44   :  { %2943 = vrot.lane.b32.xlu0 %v2942_v26, %s3441_s23  ;;  %v121_v26 = vld [vmem:[%s5154_s3 + $0x100] sm:$0xff] }
  0x45   :  { %2948 = vrot.lane.b32.xlu1 %v2947_v27, %s3434_s19  ;;  %v3052_v27 = vpack.i.bf16 %v119_v24, %v118_v23  ;;  %v3057_v28 = vpack.i.bf16 %v121_v26, %v120_v25 }
  0x48   :  { %2953 = vrot.lane.b32.xlu0 %v2952_v36, %s3435_s20  ;;  %v137_v36 = vld [vmem:[%s5153_s2 + $0x101] sm:$0xff] }
  0x49   :  { %2958 = vrot.lane.b32.xlu1 %v2957_v37, %s3435_s20  ;;  %v3062_v37 = vpack.i.bf16 %v135_v34, %v134_v29  ;;  %v3067_v38 = vpack.i.bf16 %v137_v36, %v136_v35 }
  0x4c   :  { %2963 = vrot.lane.b32.xlu0 %v2962_v42, %s3436_s21  ;;  %v2643_v42 = vld [vmem:[%s5152_s0 + $0x110] sm:$0xff] }
  0x4d   :  { %2968 = vrot.lane.b32.xlu1 %v2967_v43, %s3436_s21  ;;  %v3072_v43 = vpack.i.bf16 %v3931_v40, %v3926_v39  ;;  %v3077_v44 = vpack.i.bf16 %v2643_v42, %v3936_v41 }
  0x50   :  { %2973 = vrot.lane.b32.xlu0 %v2972_v48, %s3437_s30  ;;  %v3082_v48 = vpack.i.bf16 %v72_v5, %v71_v1  ;;  %v42_v1 = vld [vmem:[%s5152_s0] sm:$0xff] }
  0x51   :  { %2978 = vrot.lane.b32.xlu1 %v2977_v49, %s3437_s30  ;;  %v3087_v49 = vpack.i.bf16 %v2659_v46, %v73_v6 }
  0x54   :  { %2983 = vrot.lane.b32.xlu0 %v2982_v54, %s3438_s24  ;;  %v3097_v54 = vpack.i.bf16 %v2675_v51, %v89_v14 }
  0x55   :  { %2988 = vrot.lane.b32.xlu1 %v2987_v55, %s3438_s24 }
  0x58   :  { %2993 = vrot.lane.b32.xlu0 %v2992_v60, %s3439_s27 }
  0x59   :  { %2998 = vrot.lane.b32.xlu1 %v2997_v61, %s3439_s27 }
  0x5c   :  { %3003 = vrot.lane.b32.xlu0 %v3002_v63, %s3440_s13 }
  0x5d   :  { %3008 = vrot.lane.b32.xlu1 %v3007_v0, %s3440_s13 }
  0x60   :  { %3013 = vrot.lane.b32.xlu0 %v3012_v2, %s3441_s23 }
  0x61   :  { %3018 = vrot.lane.b32.xlu1 %v3017_v3, %s3434_s19 }
  0x64   :  { %3023 = vrot.lane.b32.xlu0 %v3022_v7, %s3441_s23 }
  0x65   :  { %3028 = vrot.lane.b32.xlu1 %v3027_v8, %s3434_s19 }
  0x68   :  { %3033 = vrot.lane.b32.xlu0 %v3032_v15, %s3435_s20 }
  0x69   :  { %3038 = vrot.lane.b32.xlu1 %v3037_v16, %s3435_s20 }
  0x6c   :  { %3043 = vrot.lane.b32.xlu0 %v3042_v21, %s3436_s21 }
  0x6d   :  { %3048 = vrot.lane.b32.xlu1 %v3047_v22, %s3436_s21 }
  0x70   :  { %3053 = vrot.lane.b32.xlu0 %v3052_v27, %s3437_s30 }
  0x71   :  { %3058 = vrot.lane.b32.xlu1 %v3057_v28, %s3437_s30 }
  0x74   :  { %3063 = vrot.lane.b32.xlu0 %v3062_v37, %s3438_s24 }
  0x75   :  { %3068 = vrot.lane.b32.xlu1 %v3067_v38, %s3438_s24 }
  0x76   :  { %v2784_v45 = vpop.permute.xlu0 %2783 }
  0x77   :  { %v2794_v47 = vpop.permute.xlu1 %2793  ;;  %v2786_v63 = vunpack.i.h.bf16 %v2784_v45  ;;  %v2785_v0 = vunpack.i.l.bf16 %v2784_v45 }
  0x78   :  { %3073 = vrot.lane.b32.xlu0 %v3072_v43, %s3439_s27  ;;  %v2796_v6 = vunpack.i.h.bf16 %v2794_v47  ;;  %v2795_v7 = vunpack.i.l.bf16 %v2794_v47 }
  0x79   :  { %3078 = vrot.lane.b32.xlu1 %v3077_v44, %s3439_s27  ;;  %v701_v8 = vsel %vm700_vm1, %v42_v1, %v2785_v0  ;;  %v702_v9 = vsel %vm700_vm1, %v3586_v30, %v2786_v63 }
  0x7a   :  { %v2789_v50 = vpop.permute.xlu0 %2788  ;;  %v718_v23 = vsel %vm717_vm2, %v701_v8, %v2795_v7  ;;  %v719_v30 = vsel %vm717_vm2, %v702_v9, %v2796_v6 }
  0x7b   :  { %v2799_v52 = vpop.permute.xlu1 %2798  ;;  %v2791_v2 = vunpack.i.h.bf16 %v2789_v50  ;;  %v2790_v3 = vunpack.i.l.bf16 %v2789_v50 }
  0x7c   :  { %3083 = vrot.lane.b32.xlu0 %v3082_v48, %s3440_s13  ;;  %v2801_v13 = vunpack.i.h.bf16 %v2799_v52  ;;  %v2800_v14 = vunpack.i.l.bf16 %v2799_v52 }
  0x7d   :  { %3088 = vrot.lane.b32.xlu1 %v3087_v49, %s3440_s13  ;;  %v703_v15 = vsel %vm700_vm1, %v3591_v31, %v2790_v3  ;;  %v704_v16 = vsel %vm700_vm1, %v3596_v32, %v2791_v2 }
  0x7e   :  { %v2804_v55 = vpop.permute.xlu0 %2803  ;;  %v720_v24 = vsel %vm717_vm2, %v703_v15, %v2800_v14  ;;  %v721_v31 = vsel %vm717_vm2, %v704_v16, %v2801_v13 }
  0x7f   :  { %v2809_v60 = vpop.permute.xlu1 %2808  ;;  %v2806_v17 = vunpack.i.h.bf16 %v2804_v55  ;;  %v2805_v18 = vunpack.i.l.bf16 %v2804_v55 }
  0x80   :  { %3093 = vrot.lane.b32.xlu0 %v3092_v53, %s3441_s23  ;;  %v2811_v20 = vunpack.i.h.bf16 %v2809_v60  ;;  %v2810_v21 = vunpack.i.l.bf16 %v2809_v60 }
  0x81   :  { %3098 = vrot.lane.b32.xlu1 %v3097_v54, %s3441_s23  ;;  %v735_v26 = vsel %vm734_vm3, %v718_v23, %v2805_v18  ;;  %v736_v27 = vsel %vm734_vm3, %v719_v30, %v2806_v17 }
  0x82   :  { %v2814_v61 = vpop.permute.xlu0 %2813  ;;  %v737_v35 = vsel %vm734_vm3, %v720_v24, %v2810_v21  ;;  %v738_v36 = vsel %vm734_vm3, %v721_v31, %v2811_v20 }
  0x83   :  { %v3958_v62 = vpop.permute.xlu1 %2818  ;;  %v2816_v25 = vunpack.i.h.bf16 %v2814_v61  ;;  %v2815_v32 = vunpack.i.l.bf16 %v2814_v61 }
  0x84   :  { %v2821_v43 = vunpack.i.h.bf16 %v3958_v62  ;;  %v2820_v44 = vunpack.i.l.bf16 %v3958_v62 }
  0x85   :  { %v752_v47 = vsel %vm751_vm4, %v735_v26, %v2815_v32  ;;  %v753_v48 = vsel %vm751_vm4, %v736_v27, %v2816_v25 }
  0x86   :  { %v2824_v4 = vpop.permute.xlu0 %2823  ;;  %v755_v6 = vsel %vm751_vm4, %v738_v36, %v2821_v43 }
  0x87   :  { %v3963_v5 = vpop.permute.xlu1 %2828  ;;  %v2826_v28 = vunpack.i.h.bf16 %v2824_v4  ;;  %v2825_v29 = vunpack.i.l.bf16 %v2824_v4 }
  0x88   :  { %v2831_v49 = vunpack.i.h.bf16 %v3963_v5  ;;  %v2830_v50 = vunpack.i.l.bf16 %v3963_v5  ;;  %v754_v5 = vsel %vm751_vm4, %v737_v35, %v2820_v44 }
  0x89   :  { %v769_v51 = vsel %vm768_vm5, %v752_v47, %v2825_v29  ;;  %v770_v52 = vsel %vm768_vm5, %v753_v48, %v2826_v28 }
  0x8a   :  { %v2834_v19 = vpop.permute.xlu0 %2833  ;;  %v771_v9 = vsel %vm768_vm5, %v754_v5, %v2830_v50  ;;  %v772_v13 = vsel %vm768_vm5, %v755_v6, %v2831_v49 }
  0x8b   :  { %v2839_v22 = vpop.permute.xlu1 %2838  ;;  %v2836_v37 = vunpack.i.h.bf16 %v2834_v19  ;;  %v2835_v38 = vunpack.i.l.bf16 %v2834_v19 }
  0x8c   :  { %v2841_v53 = vunpack.i.h.bf16 %v2839_v22  ;;  %v2840_v54 = vunpack.i.l.bf16 %v2839_v22 }
  0x8d   :  { %v786_v63 = vsel %vm785_vm6, %v769_v51, %v2835_v38  ;;  %v787_v0 = vsel %vm785_vm6, %v770_v52, %v2836_v37 }
  0x8e   :  { %v2844_v34 = vpop.permute.xlu0 %2843  ;;  %v788_v16 = vsel %vm785_vm6, %v771_v9, %v2840_v54  ;;  %v789_v17 = vsel %vm785_vm6, %v772_v13, %v2841_v53 }
  0x8f   :  { %v2849_v42 = vpop.permute.xlu1 %2848  ;;  %v2846_v45 = vunpack.i.h.bf16 %v2844_v34  ;;  %v2845_v46 = vunpack.i.l.bf16 %v2844_v34 }
  0x90   :  { %v2851_v1 = vunpack.i.h.bf16 %v2849_v42  ;;  %v2850_v2 = vunpack.i.l.bf16 %v2849_v42 }
  0x91   :  { %v803_v3 = vsel %vm802_vm7, %v786_v63, %v2845_v46  ;;  %v804_v4 = vsel %vm802_vm7, %v787_v0, %v2846_v45 }
  0x92   :  { %v2854_v55 = vpop.permute.xlu0 %2853  ;;  %v805_v21 = vsel %vm802_vm7, %v788_v16, %v2850_v2  ;;  %v806_v22 = vsel %vm802_vm7, %v789_v17, %v2851_v1 }
  0x93   :  { %v2856_v60 = vunpack.i.h.bf16 %v2854_v55  ;;  %v2855_v61 = vunpack.i.l.bf16 %v2854_v55  ;;  %v2859_v62 = vpop.permute.xlu1 %2858 }
  0x94   :  { %v2861_v34 = vunpack.i.h.bf16 %v2859_v62  ;;  %v2860_v35 = vunpack.i.l.bf16 %v2859_v62 }
  0x95   :  { %v820_v7 = vsel %vm819_vm8, %v803_v3, %v2855_v61  ;;  %v821_v8 = vsel %vm819_vm8, %v804_v4, %v2856_v60 }
  0x96   :  { %v2864_v14 = vpop.permute.xlu0 %2863  ;;  %v836_v15 = vpack.c.bf16 %v821_v8, %v820_v7  ;;  %v705_v49 = vsel %vm700_vm1, %v3601_v33, %v2860_v35  ;;  %v706_v50 = vsel %vm700_vm1, %v3717_v10, %v2861_v34 }
  0x97   :  { %v2866_v18 = vunpack.i.h.bf16 %v2864_v14  ;;  %v2865_v19 = vunpack.i.l.bf16 %v2864_v14  ;;  %v2869_v20 = vpop.permute.xlu1 %2868 }
  0x98   :  { %2732 = vmatprep.mubr.msk.bf16.mxu0 %vm864_vm9, %v836_v15  ;;  %v2871_v37 = vunpack.i.h.bf16 %v2869_v20  ;;  %v2870_v38 = vunpack.i.l.bf16 %v2869_v20 }
  0x99   :  { %v822_v23 = vsel %vm819_vm8, %v805_v21, %v2865_v19  ;;  %v823_v30 = vsel %vm819_vm8, %v806_v22, %v2866_v18 }
  0x9a   :  { %v2874_v24 = vpop.permute.xlu0 %2873  ;;  %v837_v31 = vpack.c.bf16 %v823_v30, %v822_v23  ;;  %v707_v54 = vsel %vm700_vm1, %v3722_v11, %v2870_v38  ;;  %v708_v55 = vsel %vm700_vm1, %v3727_v12, %v2871_v37 }
  0x9b   :  { %v2879_v25 = vpop.permute.xlu1 %2878  ;;  %v2876_v42 = vunpack.i.h.bf16 %v2874_v24  ;;  %v2875_v43 = vunpack.i.l.bf16 %v2874_v24 }
  0x9c   :  { %2733 = vmatmul.mubr.msk.bf16.vlgmr.msra.gmra.mxu0 %vm864_vm9, %v837_v31  ;;  %v2881_v44 = vunpack.i.h.bf16 %v2879_v25  ;;  %v2880_v45 = vunpack.i.l.bf16 %v2879_v25 }
  0x9d   :  { %v722_v60 = vsel %vm717_vm2, %v705_v49, %v2875_v43  ;;  %v723_v61 = vsel %vm717_vm2, %v706_v50, %v2876_v42 }
  0x9e   :  { %v2884_v32 = vpop.permute.xlu0 %2883  ;;  %v724_v62 = vsel %vm717_vm2, %v707_v54, %v2880_v45  ;;  %v725_v33 = vsel %vm717_vm2, %v708_v55, %v2881_v44 }
  0x9f   :  { %v2889_v26 = vpop.permute.xlu1 %2888  ;;  %v2886_v46 = vunpack.i.h.bf16 %v2884_v32  ;;  %v2885_v47 = vunpack.i.l.bf16 %v2884_v32 }
  0xa0   :  { %v2891_v51 = vunpack.i.h.bf16 %v2889_v26  ;;  %v2890_v52 = vunpack.i.l.bf16 %v2889_v26 }
  0xa1   :  { %v739_v10 = vsel %vm734_vm3, %v722_v60, %v2885_v47  ;;  %v740_v1 = vsel %vm734_vm3, %v723_v61, %v2886_v46 }
  0xa2   :  { %v2894_v27 = vpop.permute.xlu0 %2893  ;;  %v741_v4 = vsel %vm734_vm3, %v724_v62, %v2890_v52  ;;  %v742_v12 = vsel %vm734_vm3, %v725_v33, %v2891_v51 }
  0xa3   :  { %v2899_v28 = vpop.permute.xlu1 %2898  ;;  %v2896_v63 = vunpack.i.h.bf16 %v2894_v27  ;;  %v2895_v0 = vunpack.i.l.bf16 %v2894_v27 }
  0xa4   :  { %v2901_v8 = vunpack.i.h.bf16 %v2899_v28  ;;  %v2900_v9 = vunpack.i.l.bf16 %v2899_v28 }
  0xa5   :  { %v756_v15 = vsel %vm751_vm4, %v739_v10, %v2895_v0  ;;  %v757_v16 = vsel %vm751_vm4, %v740_v1, %v2896_v63 }
  0xa6   :  { %v2904_v29 = vpop.permute.xlu0 %2903  ;;  %v758_v34 = vsel %vm751_vm4, %v741_v4, %v2900_v9  ;;  %v759_v35 = vsel %vm751_vm4, %v742_v12, %v2901_v8 }
  0xa7   :  { %v2909_v36 = vpop.permute.xlu1 %2908  ;;  %v2906_v2 = vunpack.i.h.bf16 %v2904_v29  ;;  %v2905_v3 = vunpack.i.l.bf16 %v2904_v29 }
  0xa8   :  { %v2911_v17 = vunpack.i.h.bf16 %v2909_v36  ;;  %v2910_v18 = vunpack.i.l.bf16 %v2909_v36 }
  0xa9   :  { %v773_v19 = vsel %vm768_vm5, %v756_v15, %v2905_v3  ;;  %v774_v20 = vsel %vm768_vm5, %v757_v16, %v2906_v2  ;;  %v50_v3 = vld [vmem:[%s5152_s0 + $0x90] sm:$0xff] }
  0xaa   :  { %v2914_v48 = vpop.permute.xlu0 %2913  ;;  %v775_v38 = vsel %vm768_vm5, %v758_v34, %v2910_v18  ;;  %v776_v42 = vsel %vm768_vm5, %v759_v35, %v2911_v17 }
  0xab   :  { %v2919_v53 = vpop.permute.xlu1 %2918  ;;  %v2916_v5 = vunpack.i.h.bf16 %v2914_v48  ;;  %v2915_v6 = vunpack.i.l.bf16 %v2914_v48 }
  0xac   :  { %v2921_v21 = vunpack.i.h.bf16 %v2919_v53  ;;  %v2920_v22 = vunpack.i.l.bf16 %v2919_v53 }
  0xad   :  { %v790_v30 = vsel %vm785_vm6, %v773_v19, %v2915_v6  ;;  %v791_v24 = vsel %vm785_vm6, %v774_v20, %v2916_v5 }
  0xae   :  { %v2924_v11 = vpop.permute.xlu0 %2923  ;;  %v792_v45 = vsel %vm785_vm6, %v775_v38, %v2920_v22  ;;  %v793_v46 = vsel %vm785_vm6, %v776_v42, %v2921_v21 }
  0xaf   :  { %v2929_v7 = vpop.permute.xlu1 %2928  ;;  %v2926_v13 = vunpack.i.h.bf16 %v2924_v11  ;;  %v2925_v14 = vunpack.i.l.bf16 %v2924_v11 }
  0xb0   :  { %v2931_v28 = vunpack.i.h.bf16 %v2929_v7  ;;  %v2930_v29 = vunpack.i.l.bf16 %v2929_v7 }
  0xb1   :  { %v807_v26 = vsel %vm802_vm7, %v790_v30, %v2925_v14  ;;  %v808_v27 = vsel %vm802_vm7, %v791_v24, %v2926_v13 }
  0xb2   :  { %v2934_v23 = vpop.permute.xlu0 %2933  ;;  %v809_v50 = vsel %vm802_vm7, %v792_v45, %v2930_v29  ;;  %v810_v51 = vsel %vm802_vm7, %v793_v46, %v2931_v28 }
  0xb3   :  { %v2936_v31 = vunpack.i.h.bf16 %v2934_v23  ;;  %v2935_v25 = vunpack.i.l.bf16 %v2934_v23  ;;  %v2939_v32 = vpop.permute.xlu1 %2938 }
  0xb4   :  { %v2941_v10 = vunpack.i.h.bf16 %v2939_v32  ;;  %v2940_v1 = vunpack.i.l.bf16 %v2939_v32 }
  0xb5   :  { %v824_v36 = vsel %vm819_vm8, %v807_v26, %v2935_v25  ;;  %v825_v37 = vsel %vm819_vm8, %v808_v27, %v2936_v31 }
  0xb6   :  { %v2944_v43 = vpop.permute.xlu0 %2943  ;;  %v838_v44 = vpack.c.bf16 %v825_v37, %v824_v36  ;;  %v709_v14 = vsel %vm700_vm1, %v50_v3, %v2940_v1  ;;  %v710_v15 = vsel %vm700_vm1, %v3826_v56, %v2941_v10 }
  0xb7   :  { %v2946_v47 = vunpack.i.h.bf16 %v2944_v43  ;;  %v2945_v48 = vunpack.i.l.bf16 %v2944_v43  ;;  %v2949_v49 = vpop.permute.xlu1 %2948 }
  0xb8   :  { %2736 = vmatprep.mubr.msk.bf16.mxu0 %vm864_vm9, %v838_v44  ;;  %v2951_v11 = vunpack.i.h.bf16 %v2949_v49  ;;  %v2950_v4 = vunpack.i.l.bf16 %v2949_v49 }
  0xb9   :  { %v826_v52 = vsel %vm819_vm8, %v809_v50, %v2945_v48  ;;  %v827_v53 = vsel %vm819_vm8, %v810_v51, %v2946_v47 }
  0xba   :  { %v2954_v54 = vpop.permute.xlu0 %2953  ;;  %v839_v55 = vpack.c.bf16 %v827_v53, %v826_v52  ;;  %v711_v19 = vsel %vm700_vm1, %v3831_v57, %v2950_v4  ;;  %v712_v20 = vsel %vm700_vm1, %v3836_v58, %v2951_v11 }
  0xbb   :  { %v2959_v60 = vpop.permute.xlu1 %2958  ;;  %v2956_v12 = vunpack.i.h.bf16 %v2954_v54  ;;  %v2955_v5 = vunpack.i.l.bf16 %v2954_v54 }
  0xbc   :  { %2737 = vmatmul.mubr.msk.bf16.gmra.mxu0 %vm864_vm9, %v839_v55  ;;  %v2961_v6 = vunpack.i.h.bf16 %v2959_v60  ;;  %v2960_v7 = vunpack.i.l.bf16 %v2959_v60 }
  0xbd   :  { %v726_v21 = vsel %vm717_vm2, %v709_v14, %v2955_v5  ;;  %v727_v22 = vsel %vm717_vm2, %v710_v15, %v2956_v12 }
  0xbe   :  { %v2964_v61 = vpop.permute.xlu0 %2963  ;;  %v728_v23 = vsel %vm717_vm2, %v711_v19, %v2960_v7  ;;  %v729_v30 = vsel %vm717_vm2, %v712_v20, %v2961_v6 }
  0xbf   :  { %v2969_v62 = vpop.permute.xlu1 %2968  ;;  %v2966_v8 = vunpack.i.h.bf16 %v2964_v61  ;;  %v2965_v9 = vunpack.i.l.bf16 %v2964_v61 }
  0xc0   :  { %v2971_v16 = vunpack.i.h.bf16 %v2969_v62  ;;  %v2970_v17 = vunpack.i.l.bf16 %v2969_v62 }
  0xc1   :  { %v743_v56 = vsel %vm734_vm3, %v726_v21, %v2965_v9  ;;  %v744_v25 = vsel %vm734_vm3, %v727_v22, %v2966_v8 }
  0xc2   :  { %v2974_v33 = vpop.permute.xlu0 %2973  ;;  %v745_v27 = vsel %vm734_vm3, %v728_v23, %v2970_v17  ;;  %v746_v58 = vsel %vm734_vm3, %v729_v30, %v2971_v16 }
  0xc3   :  { %v4044_v63 = vpop.permute.xlu1 %2978  ;;  %v2976_v24 = vunpack.i.h.bf16 %v2974_v33  ;;  %v2975_v31 = vunpack.i.l.bf16 %v2974_v33 }
  0xc4   :  { %v2981_v35 = vunpack.i.h.bf16 %v4044_v63  ;;  %v2980_v36 = vunpack.i.l.bf16 %v4044_v63 }
  0xc5   :  { %v760_v42 = vsel %vm751_vm4, %v743_v56, %v2975_v31  ;;  %v761_v43 = vsel %vm751_vm4, %v744_v25, %v2976_v24 }
  0xc6   :  { %v2984_v0 = vpop.permute.xlu0 %2983  ;;  %v762_v63 = vsel %vm751_vm4, %v745_v27, %v2980_v36 }
  0xc7   :  { %v4046_v2 = vpop.permute.xlu1 %2988  ;;  %v2986_v32 = vunpack.i.h.bf16 %v2984_v0  ;;  %v2985_v26 = vunpack.i.l.bf16 %v2984_v0  ;;  %v763_v0 = vsel %vm751_vm4, %v746_v58, %v2981_v35 }
  0xc8   :  { %v2991_v44 = vunpack.i.h.bf16 %v4046_v2  ;;  %v2990_v45 = vunpack.i.l.bf16 %v4046_v2 }
  0xc9   :  { %v777_v46 = vsel %vm768_vm5, %v760_v42, %v2985_v26  ;;  %v778_v47 = vsel %vm768_vm5, %v761_v43, %v2986_v32 }
  0xca   :  { %v2994_v13 = vpop.permute.xlu0 %2993  ;;  %v779_v2 = vsel %vm768_vm5, %v762_v63, %v2990_v45  ;;  %v780_v3 = vsel %vm768_vm5, %v763_v0, %v2991_v44 }
  0xcb   :  { %v2999_v18 = vpop.permute.xlu1 %2998  ;;  %v2996_v28 = vunpack.i.h.bf16 %v2994_v13  ;;  %v2995_v29 = vunpack.i.l.bf16 %v2994_v13 }
  0xcc   :  { %v3001_v48 = vunpack.i.h.bf16 %v2999_v18  ;;  %v3000_v49 = vunpack.i.l.bf16 %v2999_v18 }
  0xcd   :  { %v794_v51 = vsel %vm785_vm6, %v777_v46, %v2995_v29  ;;  %v795_v52 = vsel %vm785_vm6, %v778_v47, %v2996_v28 }
  0xce   :  { %v3004_v57 = vpop.permute.xlu0 %3003  ;;  %v796_v12 = vsel %vm785_vm6, %v779_v2, %v3000_v49  ;;  %v797_v5 = vsel %vm785_vm6, %v780_v3, %v3001_v48 }
  0xcf   :  { %v3009_v34 = vpop.permute.xlu1 %3008  ;;  %v3006_v37 = vunpack.i.h.bf16 %v3004_v57  ;;  %v3005_v38 = vunpack.i.l.bf16 %v3004_v57 }
  0xd0   :  { %v3011_v62 = vunpack.i.h.bf16 %v3009_v34  ;;  %v3010_v33 = vunpack.i.l.bf16 %v3009_v34 }
  0xd1   :  { %v811_v60 = vsel %vm802_vm7, %v794_v51, %v3005_v38  ;;  %v812_v61 = vsel %vm802_vm7, %v795_v52, %v3006_v37 }
  0xd2   :  { %v3014_v50 = vpop.permute.xlu0 %3013  ;;  %v813_v9 = vsel %vm802_vm7, %v796_v12, %v3010_v33  ;;  %v814_v13 = vsel %vm802_vm7, %v797_v5, %v3011_v62 }
  0xd3   :  { %v3016_v53 = vunpack.i.h.bf16 %v3014_v50  ;;  %v3015_v54 = vunpack.i.l.bf16 %v3014_v50  ;;  %v3019_v55 = vpop.permute.xlu1 %3018 }
  0xd4   :  { %v3021_v23 = vunpack.i.h.bf16 %v3019_v55  ;;  %v3020_v30 = vunpack.i.l.bf16 %v3019_v55 }
  0xd5   :  { %v828_v10 = vsel %vm819_vm8, %v811_v60, %v3015_v54  ;;  %v829_v1 = vsel %vm819_vm8, %v812_v61, %v3016_v53 }
  0xd6   :  { %v3024_v11 = vpop.permute.xlu0 %3023  ;;  %v840_v4 = vpack.c.bf16 %v829_v1, %v828_v10  ;;  %v713_v29 = vsel %vm700_vm1, %v3841_v59, %v3020_v30  ;;  %v714_v34 = vsel %vm700_vm1, %v3926_v39, %v3021_v23 }
  0xd7   :  { %v3026_v6 = vunpack.i.h.bf16 %v3024_v11  ;;  %v3025_v7 = vunpack.i.l.bf16 %v3024_v11  ;;  %v3029_v8 = vpop.permute.xlu1 %3028 }
  0xd8   :  { %2740 = vmatprep.mubr.msk.bf16.mxu0 %vm864_vm9, %v840_v4  ;;  %v3031_v24 = vunpack.i.h.bf16 %v3029_v8  ;;  %v3030_v31 = vunpack.i.l.bf16 %v3029_v8 }
  0xd9   :  { %v830_v14 = vsel %vm819_vm8, %v813_v9, %v3025_v7  ;;  %v831_v15 = vsel %vm819_vm8, %v814_v13, %v3026_v6 }
  0xda   :  { %v841_v16 = vpack.c.bf16 %v831_v15, %v830_v14  ;;  %v3034_v17 = vpop.permute.xlu0 %3033  ;;  %v715_v37 = vsel %vm700_vm1, %v3931_v40, %v3030_v31  ;;  %v716_v38 = vsel %vm700_vm1, %v3936_v41, %v3031_v24 }
  0xdb   :  { %v3039_v18 = vpop.permute.xlu1 %3038  ;;  %v3036_v56 = vunpack.i.h.bf16 %v3034_v17  ;;  %v3035_v25 = vunpack.i.l.bf16 %v3034_v17 }
  0xdc   :  { %2741 = vmatmul.mubr.msk.bf16.gmra.mxu0 %vm864_vm9, %v841_v16  ;;  %v3041_v26 = vunpack.i.h.bf16 %v3039_v18  ;;  %v3040_v57 = vunpack.i.l.bf16 %v3039_v18 }
  0xdd   :  { %v730_v42 = vsel %vm717_vm2, %v713_v29, %v3035_v25  ;;  %v731_v43 = vsel %vm717_vm2, %v714_v34, %v3036_v56 }
  0xde   :  { %v3044_v19 = vpop.permute.xlu0 %3043  ;;  %v732_v45 = vsel %vm717_vm2, %v715_v37, %v3040_v57  ;;  %v733_v59 = vsel %vm717_vm2, %v716_v38, %v3041_v26 }
  0xdf   :  { %v3049_v20 = vpop.permute.xlu1 %3048  ;;  %v3046_v58 = vunpack.i.h.bf16 %v3044_v19  ;;  %v3045_v28 = vunpack.i.l.bf16 %v3044_v19 }
  0xe0   :  { %v3051_v35 = vunpack.i.h.bf16 %v3049_v20  ;;  %v3050_v36 = vunpack.i.l.bf16 %v3049_v20 }
  0xe1   :  { %v747_v48 = vsel %vm734_vm3, %v730_v42, %v3045_v28  ;;  %v748_v49 = vsel %vm734_vm3, %v731_v43, %v3046_v58 }
  0xe2   :  { %v3054_v21 = vpop.permute.xlu0 %3053  ;;  %v749_v41 = vsel %vm734_vm3, %v732_v45, %v3050_v36  ;;  %v750_v51 = vsel %vm734_vm3, %v733_v59, %v3051_v35 }
  0xe3   :  { %v3059_v22 = vpop.permute.xlu1 %3058  ;;  %v3056_v46 = vunpack.i.h.bf16 %v3054_v21  ;;  %v3055_v47 = vunpack.i.l.bf16 %v3054_v21 }
  0xe4   :  { %v3061_v40 = vunpack.i.h.bf16 %v3059_v22  ;;  %v3060_v50 = vunpack.i.l.bf16 %v3059_v22 }
  0xe5   :  { %v764_v33 = vsel %vm751_vm4, %v747_v48, %v3055_v47  ;;  %v765_v63 = vsel %vm751_vm4, %v748_v49, %v3056_v46 }
  0xe6   :  { %v3064_v32 = vpop.permute.xlu0 %3063  ;;  %v766_v2 = vsel %vm751_vm4, %v749_v41, %v3060_v50  ;;  %v767_v3 = vsel %vm751_vm4, %v750_v51, %v3061_v40 }
  0xe7   :  { %v3069_v27 = vpop.permute.xlu1 %3068  ;;  %v3066_v52 = vunpack.i.h.bf16 %v3064_v32  ;;  %v3065_v53 = vunpack.i.l.bf16 %v3064_v32 }
  0xe8   :  { %v3071_v54 = vunpack.i.h.bf16 %v3069_v27  ;;  %v3070_v55 = vunpack.i.l.bf16 %v3069_v27 }
  0xe9   :  { %v781_v12 = vsel %vm768_vm5, %v764_v33, %v3065_v53  ;;  %v782_v5 = vsel %vm768_vm5, %v765_v63, %v3066_v52 }
  0xea   :  { %v3074_v44 = vpop.permute.xlu0 %3073  ;;  %v783_v8 = vsel %vm768_vm5, %v766_v2, %v3070_v55  ;;  %v784_v9 = vsel %vm768_vm5, %v767_v3, %v3071_v54 }
  0xeb   :  { %v3079_v39 = vpop.permute.xlu1 %3078  ;;  %v3076_v60 = vunpack.i.h.bf16 %v3074_v44  ;;  %v3075_v61 = vunpack.i.l.bf16 %v3074_v44 }
  0xec   :  { %v3081_v0 = vunpack.i.h.bf16 %v3079_v39  ;;  %v3080_v10 = vunpack.i.l.bf16 %v3079_v39  ;;  %v3442_v39 = vmov 0.0  }
  0xed   :  { %v798_v13 = vsel %vm785_vm6, %v781_v12, %v3075_v61  ;;  %v799_v14 = vsel %vm785_vm6, %v782_v5, %v3076_v60  ;;  %1376 = vst.msk [vmem:[#allocation2 + $0x100] sm:$0xff] %vm700_vm1, %v3442_v39  ;;  %1343 = vst.msk [vmem:[#allocation2] sm:$0xff] %vm700_vm1, %v3442_v39 }
  0xee   :  { %v3084_v62 = vpop.permute.xlu0 %3083  ;;  %v800_v16 = vsel %vm785_vm6, %v783_v8, %v3080_v10  ;;  %v801_v17 = vsel %vm785_vm6, %v784_v9, %v3081_v0  ;;  %1377 = vst.msk [vmem:[#allocation2 + $0x108] sm:$0x3] %vm1344_vm11, %v3442_v39  ;;  %1345 = vst.msk [vmem:[#allocation2 + $0x8] sm:$0x3] %vm1344_vm11, %v3442_v39 }
  0xef   :  { %v3089_v1 = vpop.permute.xlu1 %3088  ;;  %v3086_v11 = vunpack.i.h.bf16 %v3084_v62  ;;  %v3085_v4 = vunpack.i.l.bf16 %v3084_v62  ;;  %1346 = vst.msk [vmem:[#allocation2 + $0x10] sm:$0xff] %vm700_vm1, %v3442_v39  ;;  %1348 = vst.msk [vmem:[#allocation2 + $0x20] sm:$0xff] %vm700_vm1, %v3442_v39 }
  0xf0   :  { %v3091_v6 = vunpack.i.h.bf16 %v3089_v1  ;;  %v3090_v7 = vunpack.i.l.bf16 %v3089_v1  ;;  %1347 = vst.msk [vmem:[#allocation2 + $0x18] sm:$0x3] %vm1344_vm11, %v3442_v39  ;;  %1349 = vst.msk [vmem:[#allocation2 + $0x28] sm:$0x3] %vm1344_vm11, %v3442_v39 }
  0xf1   :  { %v815_v21 = vsel %vm802_vm7, %v798_v13, %v3085_v4  ;;  %v816_v22 = vsel %vm802_vm7, %v799_v14, %v3086_v11  ;;  %1350 = vst.msk [vmem:[#allocation2 + $0x30] sm:$0xff] %vm700_vm1, %v3442_v39  ;;  %1352 = vst.msk [vmem:[#allocation2 + $0x40] sm:$0xff] %vm700_vm1, %v3442_v39 }
  0xf2   :  { %v3094_v15 = vpop.permute.xlu0 %3093  ;;  %v817_v24 = vsel %vm802_vm7, %v800_v16, %v3090_v7  ;;  %v818_v31 = vsel %vm802_vm7, %v801_v17, %v3091_v6  ;;  %1351 = vst.msk [vmem:[#allocation2 + $0x38] sm:$0x3] %vm1344_vm11, %v3442_v39  ;;  %1353 = vst.msk [vmem:[#allocation2 + $0x48] sm:$0x3] %vm1344_vm11, %v3442_v39 }
  0xf3   :  { %v3096_v18 = vunpack.i.h.bf16 %v3094_v15  ;;  %v3095_v19 = vunpack.i.l.bf16 %v3094_v15  ;;  %v3099_v20 = vpop.permute.xlu1 %3098  ;;  %1354 = vst.msk [vmem:[#allocation2 + $0x50] sm:$0xff] %vm700_vm1, %v3442_v39  ;;  %1356 = vst.msk [vmem:[#allocation2 + $0x60] sm:$0xff] %vm700_vm1, %v3442_v39 }
  0xf4   :  { %v3101_v23 = vunpack.i.h.bf16 %v3099_v20  ;;  %v3100_v30 = vunpack.i.l.bf16 %v3099_v20  ;;  %1355 = vst.msk [vmem:[#allocation2 + $0x58] sm:$0x3] %vm1344_vm11, %v3442_v39  ;;  %1357 = vst.msk [vmem:[#allocation2 + $0x68] sm:$0x3] %vm1344_vm11, %v3442_v39 }
  0xf5   :  { %v832_v56 = vsel %vm819_vm8, %v815_v21, %v3095_v19  ;;  %v833_v25 = vsel %vm819_vm8, %v816_v22, %v3096_v18  ;;  %1358 = vst.msk [vmem:[#allocation2 + $0x70] sm:$0xff] %vm700_vm1, %v3442_v39  ;;  %1360 = vst.msk [vmem:[#allocation2 + $0x80] sm:$0xff] %vm700_vm1, %v3442_v39 }
  0xf6   :  { %v842_v32 = vpack.c.bf16 %v833_v25, %v832_v56  ;;  %v834_v26 = vsel %vm819_vm8, %v817_v24, %v3100_v30  ;;  %v835_v57 = vsel %vm819_vm8, %v818_v31, %v3101_v23  ;;  %1359 = vst.msk [vmem:[#allocation2 + $0x78] sm:$0x3] %vm1344_vm11, %v3442_v39  ;;  %1361 = vst.msk [vmem:[#allocation2 + $0x88] sm:$0x3] %vm1344_vm11, %v3442_v39 }
  0xf7   :  { %v843_v27 = vpack.c.bf16 %v835_v57, %v834_v26  ;;  %1362 = vst.msk [vmem:[#allocation2 + $0x90] sm:$0xff] %vm700_vm1, %v3442_v39  ;;  %1364 = vst.msk [vmem:[#allocation2 + $0xa0] sm:$0xff] %vm700_vm1, %v3442_v39 }
  0xf8   :  { %2744 = vmatprep.mubr.msk.bf16.mxu0 %vm864_vm9, %v842_v32  ;;  %1363 = vst.msk [vmem:[#allocation2 + $0x98] sm:$0x3] %vm1344_vm11, %v3442_v39  ;;  %1365 = vst.msk [vmem:[#allocation2 + $0xa8] sm:$0x3] %vm1344_vm11, %v3442_v39 }
  0xf9   :  { %2745 = vmatmul.mubr.msk.bf16.gmra.mxu0 %vm864_vm9, %v843_v27  ;;  %1366 = vst.msk [vmem:[#allocation2 + $0xb0] sm:$0xff] %vm700_vm1, %v3442_v39  ;;  %1368 = vst.msk [vmem:[#allocation2 + $0xc0] sm:$0xff] %vm700_vm1, %v3442_v39 }
  0xfa   :  { %1367 = vst.msk [vmem:[#allocation2 + $0xb8] sm:$0x3] %vm1344_vm11, %v3442_v39  ;;  %1369 = vst.msk [vmem:[#allocation2 + $0xc8] sm:$0x3] %vm1344_vm11, %v3442_v39 }
  0xfb   :  { %1370 = vst.msk [vmem:[#allocation2 + $0xd0] sm:$0xff] %vm700_vm1, %v3442_v39  ;;  %1372 = vst.msk [vmem:[#allocation2 + $0xe0] sm:$0xff] %vm700_vm1, %v3442_v39 }
  0xfc   :  { %1371 = vst.msk [vmem:[#allocation2 + $0xd8] sm:$0x3] %vm1344_vm11, %v3442_v39  ;;  %1373 = vst.msk [vmem:[#allocation2 + $0xe8] sm:$0x3] %vm1344_vm11, %v3442_v39 }
  0xfd   :  { %1374 = vst.msk [vmem:[#allocation2 + $0xf0] sm:$0xff] %vm700_vm1, %v3442_v39  ;;  %1378 = vst.msk [vmem:[#allocation2 + $0x110] sm:$0xff] %vm700_vm1, %v3442_v39 }
  0xfe   :  { %1375 = vst.msk [vmem:[#allocation2 + $0xf8] sm:$0x3] %vm1344_vm11, %v3442_v39  ;;  %1379 = vst.msk [vmem:[#allocation2 + $0x118] sm:$0x3] %vm1344_vm11, %v3442_v39 }
  0xff   :  { %1380 = vst.msk [vmem:[#allocation2 + $0x120] sm:$0xff] %vm700_vm1, %v3442_v39  ;;  %1382 = vst.msk [vmem:[#allocation2 + $0x130] sm:$0xff] %vm700_vm1, %v3442_v39 }
 0x100   :  { %1381 = vst.msk [vmem:[#allocation2 + $0x128] sm:$0x3] %vm1344_vm11, %v3442_v39  ;;  %1383 = vst.msk [vmem:[#allocation2 + $0x138] sm:$0x3] %vm1344_vm11, %v3442_v39 }
 0x15c   :  { %v4130_v58 = vpop.f32.mrf.mxu0 }
 0x15d   :  { %v4144_v36 = vmul.f32 %v4130_v58, %v4130_v58  ;;  %v1184_v3 = vsel %vm1180_vm10, %v4130_v58, 0.0  ;;  %v993_v30 = vsel %vm700_vm1, %v4130_v58, 0.0 }
 0x15e   :  { %v4132_v28 = vpop.f32.mrf.mxu0 }
 0x15f   :  { %v4138_v34 = vmul.f32 %v4132_v28, %v4132_v28  ;;  %v1221_v45 = vsel %vm1180_vm10, %v4144_v36, 0.0  ;;  %v1181_v1 = vsel %vm1180_vm10, %v4132_v28, 0.0  ;;  %v990_v14 = vsel %vm700_vm1, %v4132_v28, 0.0 }
 0x160   :  { %v4134_v29 = vpop.f32.mrf.mxu0  ;;  %v1046_v26 = vsel %vm700_vm1, %v4144_v36, 0.0 }
 0x161   :  { %v1218_v38 = vsel %vm1180_vm10, %v4138_v34, 0.0  ;;  %v4154_v42 = vmul.f32 %v4134_v29, %v4134_v29  ;;  %v1186_v4 = vsel %vm1180_vm10, %v4134_v29, 0.0  ;;  %v1043_v19 = vsel %vm700_vm1, %v4138_v34, 0.0 }
 0x162   :  { %v4140_v35 = vpop.f32.mrf.mxu0 }
 0x163   :  { %v4148_v37 = vmul.f32 %v4140_v35, %v4140_v35  ;;  %v1223_v46 = vsel %vm1180_vm10, %v4154_v42, 0.0  ;;  %v1182_v63 = vsel %vm1180_vm10, %v4140_v35, 0.0  ;;  %v991_v9 = vsel %vm700_vm1, %v4140_v35, 0.0 }
 0x164   :  { %v1183_v2 = vadd.f32 %v1182_v63, %v1181_v1  ;;  %v992_v18 = vadd.f32 %v991_v9, %v990_v14  ;;  %v1048_v36 = vsel %vm700_vm1, %v4154_v42, 0.0 }
 0x165   :  { %v1219_v43 = vsel %vm1180_vm10, %v4148_v37, 0.0  ;;  %v1044_v15 = vsel %vm700_vm1, %v4148_v37, 0.0 }
 0x166   :  { %v1220_v44 = vadd.f32 %v1219_v43, %v1218_v38  ;;  %v1185_v11 = vadd.f32 %v1184_v3, %v1183_v2  ;;  %v1045_v21 = vadd.f32 %v1044_v15, %v1043_v19  ;;  %v994_v25 = vadd.f32 %v993_v30, %v992_v18 }
 0x168   :  { %v1222_v59 = vadd.f32 %v1221_v45, %v1220_v44  ;;  %v1187_v5 = vadd.f32 %v1186_v4, %v1185_v11  ;;  %v1047_v37 = vadd.f32 %v1046_v26, %v1045_v21  ;;  %v995_v45 = vsel %vm700_vm1, %v4134_v29, 0.0 }
 0x16a   :  { %v1224_v47 = vadd.f32 %v1223_v46, %v1222_v59  ;;  %v1049_v63 = vadd.f32 %v1048_v36, %v1047_v37 }
 0x17c   :  { %v4202_v48 = vpop.f32.mrf.mxu0 }
 0x17d   :  { %v4215_v53 = vmul.f32 %v4202_v48, %v4202_v48  ;;  %v1192_v13 = vsel %vm1180_vm10, %v4202_v48, 0.0 }
 0x17e   :  { %v4204_v49 = vpop.f32.mrf.mxu0 }
 0x17f   :  { %v1031_v40 = vmul.f32 %v4204_v49, %v4204_v49  ;;  %v1229_v62 = vsel %vm1180_vm10, %v4215_v53, 0.0  ;;  %v1188_v12 = vsel %vm1180_vm10, %v4204_v49, 0.0  ;;  %v997_v59 = vsel %vm700_vm1, %v4204_v49, 0.0 }
 0x180   :  { %v4208_v50 = vpop.f32.mrf.mxu0  ;;  %v1189_v7 = vadd.f32 %v1188_v12, %v1187_v5 }
 0x181   :  { %v1225_v41 = vsel %vm1180_vm10, %v1031_v40, 0.0  ;;  %v4221_v55 = vmul.f32 %v4208_v50, %v4208_v50  ;;  %v1194_v22 = vsel %vm1180_vm10, %v4208_v50, 0.0 }
 0x182   :  { %v1226_v51 = vadd.f32 %v1225_v41, %v1224_v47  ;;  %v4211_v52 = vpop.f32.mrf.mxu0  ;;  %v996_v47 = vadd.f32 %v995_v45, %v994_v25 }
 0x183   :  { %v1032_v54 = vmul.f32 %v4211_v52, %v4211_v52  ;;  %v1231_v0 = vsel %vm1180_vm10, %v4221_v55, 0.0  ;;  %v1190_v6 = vsel %vm1180_vm10, %v4211_v52, 0.0  ;;  %v1056_v15 = vsel %vm700_vm1, %v4221_v55, 0.0 }
 0x184   :  { %v1191_v8 = vadd.f32 %v1190_v6, %v1189_v7  ;;  %v1001_v6 = vsel %vm700_vm1, %v4202_v48, 0.0 }
 0x185   :  { %v1227_v60 = vsel %vm1180_vm10, %v1032_v54, 0.0  ;;  %v1052_v1 = vsel %vm700_vm1, %v1032_v54, 0.0 }
 0x186   :  { %v1228_v61 = vadd.f32 %v1227_v60, %v1226_v51  ;;  %v1193_v16 = vadd.f32 %v1192_v13, %v1191_v8  ;;  %v1050_v60 = vsel %vm700_vm1, %v1031_v40, 0.0  ;;  %v1054_v8 = vsel %vm700_vm1, %v4215_v53, 0.0 }
 0x187   :  { %v1051_v11 = vadd.f32 %v1050_v60, %v1049_v63  ;;  %v1003_v13 = vsel %vm700_vm1, %v4208_v50, 0.0 }
 0x188   :  { %v1230_v33 = vadd.f32 %v1229_v62, %v1228_v61  ;;  %v1195_v24 = vadd.f32 %v1194_v22, %v1193_v16  ;;  %v999_v61 = vsel %vm700_vm1, %v4211_v52, 0.0 }
 0x189   :  { %v1053_v5 = vadd.f32 %v1052_v1, %v1051_v11 }
 0x18a   :  { %v1232_v10 = vadd.f32 %v1231_v0, %v1230_v33  ;;  %v998_v33 = vadd.f32 %v997_v59, %v996_v47 }
 0x18b   :  { %v1055_v9 = vadd.f32 %v1054_v8, %v1053_v5 }
 0x18c   :  { %v1000_v4 = vadd.f32 %v999_v61, %v998_v33 }
 0x18d   :  { %v1057_v21 = vadd.f32 %v1056_v15, %v1055_v9 }
 0x18e   :  { %v1002_v7 = vadd.f32 %v1001_v6, %v1000_v4 }
 0x190   :  { %v1004_v14 = vadd.f32 %v1003_v13, %v1002_v7 }
 0x19c   :  { %v4248_v17 = vpop.f32.mrf.mxu0 }
 0x19d   :  { %v1037_v38 = vmul.f32 %v4248_v17, %v4248_v17  ;;  %v1200_v39 = vsel %vm1180_vm10, %v4248_v17, 0.0 }
 0x19e   :  { %v4252_v20 = vpop.f32.mrf.mxu0 }
 0x19f   :  { %v1035_v23 = vmul.f32 %v4252_v20, %v4252_v20  ;;  %v1196_v31 = vsel %vm1180_vm10, %v4252_v20, 0.0  ;;  %v1237_v0 = vsel %vm1180_vm10, %v1037_v38, 0.0  ;;  %v1005_v54 = vsel %vm700_vm1, %v4252_v20, 0.0 }
 0x1a0   :  { %v4262_v56 = vpop.f32.mrf.mxu0  ;;  %v1197_v57 = vadd.f32 %v1196_v31, %v1195_v24  ;;  %v1006_v19 = vadd.f32 %v1005_v54, %v1004_v14  ;;  %v1009_v31 = vsel %vm700_vm1, %v4248_v17, 0.0  ;;  %v1062_v55 = vsel %vm700_vm1, %v1037_v38, 0.0 }
 0x1a1   :  { %v1233_v32 = vsel %vm1180_vm10, %v1035_v23, 0.0  ;;  %v1038_v41 = vmul.f32 %v4262_v56, %v4262_v56  ;;  %v1058_v16 = vsel %vm700_vm1, %v1035_v23, 0.0 }
 0x1a2   :  { %v1234_v27 = vadd.f32 %v1233_v32, %v1232_v10  ;;  %v4267_v34 = vpop.f32.mrf.mxu0  ;;  %v1202_v10 = vsel %vm1180_vm10, %v4262_v56, 0.0  ;;  %v1059_v22 = vadd.f32 %v1058_v16, %v1057_v21 }
 0x1a3   :  { %v1036_v43 = vmul.f32 %v4267_v34, %v4267_v34  ;;  %v1198_v44 = vsel %vm1180_vm10, %v4267_v34, 0.0  ;;  %v1239_v40 = vsel %vm1180_vm10, %v1038_v41, 0.0  ;;  %v1007_v18 = vsel %vm700_vm1, %v4267_v34, 0.0 }
 0x1a4   :  { %v1199_v46 = vadd.f32 %v1198_v44, %v1197_v57  ;;  %v1008_v30 = vadd.f32 %v1007_v18, %v1006_v19  ;;  %v1011_v57 = vsel %vm700_vm1, %v4262_v56, 0.0  ;;  %v1064_v38 = vsel %vm700_vm1, %v1038_v41, 0.0 }
 0x1a5   :  { %v1235_v51 = vsel %vm1180_vm10, %v1036_v43, 0.0  ;;  %v1060_v53 = vsel %vm700_vm1, %v1036_v43, 0.0 }
 0x1a6   :  { %v1201_v62 = vadd.f32 %v1200_v39, %v1199_v46  ;;  %v1236_v42 = vadd.f32 %v1235_v51, %v1234_v27  ;;  %v1061_v24 = vadd.f32 %v1060_v53, %v1059_v22  ;;  %v1010_v25 = vadd.f32 %v1009_v31, %v1008_v30 }
 0x1a8   :  { %v1238_v2 = vadd.f32 %v1237_v0, %v1236_v42  ;;  %v1203_v3 = vadd.f32 %v1202_v10, %v1201_v62  ;;  %v1063_v26 = vadd.f32 %v1062_v55, %v1061_v24  ;;  %v1012_v45 = vadd.f32 %v1011_v57, %v1010_v25 }
 0x1aa   :  { %v1240_v12 = vadd.f32 %v1239_v40, %v1238_v2  ;;  %v1065_v39 = vadd.f32 %v1064_v38, %v1063_v26 }
 0x1b9   :  { %v4310_v32 = vpop.f32.mrf.mxu0 }
 0x1ba   :  { %v1041_v61 = vmul.f32 %v4310_v32, %v4310_v32  ;;  %v1017_v41 = vsel %vm700_vm1, %v4310_v32, 0.0  ;;  %v1208_v11 = vsel %vm1180_vm10, %v4310_v32, 0.0 }
 0x1bb   :  { %v4313_v23 = vpop.f32.mrf.mxu0 }
 0x1bc   :  { %v1013_v27 = vsel %vm700_vm1, %v4313_v23, 0.0  ;;  %v1039_v37 = vmul.f32 %v4313_v23, %v4313_v23  ;;  %v1204_v43 = vsel %vm1180_vm10, %v4313_v23, 0.0  ;;  %v1070_v5 = vsel %vm700_vm1, %v1041_v61, 0.0 }
 0x1bd   :  { %v4323_v44 = vpop.f32.mrf.mxu0  ;;  %v1014_v47 = vadd.f32 %v1013_v27, %v1012_v45  ;;  %v1205_v51 = vadd.f32 %v1204_v43, %v1203_v3  ;;  %v1245_v6 = vsel %vm1180_vm10, %v1041_v61, 0.0 }
 0x1be   :  { %v1066_v36 = vsel %vm700_vm1, %v1039_v37, 0.0  ;;  %v1241_v59 = vsel %vm1180_vm10, %v1039_v37, 0.0  ;;  %v1042_v10 = vmul.f32 %v4323_v44, %v4323_v44  ;;  %v1019_v7 = vsel %vm700_vm1, %v4323_v44, 0.0 }
 0x1bf   :  { %v4328_v46 = vpop.f32.mrf.mxu0  ;;  %v1242_v60 = vadd.f32 %v1241_v59, %v1240_v12  ;;  %v1067_v63 = vadd.f32 %v1066_v36, %v1065_v39  ;;  %v1210_v9 = vsel %vm1180_vm10, %v4323_v44, 0.0 }
 0x1c0   :  { %v1015_v62 = vsel %vm700_vm1, %v4328_v46, 0.0  ;;  %v1040_v42 = vmul.f32 %v4328_v46, %v4328_v46  ;;  %v1206_v0 = vsel %vm1180_vm10, %v4328_v46, 0.0  ;;  %v1072_v15 = vsel %vm700_vm1, %v1042_v10, 0.0 }
 0x1c1   :  { %v1016_v33 = vadd.f32 %v1015_v62, %v1014_v47  ;;  %v1207_v2 = vadd.f32 %v1206_v0, %v1205_v51  ;;  %v1247_v16 = vsel %vm1180_vm10, %v1042_v10, 0.0 }
 0x1c2   :  { %v1068_v1 = vsel %vm700_vm1, %v1040_v42, 0.0  ;;  %v1243_v3 = vsel %vm1180_vm10, %v1040_v42, 0.0 }
 0x1c3   :  { %v1018_v4 = vadd.f32 %v1017_v41, %v1016_v33  ;;  %v1069_v40 = vadd.f32 %v1068_v1, %v1067_v63  ;;  %v1244_v12 = vadd.f32 %v1243_v3, %v1242_v60  ;;  %v1209_v8 = vadd.f32 %v1208_v11, %v1207_v2 }
 0x1c5   :  { %v1020_v13 = vadd.f32 %v1019_v7, %v1018_v4  ;;  %v1071_v54 = vadd.f32 %v1070_v5, %v1069_v40  ;;  %v1246_v14 = vadd.f32 %v1245_v6, %v1244_v12  ;;  %v1211_v18 = vadd.f32 %v1210_v9, %v1209_v8 }
 0x1c7   :  { %v1021_v19 = vrot.slane %v1020_v13, 4  ;;  %v1073_v21 = vadd.f32 %v1072_v15, %v1071_v54  ;;  %v1248_v53 = vadd.f32 %v1247_v16, %v1246_v14  ;;  %v1212_v22 = vrot.slane %v1211_v18, 4 }
 0x1c9   :  { %v1022_v30 = vadd.f32 %v1021_v19, %v1020_v13  ;;  %v1074_v24 = vrot.slane %v1073_v21, 4  ;;  %v1249_v31 = vrot.slane %v1248_v53, 4  ;;  %v1213_v25 = vadd.f32 %v1212_v22, %v1211_v18 }
 0x1cb   :  { %v1023_v55 = vrot.slane %v1022_v30, 2  ;;  %v1075_v26 = vadd.f32 %v1074_v24, %v1073_v21  ;;  %v1250_v57 = vadd.f32 %v1249_v31, %v1248_v53  ;;  %v1214_v27 = vrot.slane %v1213_v25, 2 }
 0x1cd   :  { %v1024_v37 = vadd.f32 %v1023_v55, %v1022_v30  ;;  %v1076_v43 = vrot.slane %v1075_v26, 2  ;;  %v1251_v45 = vrot.slane %v1250_v57, 2  ;;  %v1215_v38 = vadd.f32 %v1214_v27, %v1213_v25 }
 0x1cf   :  { %v1025_v36 = vrot.slane %v1024_v37, 1  ;;  %v1077_v59 = vadd.f32 %v1076_v43, %v1075_v26  ;;  %v1252_v47 = vadd.f32 %v1251_v45, %v1250_v57  ;;  %v1216_v39 = vrot.slane %v1215_v38, 1  ;;  %v4409_v26 = vld [vmem:[%s5156_s6] ss:$0 sm:$0xff] }
 0x1d1   :  { %v1026_v51 = vadd.f32 %v1025_v36, %v1024_v37  ;;  %v1078_v60 = vrot.slane %v1077_v59, 1  ;;  %v1253_v61 = vrot.slane %v1252_v47, 1  ;;  %v1217_v62 = vadd.f32 %v1216_v39, %v1215_v38  ;;  %v4428_v39 = vld [vmem:[%s5157_s7] ss:$0 sm:$0xff] }
 0x1d3   :  { %v1079_v42 = vadd.f32 %v1078_v60, %v1077_v59  ;;  %v4354_v41 = vmul.f32 0.0078125, %v1026_v51  ;;  %v1254_v33 = vadd.f32 %v1253_v61, %v1252_v47  ;;  %v4356_v63 = vmul.f32 0.0078125, %v1217_v62 }
 0x1d5   :  { %v1081_v0 = vmul.f32 0.0078125, %v1079_v42  ;;  %v1082_v10 = vmul.f32 %v4354_v41, %v4354_v41  ;;  %v1256_v1 = vmul.f32 0.0078125, %v1254_v33  ;;  %v1257_v2 = vmul.f32 %v4356_v63, %v4356_v63 }
 0x1d6   :  { %v1272_v3 = vsub.f32 %v4328_v46, %v4356_v63  ;;  %v1268_v5 = vsub.f32 %v4267_v34, %v4356_v63  ;;  %v1267_v6 = vsub.f32 %v4252_v20, %v4356_v63  ;;  %v1270_v7 = vsub.f32 %v4262_v56, %v4356_v63 }
 0x1d7   :  { %v1083_v11 = vsub.f32 %v1081_v0, %v1082_v10  ;;  %v1258_v4 = vsub.f32 %v1256_v1, %v1257_v2  ;;  %v1271_v8 = vsub.f32 %v4313_v23, %v4356_v63  ;;  %v1274_v9 = vsub.f32 %v4323_v44, %v4356_v63 }
 0x1d8   :  { %v1273_v13 = vsub.f32 %v4310_v32, %v4356_v63  ;;  %v1097_v54 = vsub.f32 %v4328_v46, %v4354_v41  ;;  %v1085_v14 = vsub.f32 %v4140_v35, %v4354_v41  ;;  %v1086_v15 = vsub.f32 %v4130_v58, %v4354_v41 }
 0x1d9   :  { %v1100_v40 = vadd.f32 1e-05, %v1083_v11  ;;  %v1275_v12 = vadd.f32 1e-05, %v1258_v4  ;;  %v1084_v16 = vsub.f32 %v4132_v28, %v4354_v41  ;;  %v1087_v18 = vsub.f32 %v4134_v29, %v4354_v41 }
 0x1da   :  { %v1088_v19 = vsub.f32 %v4204_v49, %v4354_v41  ;;  %v1089_v21 = vsub.f32 %v4211_v52, %v4354_v41  ;;  %v1090_v46 = vsub.f32 %v4202_v48, %v4354_v41  ;;  %v1091_v53 = vsub.f32 %v4208_v50, %v4354_v41 }
 0x1db   :  { %3428 = vrsqrt.f32 %v1100_v40  ;;  %v1092_v22 = vsub.f32 %v4252_v20, %v4354_v41  ;;  %v1093_v30 = vsub.f32 %v4267_v34, %v4354_v41  ;;  %v1094_v24 = vsub.f32 %v4248_v17, %v4354_v41 }
 0x1dc   :  { %3430 = vrsqrt.f32 %v1275_v12  ;;  %v1095_v31 = vsub.f32 %v4262_v56, %v4354_v41  ;;  %v1096_v25 = vsub.f32 %v4313_v23, %v4354_v41  ;;  %v1098_v57 = vsub.f32 %v4310_v32, %v4354_v41  ;;  %v3425_v56 = vld [vmem:[%s5158_s5 + $0x10] ss:$0 sps:$4 sm:$0x33]  }
 0x1dd   :  { %v1099_v27 = vsub.f32 %v4323_v44, %v4354_v41  ;;  %v1260_v37 = vsub.f32 %v4140_v35, %v4356_v63  ;;  %v1259_v43 = vsub.f32 %v4132_v28, %v4356_v63  ;;  %v2239_v23 = vsel %vm889_vm0, %v3425_v56, 0  ;;  %2771 = vmatprep.subr.msk.bf16.mxu1 %vm889_vm0, %v3425_v56  ;;  %v3426_v44 = vld [vmem:[%s5158_s5 + $0x8] sm:$0xff]  }
 0x1de   :  { %2749 = vmatpush3.bf16.msra.mxu1 %v2239_v23 }
 0x1df   :  { %2750 = vmatprep.subr.bf16.mxu1 %v3426_v44 }
 0x1e2   :  { %2751 = vmatpush3.bf16.msra.mxu1 %v3426_v44 }
 0x1e8   :  { %v4404_v55 = vpop.eup %3428 }
 0x1e9   :  { %v4419_v45 = vpop.eup %3430  ;;  %v1115_v38 = vmul.f32 %v4404_v55, %v1097_v54  ;;  %v1103_v36 = vmul.f32 %v4404_v55, %v1085_v14  ;;  %v1104_v59 = vmul.f32 %v4404_v55, %v1086_v15  ;;  %v1102_v47 = vmul.f32 %v4404_v55, %v1084_v16 }
 0x1ea   :  { %v4431_v51 = vmul.f32 %v4419_v45, %v1272_v3  ;;  %v1105_v60 = vmul.f32 %v4404_v55, %v1087_v18  ;;  %v1106_v61 = vmul.f32 %v4404_v55, %v1088_v19  ;;  %v1107_v62 = vmul.f32 %v4404_v55, %v1089_v21 }
 0x1eb   :  { %v1138_v42 = vmul.f32 %v4409_v26, %v1115_v38  ;;  %v1126_v41 = vmul.f32 %v4409_v26, %v1103_v36  ;;  %v1127_v33 = vmul.f32 %v4409_v26, %v1104_v59  ;;  %v1125_v0 = vmul.f32 %v4409_v26, %v1102_v47 }
 0x1ec   :  { %v1128_v10 = vmul.f32 %v4409_v26, %v1105_v60  ;;  %v1129_v1 = vmul.f32 %v4409_v26, %v1106_v61  ;;  %v1108_v2 = vmul.f32 %v4404_v55, %v1090_v46  ;;  %v1130_v3 = vmul.f32 %v4409_v26, %v1107_v62 }
 0x1ed   :  { %v1161_v11 = vadd.f32 %v4428_v39, %v1138_v42  ;;  %v1149_v4 = vadd.f32 %v4428_v39, %v1126_v41  ;;  %v1150_v40 = vadd.f32 %v4428_v39, %v1127_v33  ;;  %v1148_v12 = vadd.f32 %v4428_v39, %v1125_v0 }
 0x1ee   :  { %v1151_v54 = vadd.f32 %v4428_v39, %v1128_v10  ;;  %v1152_v14 = vadd.f32 %v4428_v39, %v1129_v1  ;;  %v1131_v15 = vmul.f32 %v4409_v26, %v1108_v2  ;;  %v1153_v16 = vadd.f32 %v4428_v39, %v1130_v3 }
 0x1ef   :  { %v1177_v18 = vmax.f32 %v1161_v11, 0.0  ;;  %v1165_v19 = vmax.f32 %v1149_v4, 0.0  ;;  %v1166_v21 = vmax.f32 %v1150_v40, 0.0  ;;  %v1164_v46 = vmax.f32 %v1148_v12, 0.0  ;;  %v1417_v40 = vld [vmem:[#allocation2 + $0x1] sm:$0xff] }
 0x1f0   :  { %v1167_v38 = vmax.f32 %v1151_v54, 0.0  ;;  %v1168_v36 = vmax.f32 %v1152_v14, 0.0  ;;  %v1154_v59 = vadd.f32 %v4428_v39, %v1131_v15  ;;  %v1169_v47 = vmax.f32 %v1153_v16, 0.0 }
 0x1f1   :  { %1398 = vst.msk [vmem:[#allocation2 + $0x101] sm:$0xff] %vm700_vm1, %v1177_v18  ;;  %1386 = vst.msk [vmem:[#allocation2 + $0x21] sm:$0xff] %vm700_vm1, %v1165_v19  ;;  %v1109_v60 = vmul.f32 %v4404_v55, %v1091_v53  ;;  %v1110_v61 = vmul.f32 %v4404_v55, %v1092_v22  ;;  %v1111_v62 = vmul.f32 %v4404_v55, %v1093_v30 }
 0x1f2   :  { %1387 = vst.msk [vmem:[#allocation2 + $0x31] sm:$0xff] %vm700_vm1, %v1166_v21  ;;  %1385 = vst.msk [vmem:[#allocation2 + $0x11] sm:$0xff] %vm700_vm1, %v1164_v46  ;;  %v1112_v42 = vmul.f32 %v4404_v55, %v1094_v24  ;;  %v1170_v41 = vmax.f32 %v1154_v59, 0.0  ;;  %v1113_v33 = vmul.f32 %v4404_v55, %v1095_v31  ;;  %v1114_v0 = vmul.f32 %v4404_v55, %v1096_v25 }
 0x1f3   :  { %1388 = vst.msk [vmem:[#allocation2 + $0x41] sm:$0xff] %vm700_vm1, %v1167_v38  ;;  %1389 = vst.msk [vmem:[#allocation2 + $0x51] sm:$0xff] %vm700_vm1, %v1168_v36  ;;  %v1116_v10 = vmul.f32 %v4404_v55, %v1098_v57  ;;  %v1132_v53 = vmul.f32 %v4409_v26, %v1109_v60  ;;  %v1133_v22 = vmul.f32 %v4409_v26, %v1110_v61 }
 0x1f4   :  { %1390 = vst.msk [vmem:[#allocation2 + $0x61] sm:$0xff] %vm700_vm1, %v1169_v47  ;;  %v1134_v30 = vmul.f32 %v4409_v26, %v1111_v62  ;;  %v1135_v24 = vmul.f32 %v4409_v26, %v1112_v42  ;;  %1391 = vst.msk [vmem:[#allocation2 + $0x71] sm:$0xff] %vm700_vm1, %v1170_v41  ;;  %v1136_v1 = vmul.f32 %v4409_v26, %v1113_v33  ;;  %v1433_v62 = vld [vmem:[#allocation2 + $0x2] sm:$0xff] }
 0x1f5   :  { %v1137_v2 = vmul.f32 %v4409_v26, %v1114_v0  ;;  %v1139_v31 = vmul.f32 %v4409_v26, %v1116_v10  ;;  %v1117_v25 = vmul.f32 %v4404_v55, %v1099_v27  ;;  %v1155_v57 = vadd.f32 %v4428_v39, %v1132_v53 }
 0x1f6   :  { %v1156_v3 = vadd.f32 %v4428_v39, %v1133_v22  ;;  %v1157_v11 = vadd.f32 %v4428_v39, %v1134_v30  ;;  %v1158_v4 = vadd.f32 %v4428_v39, %v1135_v24  ;;  %v1159_v12 = vadd.f32 %v4428_v39, %v1136_v1 }
 0x1f7   :  { %v1160_v54 = vadd.f32 %v4428_v39, %v1137_v2  ;;  %v1162_v14 = vadd.f32 %v4428_v39, %v1139_v31  ;;  %v1140_v15 = vmul.f32 %v4409_v26, %v1117_v25  ;;  %v1171_v16 = vmax.f32 %v1155_v57, 0.0 }
 0x1f8   :  { %v1172_v18 = vmax.f32 %v1156_v3, 0.0  ;;  %v1173_v55 = vmax.f32 %v1157_v11, 0.0  ;;  %v1174_v27 = vmax.f32 %v1158_v4, 0.0  ;;  %v1419_v19 = vld [vmem:[#allocation2 + $0x21] sm:$0xff]  ;;  %v1175_v38 = vmax.f32 %v1159_v12, 0.0 }
 0x1f9   :  { %v1420_v21 = vld [vmem:[#allocation2 + $0x31] sm:$0xff]  ;;  %v1176_v36 = vmax.f32 %v1160_v54, 0.0  ;;  %v1178_v59 = vmax.f32 %v1162_v14, 0.0  ;;  %v1163_v47 = vadd.f32 %v4428_v39, %v1140_v15  ;;  %1392 = vst.msk [vmem:[#allocation2 + $0x81] sm:$0xff] %vm700_vm1, %v1171_v16  ;;  %v4495_v26 = vmul.f32 %v4419_v45, %v1260_v37  ;;  %v1435_v42 = vld [vmem:[#allocation2 + $0x22] sm:$0xff] }
 0x1fa   :  { %v1418_v46 = vld [vmem:[#allocation2 + $0x11] sm:$0xff]  ;;  %v4485_v60 = vpack.i.bf16 %v1420_v21, %v1419_v19  ;;  %1393 = vst.msk [vmem:[#allocation2 + $0xb1] sm:$0xff] %vm700_vm1, %v1172_v18  ;;  %1394 = vst.msk [vmem:[#allocation2 + $0xc1] sm:$0xff] %vm700_vm1, %v1173_v55  ;;  %v1262_v39 = vsub.f32 %v4134_v29, %v4356_v63  ;;  %v4509_v29 = vmul.f32 %v4419_v45, %v1259_v43  ;;  %v4524_v43 = vld [vmem:[#allocation2 + $0x40] sm:$0xff] }
 0x1fb   :  { %v3102_v61 = vpack.i.bf16 %v1418_v46, %v1417_v40  ;;  %1395 = vst.msk [vmem:[#allocation2 + $0xd1] sm:$0xff] %vm700_vm1, %v1174_v27  ;;  %v1436_v41 = vld [vmem:[#allocation2 + $0x32] sm:$0xff]  ;;  %1396 = vst.msk [vmem:[#allocation2 + $0xe1] sm:$0xff] %vm700_vm1, %v1175_v38  ;;  %v1179_v0 = vmax.f32 %v1163_v47, 0.0  ;;  %v1261_v37 = vsub.f32 %v4130_v58, %v4356_v63  ;;  %v1264_v10 = vsub.f32 %v4211_v52, %v4356_v63  ;;  %v4528_v1 = vld [vmem:[#allocation2 + $0x20] sm:$0xff] }
 0x1fc   :  { %v1434_v33 = vld [vmem:[#allocation2 + $0x12] sm:$0xff]  ;;  %1397 = vst.msk [vmem:[#allocation2 + $0xf1] sm:$0xff] %vm700_vm1, %v1176_v36  ;;  %1399 = vst.msk [vmem:[#allocation2 + $0x111] sm:$0xff] %vm700_vm1, %v1178_v59  ;;  %3108 = vrot.lane.b32.xlu1 %v4485_v60, %s3434_s19  ;;  %v4512_v35 = vmul.f32 %v4419_v45, %v1262_v39  ;;  %v3117_v53 = vpack.i.bf16 %v1436_v41, %v1435_v42  ;;  %v1263_v2 = vsub.f32 %v4204_v49, %v4356_v63  ;;  %v1468_v11 = vld [vmem:[#allocation2 + $0x41] sm:$0xff] }
 0x1fd   :  { %3103 = vrot.lane.b32.xlu0 %v3102_v61, %s3434_s19  ;;  %1400 = vst.msk [vmem:[#allocation2 + $0x121] sm:$0xff] %vm700_vm1, %v1179_v0  ;;  %v3112_v22 = vpack.i.bf16 %v1434_v33, %v1433_v62  ;;  %v4519_v30 = vld [vmem:[#allocation2 + $0x30] sm:$0xff]  ;;  %v4522_v28 = vmul.f32 %v4419_v45, %v1261_v37  ;;  %v4531_v58 = vmul.f32 %v4419_v45, %v1264_v10  ;;  %v1484_v12 = vld [vmem:[#allocation2 + $0x42] sm:$0xff] }
 0x1fe   :  { %v4526_v24 = vld [vmem:[#allocation2 + $0x10] sm:$0xff]  ;;  %v1266_v52 = vsub.f32 %v4208_v50, %v4356_v63  ;;  %v1265_v31 = vsub.f32 %v4202_v48, %v4356_v63  ;;  %v4542_v25 = vmul.f32 %v4419_v45, %v1263_v2  ;;  %v4554_v49 = vmul.f32 %v4419_v45, %v1268_v5  ;;  %v4629_v47 = vld [vmem:[#allocation2 + $0x60] sm:$0xff] }
 0x1ff   :  { %v3127_v48 = vpack.i.bf16 %v4524_v43, %v4519_v30  ;;  %v3122_v50 = vpack.i.bf16 %v4528_v1, %v4526_v24  ;;  %v4566_v4 = vmul.f32 %v4419_v45, %v1267_v6  ;;  %v4572_v34 = vmul.f32 %v4419_v45, %v1270_v7  ;;  %v4578_v6 = vld [vmem:[#allocation2 + $0x50] sm:$0xff] }
 0x200   :  { %3118 = vrot.lane.b32.xlu1 %v3117_v53, %s3435_s20  ;;  %v4545_v57 = vmul.f32 %v4419_v45, %v1266_v52  ;;  %v4548_v3 = vmul.f32 %v4419_v45, %v1265_v31  ;;  %v3137_v5 = vpack.i.bf16 %v1468_v11, %v1420_v21  ;;  %v3132_v40 = vpack.i.bf16 %v1419_v19, %v1418_v46  ;;  %v1424_v18 = vld [vmem:[#allocation2 + $0x71] sm:$0xff]  ;;  %v1439_v21 = vld [vmem:[#allocation2 + $0x62] sm:$0xff] }
 0x201   :  { %3113 = vrot.lane.b32.xlu0 %v3112_v22, %s3435_s20  ;;  %v1269_v54 = vsub.f32 %v4248_v17, %v4356_v63  ;;  %v3147_v20 = vpack.i.bf16 %v1484_v12, %v1436_v41  ;;  %v3142_v14 = vpack.i.bf16 %v1435_v42, %v1434_v33  ;;  %v4590_v15 = vmul.f32 %v4419_v45, %v1271_v8  ;;  %v1517_v63 = vld [vmem:[#allocation2 + $0x51] sm:$0xff]  ;;  %v1456_v59 = vld [vmem:[#allocation2 + $0x80] sm:$0xff] }
 0x202   :  { %v4596_v17 = vmul.f32 %v4419_v45, %v1274_v9  ;;  %v4602_v16 = vmul.f32 %v4419_v45, %v1273_v13  ;;  %v3157_v8 = vpack.i.bf16 %v4578_v6, %v4524_v43  ;;  %v3152_v32 = vpack.i.bf16 %v4519_v30, %v4528_v1  ;;  %v3427_v13 = vld [vmem:[%s5158_s5] sm:$0xff]   ;;  %v1533_v55 = vld [vmem:[#allocation2 + $0x52] sm:$0xff] }
 0x203   :  { %v4584_v7 = vmul.f32 %v4419_v45, %v1269_v54  ;;  %v3167_v9 = vpack.i.bf16 %v1517_v63, %v1468_v11  ;;  %2752 = vmatprep.subr.bf16.mxu1 %v3427_v13  ;;  %v1423_v45 = vld [vmem:[#allocation2 + $0x61] sm:$0xff]  ;;  %v3182_v19 = vpack.i.bf16 %v1533_v55, %v1484_v12  ;;  %v1440_v46 = vld [vmem:[#allocation2 + $0x72] sm:$0xff]  ;;  %v3202_v61 = vpack.i.bf16 %v4629_v47, %v4578_v6 }
 0x204   :  { %3128 = vrot.lane.b32.xlu1 %v3127_v48, %s3436_s21  ;;  %2753 = vmatpush3.bf16.msra.mxu1 %v3427_v13  ;;  %v3187_v27 = vpack.i.bf16 %v1424_v18, %v1423_v45  ;;  %v3197_v38 = vpack.i.bf16 %v1440_v46, %v1439_v21  ;;  %v4627_v36 = vld [vmem:[#allocation2 + $0x70] sm:$0xff]  ;;  %v1472_v62 = vld [vmem:[#allocation2 + $0x81] sm:$0xff]  ;;  %v3212_v42 = vpack.i.bf16 %v1423_v45, %v1517_v63 }
 0x205   :  { %3123 = vrot.lane.b32.xlu0 %v3122_v50, %s3436_s21  ;;  %v3217_v39 = vpack.i.bf16 %v1472_v62, %v1424_v18  ;;  %v1488_v41 = vld [vmem:[#allocation2 + $0x82] sm:$0xff]  ;;  %v3222_v0 = vpack.i.bf16 %v1439_v21, %v1533_v55  ;;  %v1505_v37 = vld [vmem:[#allocation2 + $0x90] sm:$0xff] }
 0x206   :  { %v3227_v33 = vpack.i.bf16 %v1488_v41, %v1440_v46  ;;  %v3237_v10 = vpack.i.bf16 %v1505_v37, %v1456_v59  ;;  %v1521_v22 = vld [vmem:[#allocation2 + $0x91] sm:$0xff]  ;;  %v1425_v52 = vld [vmem:[#allocation2 + $0xa1] sm:$0xff] }
 0x207   :  { %v3247_v2 = vpack.i.bf16 %v1521_v22, %v1472_v62  ;;  %v1426_v31 = vld [vmem:[#allocation2 + $0xb1] sm:$0xff]  ;;  %v1427_v50 = vld [vmem:[#allocation2 + $0xc1] sm:$0xff] }
 0x208   :  { %3138 = vrot.lane.b32.xlu1 %v3137_v5, %s3437_s30  ;;  %v3257_v48 = vpack.i.bf16 %v1426_v31, %v1425_v52  ;;  %v1428_v11 = vld [vmem:[#allocation2 + $0xd1] sm:$0xff]  ;;  %v1441_v54 = vld [vmem:[#allocation2 + $0xa2] sm:$0xff] }
 0x209   :  { %3133 = vrot.lane.b32.xlu0 %v3132_v40, %s3437_s30  ;;  %v1537_v5 = vld [vmem:[#allocation2 + $0x92] sm:$0xff]  ;;  %v3267_v40 = vpack.i.bf16 %v1428_v11, %v1427_v50  ;;  %v1476_v18 = vld [vmem:[#allocation2 + $0xe1] sm:$0xff] }
 0x20a   :  { %v3262_v12 = vpack.i.bf16 %v1537_v5, %v1488_v41  ;;  %v1442_v56 = vld [vmem:[#allocation2 + $0xb2] sm:$0xff]  ;;  %v3297_v55 = vpack.i.bf16 %v1476_v18, %v1428_v11  ;;  %v1447_v37 = vld [vmem:[#allocation2 + $0x102] sm:$0xff] }
 0x20b   :  { %v3272_v44 = vpack.i.bf16 %v1442_v56, %v1441_v54  ;;  %v4656_v63 = vld [vmem:[#allocation2 + $0xb0] sm:$0xff]  ;;  %v4688_v52 = vld [vmem:[#allocation2 + $0x100] sm:$0xff] }
 0x20c   :  { %3148 = vrot.lane.b32.xlu1 %v3147_v20, %s3438_s24  ;;  %v1443_v20 = vld [vmem:[#allocation2 + $0xc2] sm:$0xff]  ;;  %v1541_v41 = vld [vmem:[#allocation2 + $0xf2] sm:$0xff] }
 0x20d   :  { %3143 = vrot.lane.b32.xlu0 %v3142_v14, %s3438_s24  ;;  %v1444_v14 = vld [vmem:[#allocation2 + $0xd2] sm:$0xff]  ;;  %v3302_v46 = vpack.i.bf16 %v1443_v20, %v1442_v56  ;;  %v3382_v54 = vpack.i.bf16 %v1447_v37, %v1541_v41 }
 0x20e   :  { %v3277_v23 = vpack.i.bf16 %v1444_v14, %v1443_v20  ;;  %v4686_v22 = vld [vmem:[#allocation2 + $0x110] sm:$0xff] }
 0x20f   :  { %v1513_v20 = vld [vmem:[#allocation2 + $0x130] sm:$0xff] }
 0x210   :  { %3158 = vrot.lane.b32.xlu1 %v3157_v8, %s3439_s27  ;;  %v4652_v8 = vld [vmem:[#allocation2 + $0xd0] sm:$0xff] }
 0x211   :  { %3153 = vrot.lane.b32.xlu0 %v3152_v32, %s3439_s27  ;;  %v4654_v32 = vld [vmem:[#allocation2 + $0xe0] sm:$0xff] }
 0x212   :  { %v3287_v13 = vpack.i.bf16 %v4654_v32, %v4652_v8 }
 0x214   :  { %3168 = vrot.lane.b32.xlu1 %v3167_v9, %s3440_s13 }
 0x215   :  { %3163 = vrot.lane.b32.xlu0 %v4485_v60, %s3440_s13  ;;  %v3207_v60 = vpack.i.bf16 %v1456_v59, %v4627_v36 }
 0x218   :  { %3178 = vrot.lane.b32.xlu1 %v3167_v9, %s3434_s19  ;;  %v4658_v9 = vld [vmem:[#allocation2 + $0xc0] sm:$0xff] }
 0x219   :  { %3173 = vrot.lane.b32.xlu0 %v3117_v53, %s3441_s23  ;;  %v3232_v53 = vpack.i.bf16 %v4627_v36, %v4629_v47  ;;  %v3282_v45 = vpack.i.bf16 %v4658_v9, %v4656_v63 }
 0x21c   :  { %3188 = vrot.lane.b32.xlu1 %v3187_v27, %s3434_s19 }
 0x21d   :  { %3183 = vrot.lane.b32.xlu0 %v3182_v19, %s3441_s23 }
 0x220   :  { %3198 = vrot.lane.b32.xlu1 %v3197_v38, %s3435_s20 }
 0x221   :  { %3193 = vrot.lane.b32.xlu0 %v3182_v19, %s3435_s20  ;;  %v1492_v19 = vld [vmem:[#allocation2 + $0xe2] sm:$0xff] }
 0x222   :  { %v3307_v21 = vpack.i.bf16 %v1492_v19, %v1444_v14 }
 0x224   :  { %3208 = vrot.lane.b32.xlu1 %v3207_v60, %s3436_s21  ;;  %v3312_v60 = vpack.i.bf16 %v4652_v8, %v4658_v9 }
 0x225   :  { %3203 = vrot.lane.b32.xlu0 %v3202_v61, %s3436_s21  ;;  %v1525_v61 = vld [vmem:[#allocation2 + $0xf1] sm:$0xff] }
 0x226   :  { %v3327_v62 = vpack.i.bf16 %v1525_v61, %v1476_v18 }
 0x228   :  { %3218 = vrot.lane.b32.xlu1 %v3217_v39, %s3437_s30  ;;  %v1431_v39 = vld [vmem:[#allocation2 + $0x101] sm:$0xff] }
 0x229   :  { %3213 = vrot.lane.b32.xlu0 %v3212_v42, %s3437_s30  ;;  %v1432_v42 = vld [vmem:[#allocation2 + $0x111] sm:$0xff]  ;;  %v3372_v5 = vpack.i.bf16 %v1431_v39, %v1525_v61 }
 0x22c   :  { %3228 = vrot.lane.b32.xlu1 %v3227_v33, %s3438_s24  ;;  %v3347_v33 = vpack.i.bf16 %v1432_v42, %v1431_v39 }
 0x22d   :  { %3223 = vrot.lane.b32.xlu0 %v3222_v0, %s3438_s24  ;;  %v3342_v0 = vpack.i.bf16 %v1541_v41, %v1492_v19 }
 0x230   :  { %3238 = vrot.lane.b32.xlu1 %v3237_v10, %s3439_s27  ;;  %v1448_v10 = vld [vmem:[#allocation2 + $0x112] sm:$0xff] }
 0x231   :  { %3233 = vrot.lane.b32.xlu0 %v3232_v53, %s3439_s27  ;;  %v3357_v53 = vpack.i.bf16 %v1448_v10, %v1447_v37 }
 0x234   :  { %3248 = vrot.lane.b32.xlu1 %v3247_v2, %s3440_s13  ;;  %v1464_v2 = vld [vmem:[#allocation2 + $0x120] sm:$0xff] }
 0x235   :  { %3243 = vrot.lane.b32.xlu0 %v3187_v27, %s3440_s13  ;;  %v3292_v27 = vpack.i.bf16 %v1427_v50, %v1426_v31  ;;  %v3367_v31 = vpack.i.bf16 %v1464_v2, %v4686_v22  ;;  %v1480_v50 = vld [vmem:[#allocation2 + $0x121] sm:$0xff] }
 0x236   :  { %v3377_v11 = vpack.i.bf16 %v1480_v50, %v1432_v42 }
 0x238   :  { %3258 = vrot.lane.b32.xlu1 %v3257_v48, %s3434_s19 }
 0x239   :  { %3253 = vrot.lane.b32.xlu0 %v3197_v38, %s3441_s23  ;;  %v4670_v38 = vld [vmem:[#allocation2 + $0xf0] sm:$0xff] }
 0x23a   :  { %v3317_v59 = vpack.i.bf16 %v4670_v38, %v4654_v32  ;;  %v3362_v48 = vpack.i.bf16 %v4688_v52, %v4670_v38 }
 0x23c   :  { %3268 = vrot.lane.b32.xlu1 %v3267_v40, %s3434_s19 }
 0x23d   :  { %3263 = vrot.lane.b32.xlu0 %v3262_v12, %s3441_s23 }
 0x240   :  { %3278 = vrot.lane.b32.xlu1 %v3277_v23, %s3435_s20 }
 0x241   :  { %3273 = vrot.lane.b32.xlu0 %v3272_v44, %s3435_s20  ;;  %v3392_v44 = vpack.i.bf16 %v4686_v22, %v4688_v52 }
 0x244   :  { %3288 = vrot.lane.b32.xlu1 %v3287_v13, %s3436_s21  ;;  %v1529_v13 = vld [vmem:[#allocation2 + $0x131] sm:$0xff] }
 0x245   :  { %3283 = vrot.lane.b32.xlu0 %v3282_v45, %s3436_s21 }
 0x248   :  { %3298 = vrot.lane.b32.xlu1 %v3297_v55, %s3437_s30  ;;  %v3407_v55 = vpack.i.bf16 %v1529_v13, %v1480_v50 }
 0x249   :  { %3293 = vrot.lane.b32.xlu0 %v3292_v27, %s3437_s30  ;;  %v1545_v27 = vld [vmem:[#allocation2 + $0x132] sm:$0xff] }
 0x24c   :  { %3308 = vrot.lane.b32.xlu1 %v3307_v21, %s3438_s24 }
 0x24d   :  { %3303 = vrot.lane.b32.xlu0 %v3302_v46, %s3438_s24 }
 0x250   :  { %3318 = vrot.lane.b32.xlu1 %v3317_v59, %s3439_s27  ;;  %v2689_v59 = vld [vmem:[%s5159_s10] ss:$0 sm:$0xff]  ;;  %s3443_s10 = smov 124  }
 0x251   :  { %3313 = vrot.lane.b32.xlu0 %v3312_v60, %s3439_s27  ;;  %v2690_v60 = vld [vmem:[%s5160_s11] ss:$0 sm:$0xff] }
 0x254   :  { %3328 = vrot.lane.b32.xlu1 %v3327_v62, %s3440_s13 }
 0x255   :  { %3323 = vrot.lane.b32.xlu0 %v3267_v40, %s3440_s13  ;;  %v1496_v40 = vld [vmem:[#allocation2 + $0x122] sm:$0xff] }
 0x256   :  { %v3387_v12 = vpack.i.bf16 %v1496_v40, %v1448_v10  ;;  %v3417_v46 = vpack.i.bf16 %v1545_v27, %v1496_v40 }
 0x258   :  { %3338 = vrot.lane.b32.xlu1 %v3327_v62, %s3434_s19 }
 0x259   :  { %3333 = vrot.lane.b32.xlu0 %v3277_v23, %s3441_s23  ;;  %v3397_v23 = vpack.i.bf16 %v1513_v20, %v1464_v2  ;;  %v1401_v2 = vld [vmem:[#allocation2] sm:$0xff] }
 0x25c   :  { %3348 = vrot.lane.b32.xlu1 %v3347_v33, %s3434_s19 }
 0x25d   :  { %3343 = vrot.lane.b32.xlu0 %v3342_v0, %s3441_s23 }
 0x260   :  { %3358 = vrot.lane.b32.xlu1 %v3357_v53, %s3435_s20 }
 0x261   :  { %3353 = vrot.lane.b32.xlu0 %v3342_v0, %s3435_s20 }
 0x264   :  { %3368 = vrot.lane.b32.xlu1 %v3367_v31, %s3436_s21 }
 0x265   :  { %3363 = vrot.lane.b32.xlu0 %v3362_v48, %s3436_s21 }
 0x268   :  { %3378 = vrot.lane.b32.xlu1 %v3377_v11, %s3437_s30 }
 0x269   :  { %3373 = vrot.lane.b32.xlu0 %v3372_v5, %s3437_s30 }
 0x26c   :  { %3388 = vrot.lane.b32.xlu1 %v3387_v12, %s3438_s24 }
 0x26d   :  { %3383 = vrot.lane.b32.xlu0 %v3382_v54, %s3438_s24 }
 0x26e   :  { %v3109_v14 = vpop.permute.xlu1 %3108 }
 0x26f   :  { %v3104_v56 = vpop.permute.xlu0 %3103  ;;  %v3111_v41 = vunpack.i.h.bf16 %v3109_v14 }
 0x270   :  { %3398 = vrot.lane.b32.xlu1 %v3397_v23, %s3439_s27  ;;  %v3106_v0 = vunpack.i.h.bf16 %v3104_v56  ;;  %v3105_v37 = vunpack.i.l.bf16 %v3104_v56 }
 0x271   :  { %3393 = vrot.lane.b32.xlu0 %v3392_v44, %s3439_s27  ;;  %v2061_v12 = vsel %vm700_vm1, %v4519_v30, %v3111_v41 }
 0x272   :  { %v3119_v45 = vpop.permute.xlu1 %3118  ;;  %v2059_v56 = vsel %vm700_vm1, %v4526_v24, %v3106_v0 }
 0x273   :  { %v3114_v18 = vpop.permute.xlu0 %3113  ;;  %v3121_v10 = vunpack.i.h.bf16 %v3119_v45 }
 0x274   :  { %3408 = vrot.lane.b32.xlu1 %v3407_v55, %s3440_s13  ;;  %v3116_v31 = vunpack.i.h.bf16 %v3114_v18  ;;  %v3115_v48 = vunpack.i.l.bf16 %v3114_v18 }
 0x275   :  { %3403 = vrot.lane.b32.xlu0 %v3347_v33, %s3440_s13  ;;  %v3110_v33 = vunpack.i.l.bf16 %v3109_v14  ;;  %v2058_v14 = vsel %vm700_vm1, %v1401_v2, %v3105_v37  ;;  %v2077_v13 = vsel %vm717_vm2, %v2061_v12, %v3121_v10 }
 0x276   :  { %v3129_v19 = vpop.permute.xlu1 %3128  ;;  %v2075_v18 = vsel %vm717_vm2, %v2059_v56, %v3116_v31 }
 0x277   :  { %v3124_v21 = vpop.permute.xlu0 %3123  ;;  %v3131_v50 = vunpack.i.h.bf16 %v3129_v19  ;;  %v3130_v11 = vunpack.i.l.bf16 %v3129_v19  ;;  %v2060_v54 = vsel %vm700_vm1, %v4528_v1, %v3110_v33 }
 0x278   :  { %3418 = vrot.lane.b32.xlu1 %v3417_v46, %s3441_s23  ;;  %v3126_v20 = vunpack.i.h.bf16 %v3124_v21  ;;  %v3125_v23 = vunpack.i.l.bf16 %v3124_v21 }
 0x279   :  { %3413 = vrot.lane.b32.xlu0 %v3357_v53, %s3441_s23  ;;  %v3120_v53 = vunpack.i.l.bf16 %v3119_v45  ;;  %v2074_v45 = vsel %vm717_vm2, %v2058_v14, %v3115_v48  ;;  %v2093_v1 = vsel %vm734_vm3, %v2077_v13, %v3131_v50 }
 0x27a   :  { %v4715_v61 = vpop.permute.xlu1 %3138  ;;  %v2090_v24 = vsel %vm734_vm3, %v2074_v45, %v3125_v23 }
 0x27b   :  { %v3134_v62 = vpop.permute.xlu0 %3133  ;;  %v2076_v44 = vsel %vm717_vm2, %v2060_v54, %v3120_v53  ;;  %v3141_v0 = vunpack.i.h.bf16 %v4715_v61  ;;  %v3140_v37 = vunpack.i.l.bf16 %v4715_v61 }
 0x27c   :  { %1324 = vrot.lane.b32.xlu1 %v2690_v60, %s3434_s19  ;;  %v3136_v55 = vunpack.i.h.bf16 %v3134_v62  ;;  %v3135_v30 = vunpack.i.l.bf16 %v3134_v62  ;;  %v2092_v27 = vsel %vm734_vm3, %v2076_v44, %v3130_v11  ;;  %v2091_v60 = vsel %vm734_vm3, %v2075_v18, %v3126_v20 }
 0x27d   :  { %1299 = vrot.lane.b32.xlu0 %v2689_v59, %s3434_s19  ;;  %v2108_v45 = vsel %vm751_vm4, %v2092_v27, %v3140_v37  ;;  %v2109_v18 = vsel %vm751_vm4, %v2093_v1, %v3141_v0 }
 0x27e   :  { %v4719_v39 = vpop.permute.xlu1 %3148  ;;  %v2106_v53 = vsel %vm751_vm4, %v2090_v24, %v3135_v30  ;;  %v2107_v2 = vsel %vm751_vm4, %v2091_v60, %v3136_v55 }
 0x27f   :  { %v3144_v42 = vpop.permute.xlu0 %3143  ;;  %v3150_v31 = vunpack.i.l.bf16 %v4719_v39 }
 0x280   :  { %v3146_v19 = vunpack.i.h.bf16 %v3144_v42  ;;  %v3145_v21 = vunpack.i.l.bf16 %v3144_v42  ;;  %v3151_v42 = vunpack.i.h.bf16 %v4719_v39 }
 0x281   :  { %v2124_v30 = vsel %vm768_vm5, %v2108_v45, %v3150_v31 }
 0x282   :  { %v3159_v5 = vpop.permute.xlu1 %3158  ;;  %v2122_v48 = vsel %vm768_vm5, %v2106_v53, %v3145_v21  ;;  %v2123_v50 = vsel %vm768_vm5, %v2107_v2, %v3146_v19  ;;  %v2125_v19 = vsel %vm768_vm5, %v2109_v18, %v3151_v42 }
 0x283   :  { %v3154_v40 = vpop.permute.xlu0 %3153  ;;  %v3161_v11 = vunpack.i.h.bf16 %v3159_v5 }
 0x284   :  { %v3156_v41 = vunpack.i.h.bf16 %v3154_v40  ;;  %v3155_v33 = vunpack.i.l.bf16 %v3154_v40  ;;  %v3160_v40 = vunpack.i.l.bf16 %v3159_v5 }
 0x285   :  { %v2141_v60 = vsel %vm785_vm6, %v2125_v19, %v3161_v11 }
 0x286   :  { %v3169_v46 = vpop.permute.xlu1 %3168  ;;  %v2138_v61 = vsel %vm785_vm6, %v2122_v48, %v3155_v33  ;;  %v2139_v20 = vsel %vm785_vm6, %v2123_v50, %v3156_v41 }
 0x287   :  { %v3164_v59 = vpop.permute.xlu0 %3163  ;;  %v3171_v56 = vunpack.i.h.bf16 %v3169_v46  ;;  %v3170_v44 = vunpack.i.l.bf16 %v3169_v46  ;;  %v2140_v46 = vsel %vm785_vm6, %v2124_v30, %v3160_v40 }
 0x288   :  { %v3166_v10 = vunpack.i.h.bf16 %v3164_v59  ;;  %v3165_v62 = vunpack.i.l.bf16 %v3164_v59 }
 0x289   :  { %v2156_v27 = vsel %vm802_vm7, %v2140_v46, %v3170_v44  ;;  %v2157_v1 = vsel %vm802_vm7, %v2141_v60, %v3171_v56 }
 0x28a   :  { %v3179_v12 = vpop.permute.xlu1 %3178  ;;  %v2154_v13 = vsel %vm802_vm7, %v2138_v61, %v3165_v62  ;;  %v2155_v39 = vsel %vm802_vm7, %v2139_v20, %v3166_v10 }
 0x28b   :  { %v3174_v54 = vpop.permute.xlu0 %3173  ;;  %v3181_v61 = vunpack.i.h.bf16 %v3179_v12  ;;  %v3180_v20 = vunpack.i.l.bf16 %v3179_v12 }
 0x28c   :  { %v3176_v23 = vunpack.i.h.bf16 %v3174_v54  ;;  %v3175_v14 = vunpack.i.l.bf16 %v3174_v54 }
 0x28d   :  { %v2062_v12 = vsel %vm700_vm1, %v4524_v43, %v3180_v20 }
 0x28e   :  { %v2170_v5 = vsel %vm819_vm8, %v2154_v13, %v3175_v14  ;;  %v2171_v55 = vsel %vm819_vm8, %v2155_v39, %v3176_v23  ;;  %v3189_v21 = vpop.permute.xlu1 %3188 }
 0x28f   :  { %v3184_v59 = vpop.permute.xlu0 %3183  ;;  %v2186_v24 = vpack.c.bf16 %v2171_v55, %v2170_v5  ;;  %v3191_v40 = vunpack.i.h.bf16 %v3189_v21  ;;  %v3190_v54 = vunpack.i.l.bf16 %v3189_v21  ;;  %v2063_v21 = vsel %vm700_vm1, %v4578_v6, %v3181_v61 }
 0x290   :  { %v3186_v41 = vunpack.i.h.bf16 %v3184_v59  ;;  %v3185_v33 = vunpack.i.l.bf16 %v3184_v59 }
 0x291   :  { %2754 = vmatprep.mubr.msk.bf16.mxu1 %vm864_vm9, %v2186_v24  ;;  %v2065_v5 = vsel %vm700_vm1, %v4627_v36, %v3191_v40  ;;  %v2064_v55 = vsel %vm700_vm1, %v4629_v47, %v3190_v54 }
 0x292   :  { %v2173_v0 = vsel %vm819_vm8, %v2157_v1, %v3186_v41  ;;  %v2172_v37 = vsel %vm819_vm8, %v2156_v27, %v3185_v33  ;;  %v3199_v62 = vpop.permute.xlu1 %3198 }
 0x293   :  { %v2187_v10 = vpack.c.bf16 %v2173_v0, %v2172_v37  ;;  %v3194_v53 = vpop.permute.xlu0 %3193  ;;  %v3201_v23 = vunpack.i.h.bf16 %v3199_v62  ;;  %v3200_v14 = vunpack.i.l.bf16 %v3199_v62 }
 0x294   :  { %v3196_v56 = vunpack.i.h.bf16 %v3194_v53  ;;  %v3195_v44 = vunpack.i.l.bf16 %v3194_v53 }
 0x295   :  { %2755 = vmatmul.mubr.msk.bf16.vlgmr.msra.gmra.mxu1 %vm864_vm9, %v2187_v10  ;;  %v2080_v59 = vsel %vm717_vm2, %v2064_v55, %v3200_v14  ;;  %v2081_v24 = vsel %vm717_vm2, %v2065_v5, %v3201_v23 }
 0x296   :  { %v3209_v2 = vpop.permute.xlu1 %3208  ;;  %v2079_v46 = vsel %vm717_vm2, %v2063_v21, %v3196_v56  ;;  %v2078_v60 = vsel %vm717_vm2, %v2062_v12, %v3195_v44 }
 0x297   :  { %v3204_v42 = vpop.permute.xlu0 %3203  ;;  %v3211_v13 = vunpack.i.h.bf16 %v3209_v2  ;;  %v3210_v39 = vunpack.i.l.bf16 %v3209_v2 }
 0x298   :  { %v3206_v30 = vunpack.i.h.bf16 %v3204_v42  ;;  %v3205_v19 = vunpack.i.l.bf16 %v3204_v42 }
 0x299   :  { %v2096_v47 = vsel %vm734_vm3, %v2080_v59, %v3210_v39  ;;  %v2097_v33 = vsel %vm734_vm3, %v2081_v24, %v3211_v13 }
 0x29a   :  { %v4762_v31 = vpop.permute.xlu1 %3218  ;;  %v2094_v43 = vsel %vm734_vm3, %v2078_v60, %v3205_v19  ;;  %v2095_v37 = vsel %vm734_vm3, %v2079_v46, %v3206_v30 }
 0x29b   :  { %v3214_v48 = vpop.permute.xlu0 %3213  ;;  %v3221_v53 = vunpack.i.h.bf16 %v4762_v31  ;;  %v3220_v2 = vunpack.i.l.bf16 %v4762_v31 }
 0x29c   :  { %v3216_v36 = vunpack.i.h.bf16 %v3214_v48  ;;  %v3215_v41 = vunpack.i.l.bf16 %v3214_v48 }
 0x29d   :  { %v2112_v21 = vsel %vm751_vm4, %v2096_v47, %v3220_v2  ;;  %v2113_v12 = vsel %vm751_vm4, %v2097_v33, %v3221_v53 }
 0x29e   :  { %v4764_v50 = vpop.permute.xlu1 %3228  ;;  %v2110_v40 = vsel %vm751_vm4, %v2094_v43, %v3215_v41  ;;  %v2111_v54 = vsel %vm751_vm4, %v2095_v37, %v3216_v36 }
 0x29f   :  { %v3224_v11 = vpop.permute.xlu0 %3223  ;;  %v3230_v61 = vunpack.i.l.bf16 %v4764_v50 }
 0x2a0   :  { %v3226_v27 = vunpack.i.h.bf16 %v3224_v11  ;;  %v3225_v1 = vunpack.i.l.bf16 %v3224_v11  ;;  %v3231_v11 = vunpack.i.h.bf16 %v4764_v50 }
 0x2a1   :  { %v2128_v24 = vsel %vm768_vm5, %v2112_v21, %v3230_v61 }
 0x2a2   :  { %v3239_v45 = vpop.permute.xlu1 %3238  ;;  %v2126_v20 = vsel %vm768_vm5, %v2110_v40, %v3225_v1  ;;  %v2127_v23 = vsel %vm768_vm5, %v2111_v54, %v3226_v27  ;;  %v2129_v46 = vsel %vm768_vm5, %v2113_v12, %v3231_v11 }
 0x2a3   :  { %v3234_v18 = vpop.permute.xlu0 %3233  ;;  %v3241_v14 = vunpack.i.h.bf16 %v3239_v45  ;;  %v3240_v56 = vunpack.i.l.bf16 %v3239_v45 }
 0x2a4   :  { %v3236_v10 = vunpack.i.h.bf16 %v3234_v18  ;;  %v3235_v62 = vunpack.i.l.bf16 %v3234_v18 }
 0x2a5   :  { %v2144_v27 = vsel %vm785_vm6, %v2128_v24, %v3240_v56  ;;  %v2145_v1 = vsel %vm785_vm6, %v2129_v46, %v3241_v14 }
 0x2a6   :  { %v3249_v6 = vpop.permute.xlu1 %3248  ;;  %v2142_v31 = vsel %vm785_vm6, %v2126_v20, %v3235_v62  ;;  %v2143_v39 = vsel %vm785_vm6, %v2127_v23, %v3236_v10 }
 0x2a7   :  { %v3244_v0 = vpop.permute.xlu0 %3243  ;;  %v3251_v55 = vunpack.i.h.bf16 %v3249_v6  ;;  %v3250_v30 = vunpack.i.l.bf16 %v3249_v6 }
 0x2a8   :  { %v3246_v42 = vunpack.i.h.bf16 %v3244_v0  ;;  %v3245_v48 = vunpack.i.l.bf16 %v3244_v0 }
 0x2a9   :  { %v2160_v47 = vsel %vm802_vm7, %v2144_v27, %v3250_v30  ;;  %v2161_v33 = vsel %vm802_vm7, %v2145_v1, %v3251_v55 }
 0x2aa   :  { %v3259_v44 = vpop.permute.xlu1 %3258  ;;  %v2158_v19 = vsel %vm802_vm7, %v2142_v31, %v3245_v48  ;;  %v2159_v50 = vsel %vm802_vm7, %v2143_v39, %v3246_v42  ;;  %v1409_v31 = vld [vmem:[#allocation2 + $0xa0] sm:$0xff] }
 0x2ab   :  { %v3254_v13 = vpop.permute.xlu0 %3253  ;;  %v3261_v23 = vunpack.i.h.bf16 %v3259_v44  ;;  %v3260_v14 = vunpack.i.l.bf16 %v3259_v44 }
 0x2ac   :  { %v3256_v18 = vunpack.i.h.bf16 %v3254_v13  ;;  %v3255_v5 = vunpack.i.l.bf16 %v3254_v13 }
 0x2ad   :  { %v2067_v44 = vsel %vm700_vm1, %v4656_v63, %v3261_v23 }
 0x2ae   :  { %v2174_v45 = vsel %vm819_vm8, %v2158_v19, %v3255_v5  ;;  %v2175_v59 = vsel %vm819_vm8, %v2159_v50, %v3256_v18  ;;  %v3269_v36 = vpop.permute.xlu1 %3268 }
 0x2af   :  { %v2188_v60 = vpack.c.bf16 %v2175_v59, %v2174_v45  ;;  %v3264_v41 = vpop.permute.xlu0 %3263  ;;  %v3271_v61 = vunpack.i.h.bf16 %v3269_v36  ;;  %v3270_v20 = vunpack.i.l.bf16 %v3269_v36  ;;  %v2066_v59 = vsel %vm700_vm1, %v1409_v31, %v3260_v14 }
 0x2b0   :  { %v3266_v6 = vunpack.i.h.bf16 %v3264_v41  ;;  %v3265_v0 = vunpack.i.l.bf16 %v3264_v41 }
 0x2b1   :  { %2758 = vmatprep.mubr.msk.bf16.mxu1 %vm864_vm9, %v2188_v60  ;;  %v2069_v50 = vsel %vm700_vm1, %v4652_v8, %v3271_v61  ;;  %v2068_v21 = vsel %vm700_vm1, %v4658_v9, %v3270_v20 }
 0x2b2   :  { %v2177_v43 = vsel %vm819_vm8, %v2161_v33, %v3266_v6  ;;  %v2176_v37 = vsel %vm819_vm8, %v2160_v47, %v3265_v0  ;;  %v3279_v62 = vpop.permute.xlu1 %3278 }
 0x2b3   :  { %v2189_v10 = vpack.c.bf16 %v2177_v43, %v2176_v37  ;;  %v3274_v53 = vpop.permute.xlu0 %3273  ;;  %v3281_v56 = vunpack.i.h.bf16 %v3279_v62  ;;  %v3280_v13 = vunpack.i.l.bf16 %v3279_v62 }
 0x2b4   :  { %v3276_v39 = vunpack.i.h.bf16 %v3274_v53  ;;  %v3275_v18 = vunpack.i.l.bf16 %v3274_v53 }
 0x2b5   :  { %2759 = vmatmul.mubr.msk.bf16.gmra.mxu1 %vm864_vm9, %v2189_v10  ;;  %v2084_v24 = vsel %vm717_vm2, %v2068_v21, %v3280_v13  ;;  %v2085_v46 = vsel %vm717_vm2, %v2069_v50, %v3281_v56 }
 0x2b6   :  { %v3289_v2 = vpop.permute.xlu1 %3288  ;;  %v2083_v60 = vsel %vm717_vm2, %v2067_v44, %v3276_v39  ;;  %v2082_v36 = vsel %vm717_vm2, %v2066_v59, %v3275_v18 }
 0x2b7   :  { %v3284_v42 = vpop.permute.xlu0 %3283  ;;  %v3291_v5 = vunpack.i.h.bf16 %v3289_v2  ;;  %v3290_v55 = vunpack.i.l.bf16 %v3289_v2 }
 0x2b8   :  { %v3286_v12 = vunpack.i.h.bf16 %v3284_v42  ;;  %v3285_v45 = vunpack.i.l.bf16 %v3284_v42 }
 0x2b9   :  { %v2100_v27 = vsel %vm734_vm3, %v2084_v24, %v3290_v55  ;;  %v2101_v9 = vsel %vm734_vm3, %v2085_v46, %v3291_v5 }
 0x2ba   :  { %v4808_v48 = vpop.permute.xlu1 %3298  ;;  %v2098_v47 = vsel %vm734_vm3, %v2082_v36, %v3285_v45  ;;  %v2099_v33 = vsel %vm734_vm3, %v2083_v60, %v3286_v12 }
 0x2bb   :  { %v3294_v40 = vpop.permute.xlu0 %3293  ;;  %v3301_v10 = vunpack.i.h.bf16 %v4808_v48  ;;  %v3300_v62 = vunpack.i.l.bf16 %v4808_v48 }
 0x2bc   :  { %v3296_v41 = vunpack.i.h.bf16 %v3294_v40  ;;  %v3295_v8 = vunpack.i.l.bf16 %v3294_v40 }
 0x2bd   :  { %v2116_v21 = vsel %vm751_vm4, %v2100_v27, %v3300_v62  ;;  %v2117_v12 = vsel %vm751_vm4, %v2101_v9, %v3301_v10 }
 0x2be   :  { %v4810_v54 = vpop.permute.xlu1 %3308  ;;  %v2114_v42 = vsel %vm751_vm4, %v2098_v47, %v3295_v8  ;;  %v2115_v40 = vsel %vm751_vm4, %v2099_v33, %v3296_v41 }
 0x2bf   :  { %v3304_v11 = vpop.permute.xlu0 %3303  ;;  %v3310_v61 = vunpack.i.l.bf16 %v4810_v54 }
 0x2c0   :  { %v3306_v1 = vunpack.i.h.bf16 %v3304_v11  ;;  %v3305_v6 = vunpack.i.l.bf16 %v3304_v11  ;;  %v3311_v11 = vunpack.i.h.bf16 %v4810_v54 }
 0x2c1   :  { %v2132_v44 = vsel %vm768_vm5, %v2116_v21, %v3310_v61 }
 0x2c2   :  { %v3319_v30 = vpop.permute.xlu1 %3318  ;;  %v2130_v20 = vsel %vm768_vm5, %v2114_v42, %v3305_v6  ;;  %v2131_v23 = vsel %vm768_vm5, %v2115_v40, %v3306_v1  ;;  %v2133_v59 = vsel %vm768_vm5, %v2117_v12, %v3311_v11 }
 0x2c3   :  { %v3314_v19 = vpop.permute.xlu0 %3313  ;;  %v3321_v14 = vunpack.i.h.bf16 %v3319_v30  ;;  %v3320_v56 = vunpack.i.l.bf16 %v3319_v30 }
 0x2c4   :  { %v3316_v43 = vunpack.i.h.bf16 %v3314_v19  ;;  %v3315_v37 = vunpack.i.l.bf16 %v3314_v19 }
 0x2c5   :  { %v2148_v36 = vsel %vm785_vm6, %v2132_v44, %v3320_v56  ;;  %v2149_v41 = vsel %vm785_vm6, %v2133_v59, %v3321_v14 }
 0x2c6   :  { %v3329_v0 = vpop.permute.xlu1 %3328  ;;  %v2146_v48 = vsel %vm785_vm6, %v2130_v20, %v3315_v37  ;;  %v2147_v39 = vsel %vm785_vm6, %v2131_v23, %v3316_v43 }
 0x2c7   :  { %v3324_v63 = vpop.permute.xlu0 %3323  ;;  %v3331_v55 = vunpack.i.h.bf16 %v3329_v0  ;;  %v3330_v19 = vunpack.i.l.bf16 %v3329_v0 }
 0x2c8   :  { %v3326_v53 = vunpack.i.h.bf16 %v3324_v63  ;;  %v3325_v2 = vunpack.i.l.bf16 %v3324_v63 }
 0x2c9   :  { %v2164_v27 = vsel %vm802_vm7, %v2148_v36, %v3330_v19  ;;  %v2165_v9 = vsel %vm802_vm7, %v2149_v41, %v3331_v55 }
 0x2ca   :  { %v3339_v13 = vpop.permute.xlu1 %3338  ;;  %v2162_v50 = vsel %vm802_vm7, %v2146_v48, %v3325_v2  ;;  %v2163_v54 = vsel %vm802_vm7, %v2147_v39, %v3326_v53 }
 0x2cb   :  { %v3334_v31 = vpop.permute.xlu0 %3333  ;;  %v3341_v53 = vunpack.i.h.bf16 %v3339_v13  ;;  %v3340_v2 = vunpack.i.l.bf16 %v3339_v13 }
 0x2cc   :  { %v3336_v18 = vunpack.i.h.bf16 %v3334_v31  ;;  %v3335_v5 = vunpack.i.l.bf16 %v3334_v31 }
 0x2cd   :  { %v2070_v55 = vsel %vm700_vm1, %v4654_v32, %v3340_v2 }
 0x2ce   :  { %v2178_v30 = vsel %vm819_vm8, %v2162_v50, %v3335_v5  ;;  %v2179_v45 = vsel %vm819_vm8, %v2163_v54, %v3336_v18  ;;  %v3349_v46 = vpop.permute.xlu1 %3348  ;;  %v2071_v5 = vsel %vm700_vm1, %v4670_v38, %v3341_v53 }
 0x2cf   :  { %v2190_v24 = vpack.c.bf16 %v2179_v45, %v2178_v30  ;;  %v3344_v60 = vpop.permute.xlu0 %3343  ;;  %v3351_v42 = vunpack.i.h.bf16 %v3349_v46  ;;  %v3350_v40 = vunpack.i.l.bf16 %v3349_v46 }
 0x2d0   :  { %v3346_v8 = vunpack.i.h.bf16 %v3344_v60  ;;  %v3345_v1 = vunpack.i.l.bf16 %v3344_v60 }
 0x2d1   :  { %2762 = vmatprep.mubr.msk.bf16.mxu1 %vm864_vm9, %v2190_v24  ;;  %v2073_v13 = vsel %vm700_vm1, %v4686_v22, %v3351_v42  ;;  %v2072_v19 = vsel %vm700_vm1, %v4688_v52, %v3350_v40 }
 0x2d2   :  { %v2181_v6 = vsel %vm819_vm8, %v2165_v9, %v3346_v8  ;;  %v2180_v0 = vsel %vm819_vm8, %v2164_v27, %v3345_v1  ;;  %v3359_v47 = vpop.permute.xlu1 %3358 }
 0x2d3   :  { %v2191_v63 = vpack.c.bf16 %v2181_v6, %v2180_v0  ;;  %v3354_v33 = vpop.permute.xlu0 %3353  ;;  %v3361_v11 = vunpack.i.h.bf16 %v3359_v47  ;;  %v3360_v61 = vunpack.i.l.bf16 %v3359_v47 }
 0x2d4   :  { %v3356_v20 = vunpack.i.h.bf16 %v3354_v33  ;;  %v3355_v23 = vunpack.i.l.bf16 %v3354_v33 }
 0x2d5   :  { %2763 = vmatmul.mubr.msk.bf16.gmra.mxu1 %vm864_vm9, %v2191_v63  ;;  %v2088_v50 = vsel %vm717_vm2, %v2072_v19, %v3360_v61  ;;  %v2089_v54 = vsel %vm717_vm2, %v2073_v13, %v3361_v11 }
 0x2d6   :  { %v3369_v43 = vpop.permute.xlu1 %3368  ;;  %v2087_v21 = vsel %vm717_vm2, %v2071_v5, %v3356_v20  ;;  %v2086_v12 = vsel %vm717_vm2, %v2070_v55, %v3355_v23 }
 0x2d7   :  { %v3364_v37 = vpop.permute.xlu0 %3363  ;;  %v3371_v31 = vunpack.i.h.bf16 %v3369_v43  ;;  %v3370_v48 = vunpack.i.l.bf16 %v3369_v43 }
 0x2d8   :  { %v3366_v39 = vunpack.i.h.bf16 %v3364_v37  ;;  %v3365_v18 = vunpack.i.l.bf16 %v3364_v37 }
 0x2d9   :  { %v2104_v24 = vsel %vm734_vm3, %v2088_v50, %v3370_v48  ;;  %v2105_v22 = vsel %vm734_vm3, %v2089_v54, %v3371_v31 }
 0x2da   :  { %v3379_v10 = vpop.permute.xlu1 %3378  ;;  %v2102_v52 = vsel %vm734_vm3, %v2086_v12, %v3365_v18  ;;  %v2103_v46 = vsel %vm734_vm3, %v2087_v21, %v3366_v39 }
 0x2db   :  { %v3374_v62 = vpop.permute.xlu0 %3373  ;;  %v3381_v38 = vunpack.i.h.bf16 %v3379_v10  ;;  %v3380_v44 = vunpack.i.l.bf16 %v3379_v10 }
 0x2dc   :  { %v3376_v59 = vunpack.i.h.bf16 %v3374_v62  ;;  %v3375_v32 = vunpack.i.l.bf16 %v3374_v62 }
 0x2dd   :  { %v2120_v47 = vsel %vm751_vm4, %v2104_v24, %v3380_v44  ;;  %v2121_v33 = vsel %vm751_vm4, %v2105_v22, %v3381_v38 }
 0x2de   :  { %v3389_v14 = vpop.permute.xlu1 %3388  ;;  %v2118_v43 = vsel %vm751_vm4, %v2102_v52, %v3375_v32  ;;  %v2119_v37 = vsel %vm751_vm4, %v2103_v46, %v3376_v59 }
 0x2df   :  { %v3384_v56 = vpop.permute.xlu0 %3383  ;;  %v3391_v60 = vunpack.i.h.bf16 %v3389_v14  ;;  %v3390_v36 = vunpack.i.l.bf16 %v3389_v14 }
 0x2e0   :  { %v3386_v41 = vunpack.i.h.bf16 %v3384_v56  ;;  %v3385_v8 = vunpack.i.l.bf16 %v3384_v56 }
 0x2e1   :  { %v2136_v42 = vsel %vm768_vm5, %v2120_v47, %v3390_v36  ;;  %v2137_v40 = vsel %vm768_vm5, %v2121_v33, %v3391_v60 }
 0x2e2   :  { %v3399_v30 = vpop.permute.xlu1 %3398  ;;  %v2134_v11 = vsel %vm768_vm5, %v2118_v43, %v3385_v8  ;;  %v2135_v61 = vsel %vm768_vm5, %v2119_v37, %v3386_v41 }
 0x2e3   :  { %v3394_v45 = vpop.permute.xlu0 %3393  ;;  %v3401_v1 = vunpack.i.h.bf16 %v3399_v30  ;;  %v3400_v27 = vunpack.i.l.bf16 %v3399_v30 }
 0x2e4   :  { %v3396_v9 = vunpack.i.h.bf16 %v3394_v45  ;;  %v3395_v6 = vunpack.i.l.bf16 %v3394_v45 }
 0x2e5   :  { %v2152_v20 = vsel %vm785_vm6, %v2136_v42, %v3400_v27  ;;  %v2153_v23 = vsel %vm785_vm6, %v2137_v40, %v3401_v1 }
 0x2e6   :  { %v3409_v0 = vpop.permute.xlu1 %3408  ;;  %v2150_v14 = vsel %vm785_vm6, %v2134_v11, %v3395_v6  ;;  %v2151_v56 = vsel %vm785_vm6, %v2135_v61, %v3396_v9 }
 0x2e7   :  { %v3404_v63 = vpop.permute.xlu0 %3403  ;;  %v3411_v10 = vunpack.i.h.bf16 %v3409_v0  ;;  %v3410_v62 = vunpack.i.l.bf16 %v3409_v0 }
 0x2e8   :  { %v3406_v53 = vunpack.i.h.bf16 %v3404_v63  ;;  %v3405_v2 = vunpack.i.l.bf16 %v3404_v63 }
 0x2e9   :  { %v2168_v13 = vsel %vm802_vm7, %v2152_v20, %v3410_v62  ;;  %v2169_v19 = vsel %vm802_vm7, %v2153_v23, %v3411_v10 }
 0x2ea   :  { %v3419_v31 = vpop.permute.xlu1 %3418  ;;  %v2166_v50 = vsel %vm802_vm7, %v2150_v14, %v3405_v2  ;;  %v2167_v54 = vsel %vm802_vm7, %v2151_v56, %v3406_v53 }
 0x2eb   :  { %v3414_v48 = vpop.permute.xlu0 %3413  ;;  %v3421_v39 = vunpack.i.h.bf16 %v3419_v31  ;;  %v3420_v18 = vunpack.i.l.bf16 %v3419_v31 }
 0x2ec   :  { %v3416_v5 = vunpack.i.h.bf16 %v3414_v48  ;;  %v3415_v55 = vunpack.i.l.bf16 %v3414_v48 }
 0x2ed   :  { %v2184_v21 = vsel %vm819_vm8, %v2168_v13, %v3420_v18  ;;  %v2185_v12 = vsel %vm819_vm8, %v2169_v19, %v3421_v39 }
 0x2ee   :  { %v2182_v30 = vsel %vm819_vm8, %v2166_v50, %v3415_v55  ;;  %v2183_v45 = vsel %vm819_vm8, %v2167_v54, %v3416_v5  ;;  %v2193_v38 = vpack.c.bf16 %v2185_v12, %v2184_v21  ;;  %v1325_v32 = vpop.permute.xlu1 %1324 }
 0x2ef   :  { %v2192_v44 = vpack.c.bf16 %v2183_v45, %v2182_v30  ;;  %v1300_v59 = vpop.permute.xlu0 %1299 }
 0x2f0   :  { %v1303_v24 = vmul.f32 %v1300_v59, %v4495_v26  ;;  %v1302_v22 = vmul.f32 %v1300_v59, %v4509_v29  ;;  %v1305_v60 = vmul.f32 %v1300_v59, %v4512_v35  ;;  %v1304_v36 = vmul.f32 %v1300_v59, %v4522_v28 }
 0x2f1   :  { %2766 = vmatprep.mubr.msk.bf16.mxu1 %vm864_vm9, %v2192_v44  ;;  %v1307_v26 = vmul.f32 %v1300_v59, %v4531_v58  ;;  %v1306_v29 = vmul.f32 %v1300_v59, %v4542_v25  ;;  %v1309_v35 = vmul.f32 %v1300_v59, %v4545_v57  ;;  %v1308_v28 = vmul.f32 %v1300_v59, %v4548_v3 }
 0x2f2   :  { %2767 = vmatmul.mubr.msk.bf16.gmra.mxu1 %vm864_vm9, %v2193_v38  ;;  %v1328_v52 = vadd.f32 %v1325_v32, %v1303_v24  ;;  %v1327_v46 = vadd.f32 %v1325_v32, %v1302_v22  ;;  %v1330_v41 = vadd.f32 %v1325_v32, %v1305_v60  ;;  %v1329_v8 = vadd.f32 %v1325_v32, %v1304_v36 }
 0x2f3   :  { %v1332_v1 = vadd.f32 %v1325_v32, %v1307_v26  ;;  %v1331_v27 = vadd.f32 %v1325_v32, %v1306_v29  ;;  %v1334_v9 = vadd.f32 %v1325_v32, %v1309_v35  ;;  %v1333_v6 = vadd.f32 %v1325_v32, %v1308_v28 }
 0x2f4   :  { %2530 = vrot.lane.b32.xlu1 %v1328_v52, %s3443_s10  ;;  %2528 = vrot.lane.b32.xlu0 %v1327_v46, %s3443_s10  ;;  %v1311_v58 = vmul.f32 %v1300_v59, %v4554_v49  ;;  %v1310_v25 = vmul.f32 %v1300_v59, %v4566_v4  ;;  %v1313_v57 = vmul.f32 %v1300_v59, %v4572_v34 }
 0x2f5   :  { %v1312_v3 = vmul.f32 %v1300_v59, %v4584_v7  ;;  %v1315_v49 = vmul.f32 %v1300_v59, %v4431_v51  ;;  %v1314_v4 = vmul.f32 %v1300_v59, %v4590_v15  ;;  %v1317_v34 = vmul.f32 %v1300_v59, %v4596_v17 }
 0x2f6   :  { %v1336_v0 = vadd.f32 %v1325_v32, %v1311_v58  ;;  %v1335_v63 = vadd.f32 %v1325_v32, %v1310_v25  ;;  %v1338_v47 = vadd.f32 %v1325_v32, %v1313_v57  ;;  %v1316_v7 = vmul.f32 %v1300_v59, %v4602_v16 }
 0x2f7   :  { %v1337_v33 = vadd.f32 %v1325_v32, %v1312_v3  ;;  %v1340_v43 = vadd.f32 %v1325_v32, %v1315_v49  ;;  %v1339_v37 = vadd.f32 %v1325_v32, %v1314_v4  ;;  %v1342_v10 = vadd.f32 %v1325_v32, %v1317_v34 }
 0x2f8   :  { %2534 = vrot.lane.b32.xlu1 %v1330_v41, %s3443_s10  ;;  %2532 = vrot.lane.b32.xlu0 %v1329_v8, %s3443_s10  ;;  %v1341_v62 = vadd.f32 %v1325_v32, %v1316_v7 }
 0x2fc   :  { %2538 = vrot.lane.b32.xlu1 %v1332_v1, %s3443_s10  ;;  %2536 = vrot.lane.b32.xlu0 %v1331_v27, %s3443_s10 }
 0x300   :  { %2542 = vrot.lane.b32.xlu1 %v1334_v9, %s3443_s10  ;;  %2540 = vrot.lane.b32.xlu0 %v1333_v6, %s3443_s10 }
 0x304   :  { %2546 = vrot.lane.b32.xlu1 %v1336_v0, %s3443_s10  ;;  %2544 = vrot.lane.b32.xlu0 %v1335_v63, %s3443_s10 }
 0x308   :  { %2550 = vrot.lane.b32.xlu1 %v1338_v47, %s3443_s10  ;;  %2548 = vrot.lane.b32.xlu0 %v1337_v33, %s3443_s10 }
 0x30c   :  { %2554 = vrot.lane.b32.xlu1 %v1340_v43, %s3443_s10  ;;  %2552 = vrot.lane.b32.xlu0 %v1339_v37, %s3443_s10 }
 0x310   :  { %2558 = vrot.lane.b32.xlu1 %v1342_v10, %s3443_s10  ;;  %2556 = vrot.lane.b32.xlu0 %v1341_v62, %s3443_s10 }
 0x355   :  { %v4923_v51 = vpop.f32.mrf.mxu1 }
 0x356   :  { %v2377_v56 = vmul.f32 %v4923_v51, %v4923_v51  ;;  %v2341_v18 = vsel %vm751_vm4, %v4923_v51, 0.0 }
 0x357   :  { %v4925_v15 = vpop.f32.mrf.mxu1 }
 0x358   :  { %v2375_v40 = vmul.f32 %v4925_v15, %v4925_v15  ;;  %v2338_v20 = vsel %vm751_vm4, %v4925_v15, 0.0  ;;  %v2394_v13 = vsel %vm751_vm4, %v2377_v56, 0.0 }
 0x359   :  { %v4927_v53 = vpop.f32.mrf.mxu1 }
 0x35a   :  { %v2391_v31 = vsel %vm751_vm4, %v2375_v40, 0.0  ;;  %v2378_v19 = vmul.f32 %v4927_v53, %v4927_v53  ;;  %v2343_v21 = vsel %vm751_vm4, %v4927_v53, 0.0 }
 0x35b   :  { %v4929_v2 = vpop.f32.mrf.mxu1 }
 0x35c   :  { %v2376_v42 = vmul.f32 %v4929_v2, %v4929_v2  ;;  %v2339_v11 = vsel %vm751_vm4, %v4929_v2, 0.0  ;;  %v2396_v44 = vsel %vm751_vm4, %v2378_v19, 0.0 }
 0x35d   :  { %v2340_v14 = vadd.f32 %v2339_v11, %v2338_v20 }
 0x35e   :  { %v2392_v23 = vsel %vm751_vm4, %v2376_v42, 0.0 }
 0x35f   :  { %v2393_v48 = vadd.f32 %v2392_v23, %v2391_v31  ;;  %v2342_v5 = vadd.f32 %v2341_v18, %v2340_v14 }
 0x361   :  { %v2395_v54 = vadd.f32 %v2394_v13, %v2393_v48  ;;  %v2344_v45 = vadd.f32 %v2343_v21, %v2342_v5 }
 0x363   :  { %v2397_v22 = vadd.f32 %v2396_v44, %v2395_v54 }
 0x375   :  { %v4931_v17 = vpop.f32.mrf.mxu1 }
 0x376   :  { %v2381_v41 = vmul.f32 %v4931_v17, %v4931_v17  ;;  %v2349_v26 = vsel %vm751_vm4, %v4931_v17, 0.0 }
 0x377   :  { %v4933_v16 = vpop.f32.mrf.mxu1 }
 0x378   :  { %v2379_v50 = vmul.f32 %v4933_v16, %v4933_v16  ;;  %v2345_v12 = vsel %vm751_vm4, %v4933_v16, 0.0  ;;  %v2402_v27 = vsel %vm751_vm4, %v2381_v41, 0.0 }
 0x379   :  { %v4941_v61 = vpop.f32.mrf.mxu1  ;;  %v2346_v24 = vadd.f32 %v2345_v12, %v2344_v45 }
 0x37a   :  { %v2398_v59 = vsel %vm751_vm4, %v2379_v50, 0.0  ;;  %v2382_v35 = vmul.f32 %v4941_v61, %v4941_v61  ;;  %v2351_v6 = vsel %vm751_vm4, %v4941_v61, 0.0 }
 0x37b   :  { %v4949_v39 = vpop.f32.mrf.mxu1  ;;  %v2399_v46 = vadd.f32 %v2398_v59, %v2397_v22 }
 0x37c   :  { %v2380_v30 = vmul.f32 %v4949_v39, %v4949_v39  ;;  %v2347_v32 = vsel %vm751_vm4, %v4949_v39, 0.0  ;;  %v2404_v63 = vsel %vm751_vm4, %v2382_v35, 0.0 }
 0x37d   :  { %v2348_v60 = vadd.f32 %v2347_v32, %v2346_v24 }
 0x37e   :  { %v2400_v52 = vsel %vm751_vm4, %v2380_v30, 0.0 }
 0x37f   :  { %v2401_v8 = vadd.f32 %v2400_v52, %v2399_v46  ;;  %v2350_v29 = vadd.f32 %v2349_v26, %v2348_v60 }
 0x381   :  { %v2403_v9 = vadd.f32 %v2402_v27, %v2401_v8  ;;  %v2352_v0 = vadd.f32 %v2351_v6, %v2350_v29  ;;  %v5035_v6 = vpop.permute.xlu1 %2530 }
 0x383   :  { %v2405_v33 = vadd.f32 %v2404_v63, %v2403_v9 }
 0x395   :  { %v4953_v55 = vpop.f32.mrf.mxu1 }
 0x396   :  { %v2385_v37 = vmul.f32 %v4953_v55, %v4953_v55  ;;  %v2357_v7 = vsel %vm751_vm4, %v4953_v55, 0.0 }
 0x397   :  { %v4966_v38 = vpop.f32.mrf.mxu1 }
 0x398   :  { %v2383_v28 = vmul.f32 %v4966_v38, %v4966_v38  ;;  %v2353_v58 = vsel %vm751_vm4, %v4966_v38, 0.0  ;;  %v2410_v42 = vsel %vm751_vm4, %v2385_v37, 0.0 }
 0x399   :  { %v4973_v36 = vpop.f32.mrf.mxu1  ;;  %v2354_v47 = vadd.f32 %v2353_v58, %v2352_v0  ;;  %v5037_v58 = vpop.permute.xlu0 %2528 }
 0x39a   :  { %v2406_v57 = vsel %vm751_vm4, %v2383_v28, 0.0  ;;  %v2386_v40 = vmul.f32 %v4973_v36, %v4973_v36  ;;  %v2359_v23 = vsel %vm751_vm4, %v4973_v36, 0.0 }
 0x39b   :  { %v4979_v1 = vpop.f32.mrf.mxu1  ;;  %v2407_v4 = vadd.f32 %v2406_v57, %v2405_v33  ;;  %v5039_v33 = vpop.permute.xlu1 %2534 }
 0x39c   :  { %v2384_v25 = vmul.f32 %v4979_v1, %v4979_v1  ;;  %v2355_v3 = vsel %vm751_vm4, %v4979_v1, 0.0  ;;  %v2412_v18 = vsel %vm751_vm4, %v2386_v40, 0.0 }
 0x39d   :  { %v2356_v43 = vadd.f32 %v2355_v3, %v2354_v47 }
 0x39e   :  { %v2408_v49 = vsel %vm751_vm4, %v2384_v25, 0.0 }
 0x39f   :  { %v2409_v34 = vadd.f32 %v2408_v49, %v2407_v4  ;;  %v2358_v10 = vadd.f32 %v2357_v7, %v2356_v43  ;;  %v5041_v49 = vpop.permute.xlu0 %2532 }
 0x3a1   :  { %v2411_v11 = vadd.f32 %v2410_v42, %v2409_v34  ;;  %v2360_v31 = vadd.f32 %v2359_v23, %v2358_v10  ;;  %v5043_v10 = vpop.permute.xlu1 %2538 }
 0x3a3   :  { %v2413_v19 = vadd.f32 %v2412_v18, %v2411_v11  ;;  %v5045_v42 = vpop.permute.xlu0 %2536 }
 0x3a5   :  { %v5047_v11 = vpop.permute.xlu1 %2542 }
 0x3a7   :  { %v5049_v23 = vpop.permute.xlu0 %2540 }
 0x3b2   :  { %v5001_v62 = vpop.f32.mrf.mxu1 }
 0x3b3   :  { %v2389_v54 = vmul.f32 %v5001_v62, %v5001_v62  ;;  %v2365_v44 = vsel %vm751_vm4, %v5001_v62, 0.0 }
 0x3b4   :  { %v5006_v20 = vpop.f32.mrf.mxu1 }
 0x3b5   :  { %v2361_v14 = vsel %vm751_vm4, %v5006_v20, 0.0  ;;  %v2387_v56 = vmul.f32 %v5006_v20, %v5006_v20  ;;  %v2418_v52 = vsel %vm751_vm4, %v2389_v54, 0.0 }
 0x3b6   :  { %v5014_v48 = vpop.f32.mrf.mxu1  ;;  %v2362_v13 = vadd.f32 %v2361_v14, %v2360_v31  ;;  %v5051_v14 = vpop.permute.xlu1 %2546 }
 0x3b7   :  { %v2414_v5 = vsel %vm751_vm4, %v2387_v56, 0.0  ;;  %v2390_v59 = vmul.f32 %v5014_v48, %v5014_v48  ;;  %v2367_v46 = vsel %vm751_vm4, %v5014_v48, 0.0  ;;  %v5053_v56 = vpop.permute.xlu0 %2544 }
 0x3b8   :  { %v5018_v50 = vpop.f32.mrf.mxu1  ;;  %v2415_v30 = vadd.f32 %v2414_v5, %v2413_v19 }
 0x3b9   :  { %v2363_v21 = vsel %vm751_vm4, %v5018_v50, 0.0  ;;  %v2388_v12 = vmul.f32 %v5018_v50, %v5018_v50  ;;  %v2420_v8 = vsel %vm751_vm4, %v2390_v59, 0.0 }
 0x3ba   :  { %v2364_v45 = vadd.f32 %v2363_v21, %v2362_v13 }
 0x3bb   :  { %v2416_v32 = vsel %vm751_vm4, %v2388_v12, 0.0 }
 0x3bc   :  { %v2366_v24 = vadd.f32 %v2365_v44, %v2364_v45  ;;  %v2417_v22 = vadd.f32 %v2416_v32, %v2415_v30 }
 0x3be   :  { %v2368_v60 = vadd.f32 %v2367_v46, %v2366_v24  ;;  %v2419_v41 = vadd.f32 %v2418_v52, %v2417_v22 }
 0x3c0   :  { %v2369_v26 = vrot.slane %v2368_v60, 4  ;;  %v2421_v29 = vadd.f32 %v2420_v8, %v2419_v41 }
 0x3c2   :  { %v2370_v27 = vadd.f32 %v2369_v26, %v2368_v60  ;;  %v2422_v35 = vrot.slane %v2421_v29, 4 }
 0x3c4   :  { %v2371_v28 = vrot.slane %v2370_v27, 2  ;;  %v2423_v9 = vadd.f32 %v2422_v35, %v2421_v29 }
 0x3c6   :  { %v2372_v25 = vadd.f32 %v2371_v28, %v2370_v27  ;;  %v2424_v0 = vrot.slane %v2423_v9, 2 }
 0x3c8   :  { %v2373_v63 = vrot.slane %v2372_v25, 1  ;;  %v2425_v57 = vadd.f32 %v2424_v0, %v2423_v9 }
 0x3ca   :  { %v2374_v3 = vadd.f32 %v2373_v63, %v2372_v25  ;;  %v2426_v47 = vrot.slane %v2425_v57, 1  ;;  %v2703_v63 = vld [vmem:[%s5162_s9] ss:$0 sm:$0xff] }
 0x3cc   :  { %v2427_v4 = vadd.f32 %v2426_v47, %v2425_v57  ;;  %v2428_v43 = vmul.f32 0.0078125, %v2374_v3 }
 0x3ce   :  { %v2429_v37 = vmul.f32 0.0078125, %v2427_v4  ;;  %v2430_v34 = vmul.f32 %v2428_v43, %v2428_v43  ;;  %v2432_v31 = vsub.f32 %v4925_v15, %v2428_v43  ;;  %v2433_v18 = vsub.f32 %v4929_v2, %v2428_v43 }
 0x3cf   :  { %v2434_v5 = vsub.f32 %v4923_v51, %v2428_v43  ;;  %v2435_v13 = vsub.f32 %v4927_v53, %v2428_v43  ;;  %v2436_v19 = vsub.f32 %v4933_v16, %v2428_v43  ;;  %v2437_v54 = vsub.f32 %v4949_v39, %v2428_v43 }
 0x3d0   :  { %v2431_v7 = vsub.f32 %v2429_v37, %v2430_v34  ;;  %v2438_v21 = vsub.f32 %v4931_v17, %v2428_v43  ;;  %v2439_v12 = vsub.f32 %v4941_v61, %v2428_v43  ;;  %v2440_v30 = vsub.f32 %v4966_v38, %v2428_v43 }
 0x3d1   :  { %v2441_v45 = vsub.f32 %v4979_v1, %v2428_v43  ;;  %v2442_v15 = vsub.f32 %v4953_v55, %v2428_v43  ;;  %v2443_v2 = vsub.f32 %v4973_v36, %v2428_v43  ;;  %v2444_v51 = vsub.f32 %v5006_v20, %v2428_v43  ;;  %v2702_v55 = vld [vmem:[%s5161_s8] ss:$0 sm:$0xff]  ;;  %v2551_v36 = vpop.permute.xlu1 %2550  ;;  %v2549_v20 = vpop.permute.xlu0 %2548 }
 0x3d2   :  { %v2448_v40 = vadd.f32 1e-05, %v2431_v7  ;;  %v2445_v53 = vsub.f32 %v5018_v50, %v2428_v43  ;;  %v2446_v16 = vsub.f32 %v5001_v62, %v2428_v43  ;;  %v2447_v39 = vsub.f32 %v5014_v48, %v2428_v43 }
 0x3d4   :  { %3432 = vrsqrt.f32 %v2448_v40 }
 0x3d5   :  { %v2555_v40 = vpop.permute.xlu1 %2554 }
 0x3e1   :  { %v3433_v44 = vpop.eup %3432 }
 0x3e2   :  { %v2450_v17 = vmul.f32 %v3433_v44, %v2432_v31  ;;  %v2451_v59 = vmul.f32 %v3433_v44, %v2433_v18  ;;  %v2452_v61 = vmul.f32 %v3433_v44, %v2434_v5  ;;  %v2453_v32 = vmul.f32 %v3433_v44, %v2435_v13  ;;  %v2553_v31 = vpop.permute.xlu0 %2552 }
 0x3e3   :  { %v2454_v38 = vmul.f32 %v3433_v44, %v2436_v19  ;;  %v2455_v24 = vmul.f32 %v3433_v44, %v2437_v54  ;;  %v2456_v1 = vmul.f32 %v3433_v44, %v2438_v21  ;;  %v2457_v22 = vmul.f32 %v3433_v44, %v2439_v12 }
 0x3e4   :  { %v2458_v52 = vmul.f32 %v3433_v44, %v2440_v30  ;;  %v2459_v50 = vmul.f32 %v3433_v44, %v2441_v45  ;;  %v2460_v46 = vmul.f32 %v3433_v44, %v2442_v15  ;;  %v2461_v62 = vmul.f32 %v3433_v44, %v2443_v2 }
 0x3e5   :  { %v2462_v60 = vmul.f32 %v3433_v44, %v2444_v51  ;;  %v2463_v48 = vmul.f32 %v3433_v44, %v2445_v53  ;;  %v2464_v41 = vmul.f32 %v3433_v44, %v2446_v16  ;;  %v2465_v8 = vmul.f32 %v3433_v44, %v2447_v39 }
 0x3e6   :  { %v2473_v26 = vmul.f32 %v2702_v55, %v2450_v17  ;;  %v2474_v29 = vmul.f32 %v2702_v55, %v2451_v59  ;;  %v2475_v27 = vmul.f32 %v2702_v55, %v2452_v61  ;;  %v2476_v35 = vmul.f32 %v2702_v55, %v2453_v32 }
 0x3e7   :  { %v2477_v28 = vmul.f32 %v2702_v55, %v2454_v38  ;;  %v2478_v9 = vmul.f32 %v2702_v55, %v2455_v24  ;;  %v2479_v25 = vmul.f32 %v2702_v55, %v2456_v1  ;;  %v2480_v0 = vmul.f32 %v2702_v55, %v2457_v22 }
 0x3e8   :  { %v2481_v57 = vmul.f32 %v2702_v55, %v2458_v52  ;;  %v2482_v3 = vmul.f32 %v2702_v55, %v2459_v50  ;;  %v2483_v47 = vmul.f32 %v2702_v55, %v2460_v46  ;;  %v2484_v4 = vmul.f32 %v2702_v55, %v2461_v62  ;;  %v2557_v52 = vpop.permute.xlu0 %2556 }
 0x3e9   :  { %v2485_v43 = vmul.f32 %v2702_v55, %v2462_v60  ;;  %v2486_v37 = vmul.f32 %v2702_v55, %v2463_v48  ;;  %v2487_v34 = vmul.f32 %v2702_v55, %v2464_v41  ;;  %v2488_v7 = vmul.f32 %v2702_v55, %v2465_v8  ;;  %v2559_v55 = vpop.permute.xlu1 %2558 }
 0x3ea   :  { %v2496_v18 = vadd.f32 %v2703_v63, %v2473_v26  ;;  %v2497_v5 = vadd.f32 %v2703_v63, %v2474_v29  ;;  %v2498_v13 = vadd.f32 %v2703_v63, %v2475_v27  ;;  %v2499_v19 = vadd.f32 %v2703_v63, %v2476_v35 }
 0x3eb   :  { %v2500_v54 = vadd.f32 %v2703_v63, %v2477_v28  ;;  %v2501_v21 = vadd.f32 %v2703_v63, %v2478_v9  ;;  %v2502_v12 = vadd.f32 %v2703_v63, %v2479_v25  ;;  %v2503_v30 = vadd.f32 %v2703_v63, %v2480_v0 }
 0x3ec   :  { %v2504_v45 = vadd.f32 %v2703_v63, %v2481_v57  ;;  %v2505_v15 = vadd.f32 %v2703_v63, %v2482_v3  ;;  %v2506_v2 = vadd.f32 %v2703_v63, %v2483_v47  ;;  %v2507_v44 = vadd.f32 %v2703_v63, %v2484_v4 }
 0x3ed   :  { %v2508_v51 = vadd.f32 %v2703_v63, %v2485_v43  ;;  %v2509_v53 = vadd.f32 %v2703_v63, %v2486_v37  ;;  %v2510_v16 = vadd.f32 %v2703_v63, %v2487_v34  ;;  %v2511_v39 = vadd.f32 %v2703_v63, %v2488_v7 }
 0x3ee   :  { %v2576_v17 = vadd.f32 %v5037_v58, %v2496_v18  ;;  %v2577_v59 = vadd.f32 %v5035_v6, %v2497_v5  ;;  %v2578_v61 = vadd.f32 %v5041_v49, %v2498_v13  ;;  %v2579_v32 = vadd.f32 %v5039_v33, %v2499_v19 }
 0x3ef   :  { %v2580_v38 = vadd.f32 %v5045_v42, %v2500_v54  ;;  %v2581_v24 = vadd.f32 %v5043_v10, %v2501_v21  ;;  %v2582_v1 = vadd.f32 %v5049_v23, %v2502_v12  ;;  %v2583_v22 = vadd.f32 %v5047_v11, %v2503_v30 }
 0x3f0   :  { %v2584_v50 = vadd.f32 %v5053_v56, %v2504_v45  ;;  %v2585_v58 = vadd.f32 %v5051_v14, %v2505_v15  ;;  %v2586_v46 = vadd.f32 %v2549_v20, %v2506_v2  ;;  %v2587_v6 = vadd.f32 %v2551_v36, %v2507_v44 }
 0x3f1   :  { %v2588_v62 = vadd.f32 %v2553_v31, %v2508_v51  ;;  %v2589_v49 = vadd.f32 %v2555_v40, %v2509_v53  ;;  %v2590_v60 = vadd.f32 %v2557_v52, %v2510_v16  ;;  %v2591_v33 = vadd.f32 %v2559_v55, %v2511_v39 }
 0x3f2   :  { %v2592_v48 = vmax.f32 %v2576_v17, 0.0  ;;  %v2593_v42 = vmax.f32 %v2577_v59, 0.0  ;;  %v2594_v41 = vmax.f32 %v2578_v61, 0.0  ;;  %v2595_v10 = vmax.f32 %v2579_v32, 0.0 }
 0x3f3   :  { %v2596_v8 = vmax.f32 %v2580_v38, 0.0  ;;  %v2597_v23 = vmax.f32 %v2581_v24, 0.0  ;;  %v2598_v26 = vmax.f32 %v2582_v1, 0.0  ;;  %v2599_v11 = vmax.f32 %v2583_v22, 0.0 }
 0x3f4   :  { %v2600_v29 = vmax.f32 %v2584_v50, 0.0  ;;  %v2601_v27 = vmax.f32 %v2585_v58, 0.0  ;;  %v2602_v35 = vmax.f32 %v2586_v46, 0.0  ;;  %v2603_v56 = vmax.f32 %v2587_v6, 0.0  ;;  %2608 = vst.msk [vmem:[%s5163_s12] sm:$0xff] %vm751_vm4, %v2592_v48  ;;  %2609 = vst.msk [vmem:[%s5163_s12 + $0x8] sm:$0xff] %vm751_vm4, %v2593_v42 }
 0x3f5   :  { %2610 = vst.msk [vmem:[%s5163_s12 + $0x10] sm:$0xff] %vm751_vm4, %v2594_v41  ;;  %2611 = vst.msk [vmem:[%s5163_s12 + $0x18] sm:$0xff] %vm751_vm4, %v2595_v10  ;;  %v2604_v14 = vmax.f32 %v2588_v62, 0.0  ;;  %v2605_v36 = vmax.f32 %v2589_v49, 0.0  ;;  %v2606_v20 = vmax.f32 %v2590_v60, 0.0  ;;  %v2607_v28 = vmax.f32 %v2591_v33, 0.0 }
 0x3f6   :  { %2612 = vst.msk [vmem:[%s5163_s12 + $0x20] sm:$0xff] %vm751_vm4, %v2596_v8  ;;  %2613 = vst.msk [vmem:[%s5163_s12 + $0x28] sm:$0xff] %vm751_vm4, %v2597_v23 }
 0x3f7   :  { %2614 = vst.msk [vmem:[%s5163_s12 + $0x30] sm:$0xff] %vm751_vm4, %v2598_v26  ;;  %2615 = vst.msk [vmem:[%s5163_s12 + $0x38] sm:$0xff] %vm751_vm4, %v2599_v11 }
 0x3f8   :  { %2616 = vst.msk [vmem:[%s5163_s12 + $0x40] sm:$0xff] %vm751_vm4, %v2600_v29  ;;  %2617 = vst.msk [vmem:[%s5163_s12 + $0x48] sm:$0xff] %vm751_vm4, %v2601_v27 }
 0x3f9   :  { %2618 = vst.msk [vmem:[%s5163_s12 + $0x50] sm:$0xff] %vm751_vm4, %v2602_v35  ;;  %2619 = vst.msk [vmem:[%s5163_s12 + $0x58] sm:$0xff] %vm751_vm4, %v2603_v56 }
 0x3fa   :  { %2620 = vst.msk [vmem:[%s5163_s12 + $0x60] sm:$0xff] %vm751_vm4, %v2604_v14  ;;  %2621 = vst.msk [vmem:[%s5163_s12 + $0x68] sm:$0xff] %vm751_vm4, %v2605_v36 }
 0x3fb   :  { %2622 = vst.msk [vmem:[%s5163_s12 + $0x70] sm:$0xff] %vm751_vm4, %v2606_v20  ;;  %2623 = vst.msk [vmem:[%s5163_s12 + $0x78] sm:$0xff] %vm751_vm4, %v2607_v28 }

</bundles_post_ra>
